<compile_context>
chip_gen: v7x
topology: tpu7x:2x2x1
jax: 0.10.0
libtpu: 0.0.40
codegen_flags: <defaults>
</compile_context>

<pallas_src>
import jax
import jax.numpy as jnp
from jax.experimental import pallas as pl
from jax.experimental.pallas import tpu as pltpu

LANE = 128


def _round_up(x, m):
    return (x + m - 1) // m * m


def _pick_tile_h(H, target):
    th = max(2, min(target, H))
    while H % th != 0:
        th -= 1
    if th < 2:
        th = H
    return th


def basic_block_kernel(x_ref, w1_ref, w2_ref, s0_ref, b0_ref, s1_ref, b1_ref,
                       o_ref, tap_ref):
    # x_ref  : (1, H+4, W, Cp) f32   whole image, H padded with 2 zero rows/side
    # w*_ref : (3, 3*Cp, Cp)   bf16  K-packed weights (k = dw*Cp + cin), per dh
    # s*/b*  : (1, Cp)         f32   folded eval-mode BN scale / bias
    # o_ref  : (1, TH, W, Cp)  f32   output tile (image rows h*TH .. h*TH+TH)
    # tap_ref: (TH+4, W, 3*Cp) bf16  K-packed tap scratch (reused by both convs)
    _, TH, W, Cp = o_ref.shape
    K3 = 3 * Cp
    h = pl.program_id(1)
    last = pl.num_programs(1) - 1

    def fill_taps(act, nrows):
        # act: (nrows, W, Cp) f32, already BN+ReLU'd.  Writes
        #   tap_ref[i, w, dw*Cp + c] = zero-width-padded(act)[i, w + dw - 1, c]
        # using three full-width, lane-aligned (unmasked) stores; the W-halo
        # zeros come from the concatenated zero column (value-domain shift).
        zc = jnp.zeros((nrows, 1, Cp), jnp.float32)
        left = jnp.concatenate([zc, act[:, :W - 1, :]], axis=1)     # dw = 0
        right = jnp.concatenate([act[:, 1:, :], zc], axis=1)        # dw = 2
        tap_ref[0:nrows, :, 0:Cp] = left.astype(jnp.bfloat16)
        tap_ref[0:nrows, :, Cp:2 * Cp] = act.astype(jnp.bfloat16)
        tap_ref[0:nrows, :, 2 * Cp:K3] = right.astype(jnp.bfloat16)

    def conv3x3(w_ref, nrows_out):
        # nrows_out output rows from nrows_out+2 tap rows: 3 fat MXU matmuls
        # (M = nrows_out*W, K = 3*Cp, N = Cp) summed in a local value — no
        # read-modify-write accumulator; f32 accumulation on the MXU.
        out = None
        for dh in range(3):
            patch = tap_ref[dh:dh + nrows_out].reshape(nrows_out * W, K3)
            contrib = jnp.dot(patch, w_ref[dh],
                              preferred_element_type=jnp.float32)
            out = contrib if out is None else out + contrib
        return out                                       # (nrows_out*W, Cp) f32

    r0 = h * TH        # first halo row in the padded image (= image row h*TH - 2)

    # ---- bn0 + relu fused into the conv1 tap fill (TH+4 halo rows) ----------
    x_halo = x_ref[0, pl.ds(r0, TH + 4), :, :]            # (TH+4, W, Cp) f32
    a0 = jnp.maximum(x_halo * s0_ref[...] + b0_ref[...], 0.0)
    fill_taps(a0, TH + 4)

    # Out-of-image halo rows must be zero *after* bn0 (the BN bias makes the
    # zero-padded x rows non-zero), so zero them at the image boundaries.
    # Kept per-step so it is independent of grid sharding across TensorCores.
    @pl.when(h == 0)
    def _():
        tap_ref[0:2] = jnp.zeros((2, W, K3), jnp.bfloat16)

    @pl.when(h == last)
    def _():
        tap_ref[TH + 2:TH + 4] = jnp.zeros((2, W, K3), jnp.bfloat16)

    # ---- conv1 over TH+2 rows (1-row halo for conv2), bn1 + relu fused ------
    c1 = conv3x3(w1_ref, TH + 2)                           # ((TH+2)*W, Cp) f32
    a1 = jnp.maximum(c1 * s1_ref[...] + b1_ref[...], 0.0)
    fill_taps(a1.reshape(TH + 2, W, Cp), TH + 2)

    @pl.when(h == 0)
    def _():
        tap_ref[0:1] = jnp.zeros((1, W, K3), jnp.bfloat16)

    @pl.when(h == last)
    def _():
        tap_ref[TH + 1:TH + 2] = jnp.zeros((1, W, K3), jnp.bfloat16)

    # ---- conv2 over TH rows; residual add fused into the single output store
    c2 = conv3x3(w2_ref, TH)                               # (TH*W, Cp) f32
    x_res = x_ref[0, pl.ds(r0 + 2, TH), :, :]              # re-read (short live range)
    o_ref[0] = (c2.reshape(TH, W, Cp) + x_res).astype(o_ref.dtype)


def basic_block_forward(x_nchw, w1_oihw, w2_oihw, bn0, bn1, *, tile_h=32):
    """x_nchw: (N, Cin, H, W) f32. Returns (N, Cout, H, W) f32."""
    N, Cin, H, W = x_nchw.shape
    Cout = w1_oihw.shape[0]
    assert Cin == Cout, "identity residual requires inplanes == planes"
    assert W % 8 == 0, "W must be a multiple of 8 (see TODO above)"
    Cp = _round_up(Cin, LANE)
    TH = _pick_tile_h(H, tile_h)
    n_tiles = H // TH

    # NCHW -> NHWC, pad channels to the lane width, pad H with the 2-row halo.
    x = jnp.transpose(x_nchw, (0, 2, 3, 1)).astype(jnp.float32)
    x = jnp.pad(x, ((0, 0), (2, 2), (0, 0), (0, Cp - Cin)))

    def prep_w(w_oihw):
        w = jnp.transpose(w_oihw, (2, 3, 1, 0))                   # OIHW -> HWIO
        w = jnp.pad(w, ((0, 0), (0, 0),
                        (0, Cp - w.shape[2]), (0, Cp - w.shape[3])))
        # (3, 3, Cp, Cp) -> (3, 3*Cp, Cp): k = dw*Cp + cin, matching the taps.
        return w.reshape(3, 3 * Cp, Cp).astype(jnp.bfloat16)

    w1 = prep_w(w1_oihw)
    w2 = prep_w(w2_oihw)

    def fold(bn):                                                 # eval-mode BN fold
        g, b, m, v, eps = bn
        s = g / jnp.sqrt(v + eps)
        bias = b - m * s
        s = jnp.pad(s.astype(jnp.float32), (0, Cp - s.shape[0]))
        bias = jnp.pad(bias.astype(jnp.float32), (0, Cp - bias.shape[0]))
        return s.reshape(1, Cp), bias.reshape(1, Cp)

    s0, bb0 = fold(bn0)
    s1, bb1 = fold(bn1)

    # VMEM budget: whole-image x block + per-tile out (both double-buffered),
    # bf16 weights (double-buffered), bf16 tap scratch, headroom for the local
    # matmul-sum / activation value temps.
    vmem_bytes = (2 * (H + 4) * W * Cp * 4
                  + 2 * TH * W * Cp * 4
                  + 2 * 2 * 3 * 3 * Cp * Cp * 2
                  + (TH + 4) * W * 3 * Cp * 2
                  + 6 * (TH + 4) * W * Cp * 4
                  + (2 << 20))
    vmem_limit = int(min(max(vmem_bytes, 16 << 20), 100 << 20))

    cost = pl.CostEstimate(
        flops=int(2 * 2 * N * H * W * 9 * Cp * Cp),               # two 3x3 convs
        transcendentals=0,
        bytes_accessed=int(N * (H + 4) * W * Cp * 4 + N * H * W * Cp * 4
                           + 2 * 3 * 3 * Cp * Cp * 2))

    out = pl.pallas_call(
        basic_block_kernel,
        out_shape=jax.ShapeDtypeStruct((N, H, W, Cp), jnp.float32),
        grid_spec=pltpu.PrefetchScalarGridSpec(
            num_scalar_prefetch=0,
            grid=(N, n_tiles),
            in_specs=[
                pl.BlockSpec((1, H + 4, W, Cp), lambda n, h: (n, 0, 0, 0)),
                pl.BlockSpec((3, 3 * Cp, Cp), lambda n, h: (0, 0, 0)),
                pl.BlockSpec((3, 3 * Cp, Cp), lambda n, h: (0, 0, 0)),
                pl.BlockSpec((1, Cp), lambda n, h: (0, 0)),
                pl.BlockSpec((1, Cp), lambda n, h: (0, 0)),
                pl.BlockSpec((1, Cp), lambda n, h: (0, 0)),
                pl.BlockSpec((1, Cp), lambda n, h: (0, 0)),
            ],
            out_specs=pl.BlockSpec((1, TH, W, Cp), lambda n, h: (n, h, 0, 0)),
            scratch_shapes=[
                pltpu.VMEM((TH + 4, W, 3 * Cp), jnp.bfloat16),    # tap buffer
            ],
        ),
        compiler_params=pltpu.CompilerParams(
            dimension_semantics=("parallel", "parallel"),
            vmem_limit_bytes=vmem_limit),
        cost_estimate=cost,
    )(x, w1, w2, s0, bb0, s1, bb1)

    out = out[:, :, :, :Cout]                                     # drop channel pad
    return jnp.transpose(out, (0, 3, 1, 2))                       # NHWC -> NCHW


# ---------------- pure-JAX reference (NCHW, like PyTorch) --------------------
def ref_forward(x, w1, w2, bn0, bn1):
    def bn(y, p):
        g, b, m, v, eps = p
        sh = (1, -1, 1, 1)
        return (y - m.reshape(sh)) / jnp.sqrt(v.reshape(sh) + eps) \
            * g.reshape(sh) + b.reshape(sh)

    def conv(y, w):
        return jax.lax.conv_general_dilated(
            y, w, window_strides=(1, 1), padding=((1, 1), (1, 1)),
            dimension_numbers=('NCHW', 'OIHW', 'NCHW'))

    out = jax.nn.relu(bn(x, bn0))
    out = conv(out, w1)
    out = jax.nn.relu(bn(out, bn1))
    out = conv(out, w2)
    return out + x


if __name__ == "__main__":
    N, C, H, W = 2, 4, 16, 16          # inplanes = planes = 4, stride = 1
    key = jax.random.PRNGKey(0)
    ks = jax.random.split(key, 11)

    x = jax.random.normal(ks[0], (N, C, H, W), jnp.float32)
    w1 = 0.1 * jax.random.normal(ks[1], (C, C, 3, 3), jnp.float32)   # OIHW
    w2 = 0.1 * jax.random.normal(ks[2], (C, C, 3, 3), jnp.float32)   # OIHW

    eps = 1e-5
    bn0 = (1.0 + 0.1 * jax.random.normal(ks[3], (C,), jnp.float32),  # gamma
           0.1 * jax.random.normal(ks[4], (C,), jnp.float32),        # beta
           0.1 * jax.random.normal(ks[5], (C,), jnp.float32),        # running_mean
           0.5 + jax.nn.softplus(jax.random.normal(ks[6], (C,), jnp.float32)),  # running_var
           eps)
    bn1 = (1.0 + 0.1 * jax.random.normal(ks[7], (C,), jnp.float32),
           0.1 * jax.random.normal(ks[8], (C,), jnp.float32),
           0.1 * jax.random.normal(ks[9], (C,), jnp.float32),
           0.5 + jax.nn.softplus(jax.random.normal(ks[10], (C,), jnp.float32)),
           eps)

    # tile_h=8 -> two H-tiles per image: exercises the halo / boundary masking.
    out = basic_block_forward(x, w1, w2, bn0, bn1, tile_h=8)
    out = jax.block_until_ready(out)

    ref = ref_forward(x, w1, w2, bn0, bn1)
    assert out.shape == ref.shape == (N, C, H, W)
    # bf16 MXU operands (f32 accumulation) -> compare with bf16-level tolerance.
    max_err = jnp.max(jnp.abs(out - ref))
    assert jnp.allclose(out, ref, rtol=5e-2, atol=5e-2), \
        f"max abs err {max_err}"

    print("KERNEL_OK")
</pallas_src>

<mosaic_0001>
module attributes {stable_mosaic.version = 11 : i64} {
  func.func @basic_block_kernel(%arg0: i32, %arg1: i32, %arg2: memref<1x20x16x128xf32, #tpu.memory_space<vmem>>, %arg3: memref<3x384x128xbf16, #tpu.memory_space<vmem>>, %arg4: memref<3x384x128xbf16, #tpu.memory_space<vmem>>, %arg5: memref<1x128xf32, #tpu.memory_space<vmem>>, %arg6: memref<1x128xf32, #tpu.memory_space<vmem>>, %arg7: memref<1x128xf32, #tpu.memory_space<vmem>>, %arg8: memref<1x128xf32, #tpu.memory_space<vmem>>, %arg9: memref<1x8x16x128xf32, #tpu.memory_space<vmem>>, %arg10: memref<12x16x384xbf16, #tpu.memory_space<vmem>>) attributes {dimension_semantics = [#tpu.dimension_semantics<parallel>, #tpu.dimension_semantics<parallel>], iteration_bounds = array<i64: 2, 2>, scalar_prefetch = 0 : i64, scratch_operands = 1 : i64, tpu.core_type = #tpu.core_type<tc>, window_params = [{transform_indices = @transform_0, window_bounds = array<i64: 1, 20, 16, 128>}, {pipeline_mode = #tpu.pipeline_mode<synchronous>, transform_indices = @transform_1, window_bounds = array<i64: 3, 384, 128>}, {pipeline_mode = #tpu.pipeline_mode<synchronous>, transform_indices = @transform_2, window_bounds = array<i64: 3, 384, 128>}, {pipeline_mode = #tpu.pipeline_mode<synchronous>, transform_indices = @transform_3, window_bounds = array<i64: 1, 128>}, {pipeline_mode = #tpu.pipeline_mode<synchronous>, transform_indices = @transform_4, window_bounds = array<i64: 1, 128>}, {pipeline_mode = #tpu.pipeline_mode<synchronous>, transform_indices = @transform_5, window_bounds = array<i64: 1, 128>}, {pipeline_mode = #tpu.pipeline_mode<synchronous>, transform_indices = @transform_6, window_bounds = array<i64: 1, 128>}, {transform_indices = @transform_7, window_bounds = array<i64: 1, 8, 16, 128>}]} {
    %c8_i32 = arith.constant 8 : i32
    %0 = arith.muli %arg1, %c8_i32 : i32
    %c0 = arith.constant 0 : index
    %1 = arith.index_cast %0 : i32 to index
    %c0_0 = arith.constant 0 : index
    %c0_1 = arith.constant 0 : index
    %2 = vector.load %arg2[%c0, %1, %c0_0, %c0_1] : memref<1x20x16x128xf32, #tpu.memory_space<vmem>>, vector<1x12x16x128xf32>
    %3 = vector.shape_cast %2 : vector<1x12x16x128xf32> to vector<12x16x128xf32>
    %c0_2 = arith.constant 0 : index
    %c0_3 = arith.constant 0 : index
    %4 = vector.load %arg5[%c0_2, %c0_3] : memref<1x128xf32, #tpu.memory_space<vmem>>, vector<1x128xf32>
    %5 = vector.shape_cast %4 : vector<1x128xf32> to vector<1x1x128xf32>
    %6 = vector.broadcast %5 : vector<1x1x128xf32> to vector<12x16x128xf32>
    %7 = arith.mulf %3, %6 : vector<12x16x128xf32>
    %c0_4 = arith.constant 0 : index
    %c0_5 = arith.constant 0 : index
    %8 = vector.load %arg6[%c0_4, %c0_5] : memref<1x128xf32, #tpu.memory_space<vmem>>, vector<1x128xf32>
    %9 = vector.shape_cast %8 : vector<1x128xf32> to vector<1x1x128xf32>
    %10 = vector.broadcast %9 : vector<1x1x128xf32> to vector<12x16x128xf32>
    %11 = arith.addf %7, %10 : vector<12x16x128xf32>
    %cst = arith.constant 0.000000e+00 : f32
    %12 = vector.broadcast %cst : f32 to vector<12x16x128xf32>
    %13 = arith.maximumf %11, %12 : vector<12x16x128xf32>
    %cst_6 = arith.constant 0.000000e+00 : f32
    %14 = vector.broadcast %cst_6 : f32 to vector<12x1x128xf32>
    %15 = vector.extract_strided_slice %13 {offsets = [0, 0, 0], sizes = [12, 15, 128], strides = [1, 1, 1]} : vector<12x16x128xf32> to vector<12x15x128xf32>
    %16 = tpu.concatenate %14, %15 in 1 : vector<12x1x128xf32>, vector<12x15x128xf32> -> vector<12x16x128xf32>
    %17 = vector.extract_strided_slice %13 {offsets = [0, 1, 0], sizes = [12, 15, 128], strides = [1, 1, 1]} : vector<12x16x128xf32> to vector<12x15x128xf32>
    %18 = tpu.concatenate %17, %14 in 1 : vector<12x15x128xf32>, vector<12x1x128xf32> -> vector<12x16x128xf32>
    %19 = arith.truncf %16 : vector<12x16x128xf32> to vector<12x16x128xbf16>
    %c0_7 = arith.constant 0 : index
    %c0_8 = arith.constant 0 : index
    %c0_9 = arith.constant 0 : index
    %20 = vector.load %arg10[%c0_7, %c0_8, %c0_9] : memref<12x16x384xbf16, #tpu.memory_space<vmem>>, vector<12x16x128xbf16>
    tpu.vector_store %arg10[%c0_7, %c0_8, %c0_9], %19 {strides = array<i32>} : memref<12x16x384xbf16, #tpu.memory_space<vmem>>, vector<12x16x128xbf16>,
    %21 = arith.truncf %13 : vector<12x16x128xf32> to vector<12x16x128xbf16>
    %c0_10 = arith.constant 0 : index
    %c0_11 = arith.constant 0 : index
    %c128 = arith.constant 128 : index
    %22 = vector.load %arg10[%c0_10, %c0_11, %c128] : memref<12x16x384xbf16, #tpu.memory_space<vmem>>, vector<12x16x128xbf16>
    tpu.vector_store %arg10[%c0_10, %c0_11, %c128], %21 {strides = array<i32>} : memref<12x16x384xbf16, #tpu.memory_space<vmem>>, vector<12x16x128xbf16>,
    %23 = arith.truncf %18 : vector<12x16x128xf32> to vector<12x16x128xbf16>
    %c0_12 = arith.constant 0 : index
    %c0_13 = arith.constant 0 : index
    %c256 = arith.constant 256 : index
    %24 = vector.load %arg10[%c0_12, %c0_13, %c256] : memref<12x16x384xbf16, #tpu.memory_space<vmem>>, vector<12x16x128xbf16>
    tpu.vector_store %arg10[%c0_12, %c0_13, %c256], %23 {strides = array<i32>} : memref<12x16x384xbf16, #tpu.memory_space<vmem>>, vector<12x16x128xbf16>,
    %c0_i32 = arith.constant 0 : i32
    %25 = arith.cmpi eq, %arg1, %c0_i32 : i32
    %26 = arith.extui %25 : i1 to i32
    %c0_i32_14 = arith.constant 0 : i32
    %27 = arith.cmpi ne, %26, %c0_i32_14 : i32
    scf.if %27 {
      %cst_82 = arith.constant 0.000000e+00 : bf16
      %100 = vector.broadcast %cst_82 : bf16 to vector<2x16x384xbf16>
      %c0_83 = arith.constant 0 : index
      %c0_84 = arith.constant 0 : index
      %c0_85 = arith.constant 0 : index
      %101 = vector.load %arg10[%c0_83, %c0_84, %c0_85] : memref<12x16x384xbf16, #tpu.memory_space<vmem>>, vector<2x16x384xbf16>
      tpu.vector_store %arg10[%c0_83, %c0_84, %c0_85], %100 {strides = array<i32>} : memref<12x16x384xbf16, #tpu.memory_space<vmem>>, vector<2x16x384xbf16>,
    } else {
    }
    %c1_i32 = arith.constant 1 : i32
    %28 = arith.cmpi eq, %arg1, %c1_i32 : i32
    %29 = arith.extui %28 : i1 to i32
    %c0_i32_15 = arith.constant 0 : i32
    %30 = arith.cmpi ne, %29, %c0_i32_15 : i32
    scf.if %30 {
      %cst_82 = arith.constant 0.000000e+00 : bf16
      %100 = vector.broadcast %cst_82 : bf16 to vector<2x16x384xbf16>
      %c10 = arith.constant 10 : index
      %c0_83 = arith.constant 0 : index
      %c0_84 = arith.constant 0 : index
      %101 = vector.load %arg10[%c10, %c0_83, %c0_84] : memref<12x16x384xbf16, #tpu.memory_space<vmem>>, vector<2x16x384xbf16>
      tpu.vector_store %arg10[%c10, %c0_83, %c0_84], %100 {strides = array<i32>} : memref<12x16x384xbf16, #tpu.memory_space<vmem>>, vector<2x16x384xbf16>,
    } else {
    }
    %c0_16 = arith.constant 0 : index
    %c0_17 = arith.constant 0 : index
    %c0_18 = arith.constant 0 : index
    %31 = vector.load %arg10[%c0_16, %c0_17, %c0_18] : memref<12x16x384xbf16, #tpu.memory_space<vmem>>, vector<10x16x384xbf16>
    %32 = vector.shape_cast %31 : vector<10x16x384xbf16> to vector<160x384xbf16>
    %c0_19 = arith.constant 0 : index
    %c0_20 = arith.constant 0 : index
    %c0_21 = arith.constant 0 : index
    %33 = vector.load %arg3[%c0_19, %c0_20, %c0_21] : memref<3x384x128xbf16, #tpu.memory_space<vmem>>, vector<1x384x128xbf16>
    %34 = vector.shape_cast %33 : vector<1x384x128xbf16> to vector<384x128xbf16>
    %cst_22 = arith.constant dense<0.000000e+00> : vector<160x128xf32>
    %35 = tpu.matmul %32, %34, %cst_22 {dimension_numbers = #tpu.dot_dimension_numbers<[1], [0], [0], [1], [0, 0, 1, 1], [], []>} : vector<160x384xbf16>, vector<384x128xbf16>, vector<160x128xf32> -> vector<160x128xf32>
    %c1 = arith.constant 1 : index
    %c0_23 = arith.constant 0 : index
    %c0_24 = arith.constant 0 : index
    %36 = vector.load %arg10[%c1, %c0_23, %c0_24] : memref<12x16x384xbf16, #tpu.memory_space<vmem>>, vector<10x16x384xbf16>
    %37 = vector.shape_cast %36 : vector<10x16x384xbf16> to vector<160x384xbf16>
    %c1_25 = arith.constant 1 : index
    %c0_26 = arith.constant 0 : index
    %c0_27 = arith.constant 0 : index
    %38 = vector.load %arg3[%c1_25, %c0_26, %c0_27] : memref<3x384x128xbf16, #tpu.memory_space<vmem>>, vector<1x384x128xbf16>
    %39 = vector.shape_cast %38 : vector<1x384x128xbf16> to vector<384x128xbf16>
    %cst_28 = arith.constant dense<0.000000e+00> : vector<160x128xf32>
    %40 = tpu.matmul %37, %39, %cst_28 {dimension_numbers = #tpu.dot_dimension_numbers<[1], [0], [0], [1], [0, 0, 1, 1], [], []>} : vector<160x384xbf16>, vector<384x128xbf16>, vector<160x128xf32> -> vector<160x128xf32>
    %41 = arith.addf %35, %40 : vector<160x128xf32>
    %c2 = arith.constant 2 : index
    %c0_29 = arith.constant 0 : index
    %c0_30 = arith.constant 0 : index
    %42 = vector.load %arg10[%c2, %c0_29, %c0_30] : memref<12x16x384xbf16, #tpu.memory_space<vmem>>, vector<10x16x384xbf16>
    %43 = vector.shape_cast %42 : vector<10x16x384xbf16> to vector<160x384xbf16>
    %c2_31 = arith.constant 2 : index
    %c0_32 = arith.constant 0 : index
    %c0_33 = arith.constant 0 : index
    %44 = vector.load %arg3[%c2_31, %c0_32, %c0_33] : memref<3x384x128xbf16, #tpu.memory_space<vmem>>, vector<1x384x128xbf16>
    %45 = vector.shape_cast %44 : vector<1x384x128xbf16> to vector<384x128xbf16>
    %cst_34 = arith.constant dense<0.000000e+00> : vector<160x128xf32>
    %46 = tpu.matmul %43, %45, %cst_34 {dimension_numbers = #tpu.dot_dimension_numbers<[1], [0], [0], [1], [0, 0, 1, 1], [], []>} : vector<160x384xbf16>, vector<384x128xbf16>, vector<160x128xf32> -> vector<160x128xf32>
    %47 = arith.addf %41, %46 : vector<160x128xf32>
    %c0_35 = arith.constant 0 : index
    %c0_36 = arith.constant 0 : index
    %48 = vector.load %arg7[%c0_35, %c0_36] : memref<1x128xf32, #tpu.memory_space<vmem>>, vector<1x128xf32>
    %49 = vector.broadcast %48 : vector<1x128xf32> to vector<160x128xf32>
    %50 = arith.mulf %47, %49 : vector<160x128xf32>
    %c0_37 = arith.constant 0 : index
    %c0_38 = arith.constant 0 : index
    %51 = vector.load %arg8[%c0_37, %c0_38] : memref<1x128xf32, #tpu.memory_space<vmem>>, vector<1x128xf32>
    %52 = vector.broadcast %51 : vector<1x128xf32> to vector<160x128xf32>
    %53 = arith.addf %50, %52 : vector<160x128xf32>
    %cst_39 = arith.constant 0.000000e+00 : f32
    %54 = vector.broadcast %cst_39 : f32 to vector<160x128xf32>
    %55 = arith.maximumf %53, %54 : vector<160x128xf32>
    %56 = vector.shape_cast %55 : vector<160x128xf32> to vector<10x16x128xf32>
    %cst_40 = arith.constant 0.000000e+00 : f32
    %57 = vector.broadcast %cst_40 : f32 to vector<10x1x128xf32>
    %58 = vector.extract_strided_slice %56 {offsets = [0, 0, 0], sizes = [10, 15, 128], strides = [1, 1, 1]} : vector<10x16x128xf32> to vector<10x15x128xf32>
    %59 = tpu.concatenate %57, %58 in 1 : vector<10x1x128xf32>, vector<10x15x128xf32> -> vector<10x16x128xf32>
    %60 = vector.extract_strided_slice %56 {offsets = [0, 1, 0], sizes = [10, 15, 128], strides = [1, 1, 1]} : vector<10x16x128xf32> to vector<10x15x128xf32>
    %61 = tpu.concatenate %60, %57 in 1 : vector<10x15x128xf32>, vector<10x1x128xf32> -> vector<10x16x128xf32>
    %62 = arith.truncf %59 : vector<10x16x128xf32> to vector<10x16x128xbf16>
    %c0_41 = arith.constant 0 : index
    %c0_42 = arith.constant 0 : index
    %c0_43 = arith.constant 0 : index
    %63 = vector.load %arg10[%c0_41, %c0_42, %c0_43] : memref<12x16x384xbf16, #tpu.memory_space<vmem>>, vector<10x16x128xbf16>
    tpu.vector_store %arg10[%c0_41, %c0_42, %c0_43], %62 {strides = array<i32>} : memref<12x16x384xbf16, #tpu.memory_space<vmem>>, vector<10x16x128xbf16>,
    %64 = arith.truncf %56 : vector<10x16x128xf32> to vector<10x16x128xbf16>
    %c0_44 = arith.constant 0 : index
    %c0_45 = arith.constant 0 : index
    %c128_46 = arith.constant 128 : index
    %65 = vector.load %arg10[%c0_44, %c0_45, %c128_46] : memref<12x16x384xbf16, #tpu.memory_space<vmem>>, vector<10x16x128xbf16>
    tpu.vector_store %arg10[%c0_44, %c0_45, %c128_46], %64 {strides = array<i32>} : memref<12x16x384xbf16, #tpu.memory_space<vmem>>, vector<10x16x128xbf16>,
    %66 = arith.truncf %61 : vector<10x16x128xf32> to vector<10x16x128xbf16>
    %c0_47 = arith.constant 0 : index
    %c0_48 = arith.constant 0 : index
    %c256_49 = arith.constant 256 : index
    %67 = vector.load %arg10[%c0_47, %c0_48, %c256_49] : memref<12x16x384xbf16, #tpu.memory_space<vmem>>, vector<10x16x128xbf16>
    tpu.vector_store %arg10[%c0_47, %c0_48, %c256_49], %66 {strides = array<i32>} : memref<12x16x384xbf16, #tpu.memory_space<vmem>>, vector<10x16x128xbf16>,
    %c0_i32_50 = arith.constant 0 : i32
    %68 = arith.cmpi eq, %arg1, %c0_i32_50 : i32
    %69 = arith.extui %68 : i1 to i32
    %c0_i32_51 = arith.constant 0 : i32
    %70 = arith.cmpi ne, %69, %c0_i32_51 : i32
    scf.if %70 {
      %cst_82 = arith.constant 0.000000e+00 : bf16
      %100 = vector.broadcast %cst_82 : bf16 to vector<1x16x384xbf16>
      %c0_83 = arith.constant 0 : index
      %c0_84 = arith.constant 0 : index
      %c0_85 = arith.constant 0 : index
      %101 = vector.load %arg10[%c0_83, %c0_84, %c0_85] : memref<12x16x384xbf16, #tpu.memory_space<vmem>>, vector<1x16x384xbf16>
      tpu.vector_store %arg10[%c0_83, %c0_84, %c0_85], %100 {strides = array<i32>} : memref<12x16x384xbf16, #tpu.memory_space<vmem>>, vector<1x16x384xbf16>,
    } else {
    }
    %c1_i32_52 = arith.constant 1 : i32
    %71 = arith.cmpi eq, %arg1, %c1_i32_52 : i32
    %72 = arith.extui %71 : i1 to i32
    %c0_i32_53 = arith.constant 0 : i32
    %73 = arith.cmpi ne, %72, %c0_i32_53 : i32
    scf.if %73 {
      %cst_82 = arith.constant 0.000000e+00 : bf16
      %100 = vector.broadcast %cst_82 : bf16 to vector<1x16x384xbf16>
      %c9 = arith.constant 9 : index
      %c0_83 = arith.constant 0 : index
      %c0_84 = arith.constant 0 : index
      %101 = vector.load %arg10[%c9, %c0_83, %c0_84] : memref<12x16x384xbf16, #tpu.memory_space<vmem>>, vector<1x16x384xbf16>
      tpu.vector_store %arg10[%c9, %c0_83, %c0_84], %100 {strides = array<i32>} : memref<12x16x384xbf16, #tpu.memory_space<vmem>>, vector<1x16x384xbf16>,
    } else {
    }
    %c0_54 = arith.constant 0 : index
    %c0_55 = arith.constant 0 : index
    %c0_56 = arith.constant 0 : index
    %74 = vector.load %arg10[%c0_54, %c0_55, %c0_56] : memref<12x16x384xbf16, #tpu.memory_space<vmem>>, vector<8x16x384xbf16>
    %75 = vector.shape_cast %74 : vector<8x16x384xbf16> to vector<128x384xbf16>
    %c0_57 = arith.constant 0 : index
    %c0_58 = arith.constant 0 : index
    %c0_59 = arith.constant 0 : index
    %76 = vector.load %arg4[%c0_57, %c0_58, %c0_59] : memref<3x384x128xbf16, #tpu.memory_space<vmem>>, vector<1x384x128xbf16>
    %77 = vector.shape_cast %76 : vector<1x384x128xbf16> to vector<384x128xbf16>
    %cst_60 = arith.constant dense<0.000000e+00> : vector<128x128xf32>
    %78 = tpu.matmul %75, %77, %cst_60 {dimension_numbers = #tpu.dot_dimension_numbers<[1], [0], [0], [1], [0, 0, 1, 1], [], []>} : vector<128x384xbf16>, vector<384x128xbf16>, vector<128x128xf32> -> vector<128x128xf32>
    %c1_61 = arith.constant 1 : index
    %c0_62 = arith.constant 0 : index
    %c0_63 = arith.constant 0 : index
    %79 = vector.load %arg10[%c1_61, %c0_62, %c0_63] : memref<12x16x384xbf16, #tpu.memory_space<vmem>>, vector<8x16x384xbf16>
    %80 = vector.shape_cast %79 : vector<8x16x384xbf16> to vector<128x384xbf16>
    %c1_64 = arith.constant 1 : index
    %c0_65 = arith.constant 0 : index
    %c0_66 = arith.constant 0 : index
    %81 = vector.load %arg4[%c1_64, %c0_65, %c0_66] : memref<3x384x128xbf16, #tpu.memory_space<vmem>>, vector<1x384x128xbf16>
    %82 = vector.shape_cast %81 : vector<1x384x128xbf16> to vector<384x128xbf16>
    %cst_67 = arith.constant dense<0.000000e+00> : vector<128x128xf32>
    %83 = tpu.matmul %80, %82, %cst_67 {dimension_numbers = #tpu.dot_dimension_numbers<[1], [0], [0], [1], [0, 0, 1, 1], [], []>} : vector<128x384xbf16>, vector<384x128xbf16>, vector<128x128xf32> -> vector<128x128xf32>
    %84 = arith.addf %78, %83 : vector<128x128xf32>
    %c2_68 = arith.constant 2 : index
    %c0_69 = arith.constant 0 : index
    %c0_70 = arith.constant 0 : index
    %85 = vector.load %arg10[%c2_68, %c0_69, %c0_70] : memref<12x16x384xbf16, #tpu.memory_space<vmem>>, vector<8x16x384xbf16>
    %86 = vector.shape_cast %85 : vector<8x16x384xbf16> to vector<128x384xbf16>
    %c2_71 = arith.constant 2 : index
    %c0_72 = arith.constant 0 : index
    %c0_73 = arith.constant 0 : index
    %87 = vector.load %arg4[%c2_71, %c0_72, %c0_73] : memref<3x384x128xbf16, #tpu.memory_space<vmem>>, vector<1x384x128xbf16>
    %88 = vector.shape_cast %87 : vector<1x384x128xbf16> to vector<384x128xbf16>
    %cst_74 = arith.constant dense<0.000000e+00> : vector<128x128xf32>
    %89 = tpu.matmul %86, %88, %cst_74 {dimension_numbers = #tpu.dot_dimension_numbers<[1], [0], [0], [1], [0, 0, 1, 1], [], []>} : vector<128x384xbf16>, vector<384x128xbf16>, vector<128x128xf32> -> vector<128x128xf32>
    %90 = arith.addf %84, %89 : vector<128x128xf32>
    %c2_i32 = arith.constant 2 : i32
    %91 = arith.addi %0, %c2_i32 : i32
    %c0_75 = arith.constant 0 : index
    %92 = arith.index_cast %91 : i32 to index
    %c0_76 = arith.constant 0 : index
    %c0_77 = arith.constant 0 : index
    %93 = vector.load %arg2[%c0_75, %92, %c0_76, %c0_77] : memref<1x20x16x128xf32, #tpu.memory_space<vmem>>, vector<1x8x16x128xf32>
    %94 = vector.shape_cast %93 : vector<1x8x16x128xf32> to vector<8x16x128xf32>
    %95 = vector.shape_cast %90 : vector<128x128xf32> to vector<8x16x128xf32>
    %96 = arith.addf %95, %94 : vector<8x16x128xf32>
    %c0_78 = arith.constant 0 : index
    %c0_79 = arith.constant 0 : index
    %c0_80 = arith.constant 0 : index
    %c0_81 = arith.constant 0 : index
    %97 = vector.load %arg9[%c0_78, %c0_79, %c0_80, %c0_81] : memref<1x8x16x128xf32, #tpu.memory_space<vmem>>, vector<1x8x16x128xf32>
    %98 = vector.shape_cast %97 : vector<1x8x16x128xf32> to vector<8x16x128xf32>
    %99 = vector.shape_cast %96 : vector<8x16x128xf32> to vector<1x8x16x128xf32>
    tpu.vector_store %arg9[%c0_78, %c0_79, %c0_80, %c0_81], %99 {strides = array<i32>} : memref<1x8x16x128xf32, #tpu.memory_space<vmem>>, vector<1x8x16x128xf32>,
    return
  }
  func.func @transform_0(%arg0: i32, %arg1: i32) -> (i32, i32, i32, i32) {
    %c0_i32 = arith.constant 0 : i32
    %c0_i32_0 = arith.constant 0 : i32
    %c0_i32_1 = arith.constant 0 : i32
    %c0_i32_2 = arith.constant 0 : i32
    return %arg0, %c0_i32, %c0_i32_0, %c0_i32_1 : i32, i32, i32, i32
  }
  func.func @transform_1(%arg0: i32, %arg1: i32) -> (i32, i32, i32) {
    %c0_i32 = arith.constant 0 : i32
    %c0_i32_0 = arith.constant 0 : i32
    %c0_i32_1 = arith.constant 0 : i32
    %c0_i32_2 = arith.constant 0 : i32
    return %c0_i32, %c0_i32_0, %c0_i32_1 : i32, i32, i32
  }
  func.func @transform_2(%arg0: i32, %arg1: i32) -> (i32, i32, i32) {
    %c0_i32 = arith.constant 0 : i32
    %c0_i32_0 = arith.constant 0 : i32
    %c0_i32_1 = arith.constant 0 : i32
    %c0_i32_2 = arith.constant 0 : i32
    return %c0_i32, %c0_i32_0, %c0_i32_1 : i32, i32, i32
  }
  func.func @transform_3(%arg0: i32, %arg1: i32) -> (i32, i32) {
    %c0_i32 = arith.constant 0 : i32
    %c0_i32_0 = arith.constant 0 : i32
    %c0_i32_1 = arith.constant 0 : i32
    return %c0_i32, %c0_i32_0 : i32, i32
  }
  func.func @transform_4(%arg0: i32, %arg1: i32) -> (i32, i32) {
    %c0_i32 = arith.constant 0 : i32
    %c0_i32_0 = arith.constant 0 : i32
    %c0_i32_1 = arith.constant 0 : i32
    return %c0_i32, %c0_i32_0 : i32, i32
  }
  func.func @transform_5(%arg0: i32, %arg1: i32) -> (i32, i32) {
    %c0_i32 = arith.constant 0 : i32
    %c0_i32_0 = arith.constant 0 : i32
    %c0_i32_1 = arith.constant 0 : i32
    return %c0_i32, %c0_i32_0 : i32, i32
  }
  func.func @transform_6(%arg0: i32, %arg1: i32) -> (i32, i32) {
    %c0_i32 = arith.constant 0 : i32
    %c0_i32_0 = arith.constant 0 : i32
    %c0_i32_1 = arith.constant 0 : i32
    return %c0_i32, %c0_i32_0 : i32, i32
  }
  func.func @transform_7(%arg0: i32, %arg1: i32) -> (i32, i32, i32, i32) {
    %c0_i32 = arith.constant 0 : i32
    %c0_i32_0 = arith.constant 0 : i32
    %c0_i32_1 = arith.constant 0 : i32
    return %arg0, %arg1, %c0_i32, %c0_i32_0 : i32, i32, i32, i32
  }
}

</mosaic_0001>

<bundles_post_ra>
// kernel: tpu_custom_call.1
= control target key start
LH: loop header
LB: loop body
LE: loop exit
PB: predicated region body
PF: predicated region fallthrough
CT: control target
= control target key end

     0   :  { %s6656_s0 = inlined_call_operand.hbm [shape: f32[2,20,16,128], index: 0, kind: input, shape index: {}]   ;;  %s6657_s1 = inlined_call_operand.hbm [shape: bf16[3,384,128], index: 1, kind: input, shape index: {}]   ;;  %s6658_s2 = inlined_call_operand.hbm [shape: bf16[3,384,128], index: 2, kind: input, shape index: {}]   ;;  %s6659_s3 = inlined_call_operand.vmem [shape: f32[1,128], index: 3, kind: input, shape index: {}]   ;;  %s6660_s4 = inlined_call_operand.vmem [shape: f32[1,128], index: 4, kind: input, shape index: {}]   ;;  %s6661_s5 = inlined_call_operand.vmem [shape: f32[1,128], index: 5, kind: input, shape index: {}]   ;;  %s6662_s6 = inlined_call_operand.vmem [shape: f32[1,128], index: 6, kind: input, shape index: {}]   ;;  %s6663_s7 = inlined_call_operand.hbm [shape: f32[2,16,16,128], index: 7, kind: output, shape index: {}]  }
   0x1   :  { %6676 = sst [smem:[#allocation19_spill]] %s6657_s1 }
   0x2   :  { %6677 = sst [smem:[#allocation20_spill]] %s6658_s2 }
   0x3   :  { %6678 = sst [smem:[#allocation21_spill]] %s6662_s6 }
   0x4   :  { %6679 = sst [smem:[#allocation22_spill]] %s6663_s7 }
   0x5   :  { %12 = vsyncpa [#allocation4], 0 }
   0x6   :  { %14 = vsyncpa [#allocation4 + $0x1], 0 }
   0x7   :  { %15 = vsyncpa [#allocation7], 0 }
   0x8   :  { %16 = vsyncpa [#allocation5], 0 }
   0x9   :  { %18 = vsyncpa [#allocation5 + $0x1], 0  ;;  %s5448_s24 = smov 0   ;;  %s5450_s25 = smov 0  }
   0xa   :  { %s5452_s26 = smov 0   ;;  %s5454_s27 = smov 0  }
   0xb   :  { %s5456_s28 = smov 0   ;;  %s5458_s29 = smov 0  }
   0xc   :  { %s5460_s30 = smov 0   ;;  %s5462_s8 = smov 0  }
   0xd   :  { %s5464_s9 = smov 0   ;;  %s5466_s10 = smov 0  }
   0xe   :  { %s5468_s11 = smov 0  }
   0xf LB: > { %6680 = sst [smem:[#allocation13_spill]] %s5352_s24  ;;  %s3801_s12 = sadd.s32 4294967295, %s5392_s11   ;;  %s5392_s11 = sphi %s5468_s11, %s24_s11   ;;  %s5388_s10 = sphi %s5466_s10, %s6718_s10   ;;  %s5384_s9 = sphi %s5464_s9, %s6710_s9   ;;  %s5380_s8 = sphi %s5462_s8, %s6717_s8   ;;  %s5376_s30 = sphi %s5460_s30, %s6709_s30   ;;  %s5372_s29 = sphi %s5458_s29, %s6716_s29   ;;  %s5368_s28 = sphi %s5456_s28, %s6715_s28   ;;  %s5364_s27 = sphi %s5454_s27, %s6714_s27   ;;  %s5360_s26 = sphi %s5452_s26, %s6713_s26   ;;  %s5356_s25 = sphi %s5450_s25, %s6712_s25   ;;  %s5352_s24 = sphi %s5448_s24, %s6711_s24  }
  0x10   : > { %6681 = sst [smem:[#allocation14_spill]] %s5380_s8  ;;  %s3802_s13 = sadd.s32 4294967294, %s5392_s11  }
  0x11   : > { %6682 = sst [smem:[#allocation15_spill]] %s5384_s9  ;;  %p56_p0 = scmp.ne.s32.totalorder %s5368_s28, %s5364_s27 }
  0x12   : > { %p5504_p1 = scmp.eq.s32.totalorder %s3801_s12, 0  ;;  %p207_p2 = scmp.ne.s32.totalorder %s5360_s26, %s5356_s25 }
  0x13   : > { %p208_p4 = scmp.eq.s32.totalorder %s3801_s12, 3  ;;  %p213_p5 = scmp.ne.s32.totalorder %s5356_s25, %s5352_s24 }
  0x14   : > { %s6683_s14 = scalar_select %p5504_p1, 1, 0 }
  0x15   : > { %p5513_p3 = por %p5504_p1, %p56_p0  ;;  %p214_p6 = scmp.eq.s32.totalorder %s3802_s13, 3 }
  0x16   : > { %p5519_p7 = por %p208_p4, %p207_p2  ;;  %p3803_p8 = scmp.ge.s32.totalorder %s5392_s11, 1 }
  0x17   : > { %s6684_s16 = scalar_select %p5513_p3, 1, 0 }
  0x18   : > { %s6685_s17 = scalar_select %p5519_p7, 1, 0 }
  0x19   : > { %p5524_p9 = por %p214_p6, %p213_p5  ;;  %p221_p10 = scmp.lt.s32.totalorder %s5392_s11, 5 }
  0x1a   : > { %6686 = sst [smem:[#allocation16_spill]] %s6685_s17  ;;  %s5394_s20 = smov [#allocation6]  }
  0x1b   : > { %s6687_s18 = scalar_select %p5524_p9, 1, 0 }
  0x1c   : > { %p5529_p11 = pnand %p3803_p8, %p221_p10  ;;  %s233_s21 = sshll.u32 %s5394_s20, 4  ;;  %s234_s21 = int_to_ptr.vmem [resolvable:$true] %s233_s21 }
  0x1d   : > { %6688 = sst [smem:[#allocation17_spill]] %s6687_s18  ;;  %s5395_s23 = smov [#allocation8]  }
  0x1e   : > { %s6689_s19 = scalar_select %p5529_p11, 1, 0 }
  0x1f   : > { %p4915_p12 = pneg %p5529_p11  ;;  %s246_s27 = sshll.u32 %s5395_s23, 4  ;;  %s5541_s27 = int_to_ptr.vmem [resolvable:$true] %s246_s27 }
  0x20   : > { %s6691_s1 = sld [smem:[#allocation19_spill]] }
  0x21   : > { %p5537_p13 = pnand %p4915_p12, %p5504_p1 }
  0x23   : > { %p5182_p2 = pneg %p5537_p13 }
  0x26   : > { %s5180_s15 = scalar_lea.hbm %s6691_s1, 9216 }
  0x27   : > { %p5181_p0 = scmp.ne.s32.totalorder %s6691_s1, %s5180_s15  ;;  %p5187_p6 = scmp.lt.u32.totalorder %s5180_s15, %s6691_s1 }
  0x29   : > { %p5183_p4 = pnand %p5182_p2, %p5181_p0 }
  0x2b   : > { %p5184_p5 = pneg %p5183_p4 }
  0x2d   : > { %p5189_p8 = pnand %p5187_p6, %p5184_p5 }
  0x2f   : > { %5192 = shalt.err (!%p5189_p8)
}
  0x30   : > { %s5193_s23 = scalar_lea.vmem %s234_s21, 9216  ;;  %p5201_p7 = scmp.lt.s32.totalorder %s234_s21, %s234_s21 }
  0x31   : > { %p5194_p10 = scmp.ne.s32.totalorder %s234_s21, %s5193_s23  ;;  %p5202_p1 = scmp.lt.s32.totalorder %s5193_s23, %s5193_s23 }
  0x33   : > { %p5196_p12 = pnand %p5194_p10, %p5182_p2  ;;  %p5203_p3 = por %p5202_p1, %p5201_p7 }
  0x35   : > { %p5197_p9 = pneg %p5196_p12 }
  0x37   : > { %p5204_p11 = pnand %p5203_p3, %p5197_p9 }
  0x39   : > { %5207 = shalt.err (!%p5204_p11)
}
  0x3a   : > { %s5396_s18 = smov 64   ;;  %s5397_s12 = smov 4  }
  0x3b   : > { %4918 = dma.hbm_to_vmem [thread:$0]  (!%p5537_p13), %s6691_s1, 9216, %s234_s21, [#allocation7], %s5396_s18, %s5396_s18, %s5397_s12  }
  0x3c   : > { %s6692_s2 = sld [smem:[#allocation20_spill]] }
  0x42   : > { %s5208_s20 = scalar_lea.hbm %s6692_s2, 9216 }
  0x43   : > { %p5209_p0 = scmp.ne.s32.totalorder %s6692_s2, %s5208_s20  ;;  %p5215_p7 = scmp.lt.u32.totalorder %s5208_s20, %s6692_s2 }
  0x45   : > { %p5211_p1 = pnand %p5209_p0, %p5182_p2 }
  0x47   : > { %p5212_p3 = pneg %p5211_p1 }
  0x49   : > { %p5217_p9 = pnand %p5215_p7, %p5212_p3 }
  0x4b   : > { %5220 = shalt.err (!%p5217_p9)
}
  0x4c   : > { %s5221_s21 = scalar_lea.vmem %s5541_s27, 9216  ;;  %p5229_p6 = scmp.lt.s32.totalorder %s5541_s27, %s5541_s27 }
  0x4d   : > { %p5222_p11 = scmp.ne.s32.totalorder %s5541_s27, %s5221_s21  ;;  %p5230_p8 = scmp.lt.s32.totalorder %s5221_s21, %s5221_s21 }
  0x4f   : > { %p5224_p4 = pnand %p5222_p11, %p5182_p2  ;;  %p5231_p10 = por %p5230_p8, %p5229_p6 }
  0x51   : > { %p5225_p5 = pneg %p5224_p4 }
  0x53   : > { %p5232_p12 = pnand %p5231_p10, %p5225_p5 }
  0x55   : > { %5235 = shalt.err (!%p5232_p12)
}
  0x56   : > { %4921 = dma.hbm_to_vmem [thread:$0]  (!%p5537_p13), %s6692_s2, 9216, %s5541_s27, [#allocation7], %s5396_s18, %s5396_s18, %s5397_s12  }
  0x57   : > { %s33_s17 = sadd.s32 1, %s5384_s9  ;;  %s36_s7 = sadd.s32 1, %s5388_s10 }
  0x58   : > { %p34_p2 = scmp.ge.s32.totalorder %s33_s17, 2  ;;  %s43_s22 = sadd.s32 1, %s5372_s29 }
  0x59   : > { %p50_p0 = scmp.ne.s32.totalorder %s5372_s29, %s5368_s28  ;;  %p51_p1 = scmp.eq.s32.totalorder %s5392_s11, 0 }
  0x5a   : > { %s6720_s17 = smov (%p34_p2, %s33_s17), 0  ;;  %s6722_s7 = smov (!%p34_p2, %s36_s7), %s5388_s10 }
  0x5b   : > { %6693 = sst [smem:[#allocation18_spill]] %s6720_s17  ;;  %p5599_p3 = por %p51_p1, %p50_p0 }
  0x5c   : > { %s193_s15 = ssub.s32 %s5384_s9, %s6720_s17  ;;  %p38_p13 = scmp.ge.s32.totalorder %s6722_s7, 2 }
  0x5d   : > { %p4932_p7 = scmp.lt.s32.totalorder %s5392_s11, 4  ;;  %s272_s27 = sand.u32 1, %s5372_s29  }
  0x5e   : > { %s4901_s18 = smul.u32 5120, %s5388_s10  ;;  %s6724_s7 = smov (%p38_p13, %s6722_s7), 0 }
  0x5f   : > { %s4900_s12 = smul.u32 320, %s272_s27  ;;  %s40_s13 = ssub.s32 %s5388_s10, %s6724_s7 }
  0x60   : > { %s5615_s21 = scalar_lea.hbm %s6656_s0, %s4901_s18  ;;  %p41_p9 = scmp.eq.s32.totalorder %s40_s13, 0 }
  0x61   : > { %s194_s6 = sor.u32 %s193_s15, %s40_s13  ;;  %s6695_s1 = sadd.s32 1, %s5360_s26 }
  0x62   : > { %p195_p11 = scmp.eq.s32.totalorder %s194_s6, 0  ;;  %s276_s17 = scalar_lea.vmem [#allocation3], %s4900_s12 }
  0x63   : > { %s5618_s8 = scalar_select %p41_p9, %s5372_s29, %s43_s22  }
  0x64   : > { %s5623_s2 = scalar_select %p195_p11, %s5360_s26, %s6695_s1  }
  0x65   : > { %s283_s9 = sshll.u32 %s276_s17, 4  ;;  %p5629_p4 = pnand %p4932_p7, %p5599_p3  ;;  %s5633_s9 = int_to_ptr.vmem [resolvable:$true] %s283_s9 }
  0x66   : > { %s5635_s15 = scalar_lea.sflag [#allocation4], %s272_s27  ;;  %s5236_s22 = scalar_lea.hbm %s5615_s21, 5120 }
  0x67   : > { %p5237_p5 = scmp.ne.s32.totalorder %s5615_s21, %s5236_s22  ;;  %p5238_p6 = pneg %p5629_p4 }
  0x68   : > { %s5241_s24 = scalar_lea.hbm %s6656_s0, 10240  ;;  %p5242_p12 = scmp.lt.u32.totalorder %s5615_s21, %s6656_s0 }
  0x69   : > { %p5239_p8 = pnand %p5238_p6, %p5237_p5  ;;  %p5243_p2 = scmp.lt.u32.totalorder %s5241_s24, %s5236_s22 }
  0x6a   : > { %p5245_p1 = scmp.lt.u32.totalorder %s5236_s22, %s5615_s21 }
  0x6b   : > { %p5240_p10 = pneg %p5239_p8  ;;  %p5244_p0 = por %p5243_p2, %p5242_p12 }
  0x6d   : > { %p5246_p3 = por %p5245_p1, %p5244_p0 }
  0x6f   : > { %p5247_p13 = pnand %p5246_p3, %p5240_p10 }
  0x71   : > { %5250 = shalt.err (!%p5247_p13)
}
  0x72   : > { %s5251_s27 = scalar_lea.vmem %s5633_s9, 5120  ;;  %s5398_s13 = smov [#allocation3]  }
  0x73   : > { %p5252_p7 = scmp.ne.s32.totalorder %s5633_s9, %s5251_s27  ;;  %s5256_s23 = sshll.u32 %s5398_s13, 4  ;;  %s5257_s23 = int_to_ptr.vmem [resolvable:$false] %s5256_s23 }
  0x74   : > { %s5258_s6 = scalar_lea.vmem %s5257_s23, 10240  ;;  %p5259_p5 = scmp.lt.s32.totalorder %s5633_s9, %s5257_s23 }
  0x75   : > { %p5254_p9 = pnand %p5252_p7, %p5238_p6  ;;  %p5260_p8 = scmp.lt.s32.totalorder %s5258_s6, %s5251_s27 }
  0x77   : > { %p5255_p11 = pneg %p5254_p9  ;;  %p5261_p12 = por %p5260_p8, %p5259_p5 }
  0x79   : > { %p5262_p2 = pnand %p5261_p12, %p5255_p11 }
  0x7b   : > { %5265 = shalt.err (!%p5262_p2)
}
  0x7c   : > { %s5399_s22 = smov 128   ;;  %s5400_s1 = smov 8  }
  0x7d   : > { %4925 = dma.hbm_to_vmem [thread:$0]  (!%p5629_p4), %s5615_s21, 5120, %s5633_s9, %s5635_s15, %s5399_s22, %s5399_s22, %s5400_s1  }
  0x7e   : > { %p6697_p6 = scmp.ne.s32.totalorder %s6689_s19, 0 }
  0x7f   : > { %s297_s17 = sand.u32 (!%p6697_p6), 1, %s5368_s28   ;;  %p6698_p10 = scmp.ne.s32.totalorder (!%p6697_p6), %s6684_s16, 0 }
  0x80   : > { %295 = sbr.rel (%p6697_p6) target bundleno = 1092 (0x444), region = 48  ;;  %s298_s18 = scalar_lea.sflag (!%p6697_p6), [#allocation4], %s297_s17 }
  0x81   : > { %s4902_s24 = smul.u32 (!%p6697_p6), 320, %s297_s17 }
  0x83   : > { %s301_s12 = scalar_lea.vmem (!%p6697_p6), [#allocation3], %s4902_s24 }
  0x87   : > { %5339 = dma.done.wait (%p6698_p10), %s298_s18, 5120  }
  0x88   : > { %5341 = vsyncadd (%p6698_p10), %s298_s18, 4294962176  ;;  %p6699_p0 = scmp.ne.s32.totalorder %s6683_s14, 0 }
  0x8a   : > { %5343 = dma.done.wait (%p6699_p0), [#allocation7], 18432  }
  0x8b   : > { %5345 = vsyncadd (%p6699_p0), [#allocation7], 4294948864  ;;  %s337_s9 = sand.u32 1, %s5356_s25   ;;  %s3991_s21 = sshll.u32 %s5376_s30, 7  ;;  %v5687_v2 = vld [vmem:[%s6659_s3] ss:$0 sm:$0xff] }
  0x8c   : > { %s5677_s19 = sshll.u32 %s337_s9, 7  ;;  %s5680_s20 = scalar_lea.vmem %s301_s12, %s3991_s21 [#allocation3]  ;;  %v5694_v5 = vld [vmem:[%s6660_s4] ss:$0 sm:$0xff]  ;;  %vm479_vm0 = vcmask 1040384   ;;  %vm552_vm1 = vcmask 1046528  }
  0x8d   : > { %v345_v0 = vld [vmem:[%s5680_s20] sm:$0xff]  ;;  %v346_v1 = vld [vmem:[%s5680_s20 + $0x8] sm:$0xff]  ;;  %v347_v6 = vld [vmem:[%s5680_s20 + $0x10] sm:$0xff]  ;;  %s5933_s13 = scalar_lea.vmem [#allocation9], %s5677_s19  ;;  %p3816_p4 = scmp.ne.s32.totalorder %s5376_s30, 0 }
  0x8e   : > { %v376_v3 = vmul.f32 %v5687_v2, %v345_v0  ;;  %v377_v4 = vmul.f32 %v5687_v2, %v346_v1  ;;  %v348_v7 = vld [vmem:[%s5680_s20 + $0x18] sm:$0xff]  ;;  %v378_v8 = vmul.f32 %v5687_v2, %v347_v6  ;;  %v349_v10 = vld [vmem:[%s5680_s20 + $0x20] sm:$0xff]  ;;  %v350_v11 = vld [vmem:[%s5680_s20 + $0x28] sm:$0xff] }
  0x8f   : > { %v379_v9 = vmul.f32 %v5687_v2, %v348_v7  ;;  %v351_v12 = vld [vmem:[%s5680_s20 + $0x30] sm:$0xff]  ;;  %v380_v15 = vmul.f32 %v5687_v2, %v349_v10  ;;  %v381_v16 = vmul.f32 %v5687_v2, %v350_v11  ;;  %v352_v17 = vld [vmem:[%s5680_s20 + $0x38] sm:$0xff]  ;;  %v353_v42 = vld [vmem:[%s5680_s20 + $0x40] sm:$0xff] }
  0x90   : > { %v407_v13 = vadd.f32 %v5694_v5, %v376_v3  ;;  %v408_v14 = vadd.f32 %v5694_v5, %v377_v4  ;;  %v409_v18 = vadd.f32 %v5694_v5, %v378_v8  ;;  %v382_v20 = vmul.f32 %v5687_v2, %v351_v12  ;;  %v354_v43 = vld [vmem:[%s5680_s20 + $0x48] sm:$0xff]  ;;  %v355_v48 = vld [vmem:[%s5680_s20 + $0x50] sm:$0xff]  ;;  %v356_v49 = vld [vmem:[%s5680_s20 + $0x58] sm:$0xff] }
  0x91   : > { %v410_v19 = vadd.f32 %v5694_v5, %v379_v9  ;;  %v383_v21 = vmul.f32 %v5687_v2, %v352_v17  ;;  %v411_v24 = vadd.f32 %v5694_v5, %v380_v15  ;;  %v412_v25 = vadd.f32 %v5694_v5, %v381_v16  ;;  %v357_v50 = vld [vmem:[%s5680_s20 + $0x60] sm:$0xff]  ;;  %v358_v55 = vld [vmem:[%s5680_s20 + $0x68] sm:$0xff]  ;;  %v359_v60 = vld [vmem:[%s5680_s20 + $0x70] sm:$0xff] }
  0x92   : > { %v5712_v22 = vmax.f32 %v407_v13, 0.0  ;;  %v5714_v23 = vmax.f32 %v408_v14, 0.0  ;;  %v5718_v26 = vmax.f32 %v409_v18, 0.0  ;;  %v413_v28 = vadd.f32 %v5694_v5, %v382_v20  ;;  %v360_v1 = vld [vmem:[%s5680_s20 + $0x78] sm:$0xff] }
  0x93   : > { %v5720_v27 = vmax.f32 %v410_v19, 0.0  ;;  %v414_v29 = vadd.f32 %v5694_v5, %v383_v21  ;;  %v5726_v32 = vmax.f32 %v411_v24, 0.0  ;;  %v5728_v33 = vmax.f32 %v412_v25, 0.0 }
  0x94   : > { %v480_v30 = vrot.slane %v5712_v22, 7  ;;  %v481_v31 = vrot.slane %v5714_v23, 7  ;;  %v483_v34 = vrot.slane %v5718_v26, 7  ;;  %v5732_v36 = vmax.f32 %v413_v28, 0.0 }
  0x95   : > { %v484_v35 = vrot.slane %v5720_v27, 7  ;;  %v5734_v37 = vmax.f32 %v414_v29, 0.0  ;;  %v486_v40 = vrot.slane %v5726_v32, 7  ;;  %v487_v41 = vrot.slane %v5728_v33, 7 }
  0x96   : > { %v482_v38 = vsel %vm479_vm0, %v480_v30, %v481_v31  ;;  %v540_v39 = vsel %vm479_vm0, 0.0, %v480_v30  ;;  %v541_v46 = vsel %vm479_vm0, 0.0, %v483_v34  ;;  %v489_v47 = vrot.slane %v5732_v36, 7 }
  0x97   : > { %v625_v44 = vpack.c.bf16 %v482_v38, %v540_v39  ;;  %v485_v45 = vsel %vm479_vm0, %v483_v34, %v484_v35  ;;  %v488_v52 = vsel %vm479_vm0, %v486_v40, %v487_v41  ;;  %v542_v53 = vsel %vm479_vm0, 0.0, %v486_v40  ;;  %v361_v40 = vld [vmem:[%s5680_s20 + $0x80] sm:$0xff]  ;;  %v362_v41 = vld [vmem:[%s5680_s20 + $0x88] sm:$0xff] }
  0x98   : > { %v626_v51 = vpack.c.bf16 %v485_v45, %v541_v46  ;;  %v490_v54 = vrot.slane %v5734_v37, 7  ;;  %v627_v56 = vpack.c.bf16 %v488_v52, %v542_v53  ;;  %v543_v57 = vsel %vm479_vm0, 0.0, %v489_v47 }
  0x99   : > { %637 = vst [vmem:[#allocation2] sm:$0xff] %v625_v44  ;;  %v384_v58 = vmul.f32 %v5687_v2, %v353_v42  ;;  %v385_v59 = vmul.f32 %v5687_v2, %v354_v43  ;;  %v386_v62 = vmul.f32 %v5687_v2, %v355_v48  ;;  %v387_v63 = vmul.f32 %v5687_v2, %v356_v49  ;;  %v363_v42 = vld [vmem:[%s5680_s20 + $0x90] sm:$0xff]  ;;  %v365_v48 = vld [vmem:[%s5680_s20 + $0xa0] sm:$0xff] }
  0x9a   : > { %638 = vst [vmem:[#allocation2 + $0x18] sm:$0xff] %v626_v51  ;;  %v491_v61 = vsel %vm479_vm0, %v489_v47, %v490_v54  ;;  %v388_v0 = vmul.f32 %v5687_v2, %v357_v50  ;;  %639 = vst [vmem:[#allocation2 + $0x30] sm:$0xff] %v627_v56  ;;  %v389_v7 = vmul.f32 %v5687_v2, %v358_v55  ;;  %v364_v47 = vld [vmem:[%s5680_s20 + $0x98] sm:$0xff] }
  0x9b   : > { %v628_v3 = vpack.c.bf16 %v491_v61, %v543_v57  ;;  %v415_v4 = vadd.f32 %v5694_v5, %v384_v58  ;;  %v416_v6 = vadd.f32 %v5694_v5, %v385_v59  ;;  %v417_v8 = vadd.f32 %v5694_v5, %v386_v62  ;;  %v366_v57 = vld [vmem:[%s5680_s20 + $0xa8] sm:$0xff]  ;;  %v367_v58 = vld [vmem:[%s5680_s20 + $0xb0] sm:$0xff] }
  0x9c   : > { %v418_v9 = vadd.f32 %v5694_v5, %v387_v63  ;;  %v419_v10 = vadd.f32 %v5694_v5, %v388_v0  ;;  %v390_v11 = vmul.f32 %v5687_v2, %v359_v60  ;;  %v420_v14 = vadd.f32 %v5694_v5, %v389_v7  ;;  %v368_v63 = vld [vmem:[%s5680_s20 + $0xb8] sm:$0xff] }
  0x9d   : > { %640 = vst [vmem:[#allocation2 + $0x48] sm:$0xff] %v628_v3  ;;  %v5768_v12 = vmax.f32 %v415_v4, 0.0  ;;  %v5770_v13 = vmax.f32 %v416_v6, 0.0  ;;  %v391_v15 = vmul.f32 %v5687_v2, %v360_v1  ;;  %v5774_v16 = vmax.f32 %v417_v8, 0.0 }
  0x9e   : > { %v5776_v17 = vmax.f32 %v418_v9, 0.0  ;;  %v5778_v18 = vmax.f32 %v419_v10, 0.0  ;;  %v421_v19 = vadd.f32 %v5694_v5, %v390_v11  ;;  %v5783_v24 = vmax.f32 %v420_v14, 0.0 }
  0x9f   : > { %v492_v20 = vrot.slane %v5768_v12, 7  ;;  %v493_v21 = vrot.slane %v5770_v13, 7  ;;  %v422_v25 = vadd.f32 %v5694_v5, %v391_v15  ;;  %v495_v28 = vrot.slane %v5774_v16, 7 }
  0xa0   : > { %v496_v29 = vrot.slane %v5776_v17, 7  ;;  %v498_v30 = vrot.slane %v5778_v18, 7  ;;  %v5789_v31 = vmax.f32 %v421_v19, 0.0  ;;  %v499_v38 = vrot.slane %v5783_v24, 7 }
  0xa1   : > { %v494_v34 = vsel %vm479_vm0, %v492_v20, %v493_v21  ;;  %v544_v35 = vsel %vm479_vm0, 0.0, %v492_v20  ;;  %v5794_v39 = vmax.f32 %v422_v25, 0.0  ;;  %v545_v45 = vsel %vm479_vm0, 0.0, %v495_v28 }
  0xa2   : > { %v629_v43 = vpack.c.bf16 %v494_v34, %v544_v35  ;;  %v497_v44 = vsel %vm479_vm0, %v495_v28, %v496_v29  ;;  %v546_v46 = vsel %vm479_vm0, 0.0, %v498_v30  ;;  %v500_v50 = vsel %vm479_vm0, %v498_v30, %v499_v38 }
  0xa3   : > { %v630_v49 = vpack.c.bf16 %v497_v44, %v545_v45  ;;  %v501_v51 = vrot.slane %v5789_v31, 7  ;;  %v502_v52 = vrot.slane %v5794_v39, 7  ;;  %v631_v53 = vpack.c.bf16 %v500_v50, %v546_v46 }
  0xa4   : > { %641 = vst [vmem:[#allocation2 + $0x60] sm:$0xff] %v629_v43  ;;  %v392_v54 = vmul.f32 %v5687_v2, %v361_v40  ;;  %v393_v55 = vmul.f32 %v5687_v2, %v362_v41  ;;  %v394_v56 = vmul.f32 %v5687_v2, %v363_v42  ;;  %v395_v61 = vmul.f32 %v5687_v2, %v364_v47 }
  0xa5   : > { %642 = vst [vmem:[#allocation2 + $0x78] sm:$0xff] %v630_v49  ;;  %v503_v59 = vsel %vm479_vm0, %v501_v51, %v502_v52  ;;  %v547_v60 = vsel %vm479_vm0, 0.0, %v501_v51  ;;  %v396_v62 = vmul.f32 %v5687_v2, %v365_v48  ;;  %643 = vst [vmem:[#allocation2 + $0x90] sm:$0xff] %v631_v53  ;;  %v397_v7 = vmul.f32 %v5687_v2, %v366_v57 }
  0xa6   : > { %v632_v0 = vpack.c.bf16 %v503_v59, %v547_v60  ;;  %v423_v1 = vadd.f32 %v5694_v5, %v392_v54  ;;  %v424_v3 = vadd.f32 %v5694_v5, %v393_v55  ;;  %v425_v4 = vadd.f32 %v5694_v5, %v394_v56 }
  0xa7   : > { %v426_v6 = vadd.f32 %v5694_v5, %v395_v61  ;;  %v427_v8 = vadd.f32 %v5694_v5, %v396_v62  ;;  %v398_v9 = vmul.f32 %v5687_v2, %v367_v58  ;;  %v399_v15 = vmul.f32 %v5687_v2, %v368_v63 }
  0xa8   : > { %644 = vst [vmem:[#allocation2 + $0xa8] sm:$0xff] %v632_v0  ;;  %v5824_v10 = vmax.f32 %v423_v1, 0.0  ;;  %v5826_v11 = vmax.f32 %v424_v3, 0.0  ;;  %v5828_v14 = vmax.f32 %v425_v4, 0.0  ;;  %v428_v20 = vadd.f32 %v5694_v5, %v397_v7 }
  0xa9   : > { %v5831_v19 = vmax.f32 %v426_v6, 0.0  ;;  %v5834_v21 = vmax.f32 %v427_v8, 0.0  ;;  %v429_v25 = vadd.f32 %v5694_v5, %v398_v9  ;;  %v430_v34 = vadd.f32 %v5694_v5, %v399_v15 }
  0xaa   : > { %v504_v28 = vrot.slane %v5824_v10, 7  ;;  %v505_v29 = vrot.slane %v5826_v11, 7  ;;  %v507_v30 = vrot.slane %v5828_v14, 7  ;;  %v5842_v2 = vmax.f32 %v428_v20, 0.0 }
  0xab   : > { %v508_v35 = vrot.slane %v5831_v19, 7  ;;  %v510_v38 = vrot.slane %v5834_v21, 7  ;;  %v5845_v40 = vmax.f32 %v429_v25, 0.0  ;;  %v5850_v44 = vmax.f32 %v430_v34, 0.0 }
  0xac   : > { %v506_v41 = vsel %vm479_vm0, %v504_v28, %v505_v29  ;;  %v548_v42 = vsel %vm479_vm0, 0.0, %v504_v28  ;;  %v549_v43 = vsel %vm479_vm0, 0.0, %v507_v30  ;;  %v511_v46 = vrot.slane %v5842_v2, 7 }
  0xad   : > { %v633_v45 = vpack.c.bf16 %v506_v41, %v548_v42  ;;  %v509_v5 = vsel %vm479_vm0, %v507_v30, %v508_v35  ;;  %v550_v47 = vsel %vm479_vm0, 0.0, %v510_v38  ;;  %v513_v49 = vrot.slane %v5845_v40, 7 }
  0xae   : > { %v634_v48 = vpack.c.bf16 %v509_v5, %v549_v43  ;;  %v514_v50 = vrot.slane %v5850_v44, 7  ;;  %v649_v51 = vpack.c.bf16 %v5714_v23, %v5712_v22  ;;  %v512_v52 = vsel %vm479_vm0, %v510_v38, %v511_v46 }
  0xaf   : > { %645 = vst [vmem:[#allocation2 + $0xc0] sm:$0xff] %v633_v45  ;;  %v650_v53 = vpack.c.bf16 %v5720_v27, %v5718_v26  ;;  %v651_v54 = vpack.c.bf16 %v5728_v33, %v5726_v32  ;;  %v652_v55 = vpack.c.bf16 %v5734_v37, %v5732_v36  ;;  %v635_v56 = vpack.c.bf16 %v512_v52, %v550_v47 }
  0xb0   : > { %646 = vst [vmem:[#allocation2 + $0xd8] sm:$0xff] %v634_v48  ;;  %v515_v57 = vsel %vm479_vm0, %v513_v49, %v514_v50  ;;  %v551_v58 = vsel %vm479_vm0, 0.0, %v513_v49  ;;  %661 = vst [vmem:[#allocation2 + $0x8] sm:$0xff] %v649_v51  ;;  %v653_v59 = vpack.c.bf16 %v5770_v13, %v5768_v12  ;;  %v654_v61 = vpack.c.bf16 %v5776_v17, %v5774_v16 }
  0xb1   : > { %v636_v60 = vpack.c.bf16 %v515_v57, %v551_v58  ;;  %662 = vst [vmem:[#allocation2 + $0x20] sm:$0xff] %v650_v53  ;;  %663 = vst [vmem:[#allocation2 + $0x38] sm:$0xff] %v651_v54  ;;  %v655_v62 = vpack.c.bf16 %v5783_v24, %v5778_v18  ;;  %v656_v63 = vpack.c.bf16 %v5794_v39, %v5789_v31  ;;  %v553_v6 = vrot.slane %v5712_v22, 1 }
  0xb2   : > { %664 = vst [vmem:[#allocation2 + $0x50] sm:$0xff] %v652_v55  ;;  %647 = vst [vmem:[#allocation2 + $0xf0] sm:$0xff] %v635_v56  ;;  %v657_v0 = vpack.c.bf16 %v5826_v11, %v5824_v10  ;;  %v658_v1 = vpack.c.bf16 %v5831_v19, %v5828_v14  ;;  %v659_v3 = vpack.c.bf16 %v5842_v2, %v5834_v21  ;;  %v554_v7 = vrot.slane %v5714_v23, 1 }
  0xb3   : > { %665 = vst [vmem:[#allocation2 + $0x68] sm:$0xff] %v653_v59  ;;  %v660_v4 = vpack.c.bf16 %v5850_v44, %v5845_v40  ;;  %648 = vst [vmem:[#allocation2 + $0x108] sm:$0xff] %v636_v60  ;;  %v556_v8 = vrot.slane %v5718_v26, 1  ;;  %v557_v9 = vrot.slane %v5720_v27, 1  ;;  %v559_v15 = vrot.slane %v5726_v32, 1 }
  0xb4   : > { %666 = vst [vmem:[#allocation2 + $0x80] sm:$0xff] %v654_v61  ;;  %667 = vst [vmem:[#allocation2 + $0x98] sm:$0xff] %v655_v62  ;;  %v560_v20 = vrot.slane %v5728_v33, 1  ;;  %v562_v25 = vrot.slane %v5732_v36, 1  ;;  %v563_v28 = vrot.slane %v5734_v37, 1  ;;  %v555_v22 = vsel %vm552_vm1, %v553_v6, %v554_v7 }
  0xb5   : > { %668 = vst [vmem:[#allocation2 + $0xb0] sm:$0xff] %v656_v63  ;;  %669 = vst [vmem:[#allocation2 + $0xc8] sm:$0xff] %v657_v0  ;;  %v613_v23 = vsel %vm552_vm1, %v554_v7, 0.0  ;;  %v558_v26 = vsel %vm552_vm1, %v556_v8, %v557_v9  ;;  %v614_v27 = vsel %vm552_vm1, %v557_v9, 0.0  ;;  %v565_v37 = vrot.slane %v5768_v12, 1 }
  0xb6   : > { %670 = vst [vmem:[#allocation2 + $0xe0] sm:$0xff] %v658_v1  ;;  %671 = vst [vmem:[#allocation2 + $0xf8] sm:$0xff] %v659_v3  ;;  %v673_v29 = vpack.c.bf16 %v613_v23, %v555_v22  ;;  %v674_v30 = vpack.c.bf16 %v614_v27, %v558_v26  ;;  %v561_v34 = vsel %vm552_vm1, %v559_v15, %v560_v20  ;;  %v615_v32 = vsel %vm552_vm1, %v560_v20, 0.0 }
  0xb7   : > { %672 = vst [vmem:[#allocation2 + $0x110] sm:$0xff] %v660_v4  ;;  %v675_v35 = vpack.c.bf16 %v615_v32, %v561_v34  ;;  %v564_v33 = vsel %vm552_vm1, %v562_v25, %v563_v28  ;;  %v616_v36 = vsel %vm552_vm1, %v563_v28, 0.0  ;;  %v566_v41 = vrot.slane %v5770_v13, 1 }
  0xb8   : > { %685 = vst [vmem:[#allocation2 + $0x10] sm:$0xff] %v673_v29  ;;  %686 = vst [vmem:[#allocation2 + $0x28] sm:$0xff] %v674_v30  ;;  %v676_v38 = vpack.c.bf16 %v616_v36, %v564_v33  ;;  %v568_v42 = vrot.slane %v5774_v16, 1  ;;  %v569_v43 = vrot.slane %v5776_v17, 1  ;;  %v571_v45 = vrot.slane %v5778_v18, 1 }
  0xb9   : > { %687 = vst [vmem:[#allocation2 + $0x40] sm:$0xff] %v675_v35  ;;  %v572_v5 = vrot.slane %v5783_v24, 1  ;;  %v574_v46 = vrot.slane %v5789_v31, 1  ;;  %v575_v47 = vrot.slane %v5794_v39, 1  ;;  %v567_v12 = vsel %vm552_vm1, %v565_v37, %v566_v41 }
  0xba   : > { %688 = vst [vmem:[#allocation2 + $0x58] sm:$0xff] %v676_v38  ;;  %v617_v48 = vsel %vm552_vm1, %v566_v41, 0.0  ;;  %v570_v13 = vsel %vm552_vm1, %v568_v42, %v569_v43  ;;  %v618_v16 = vsel %vm552_vm1, %v569_v43, 0.0  ;;  %v577_v51 = vrot.slane %v5824_v10, 1 }
  0xbb   : > { %v677_v49 = vpack.c.bf16 %v617_v48, %v567_v12  ;;  %v678_v17 = vpack.c.bf16 %v618_v16, %v570_v13  ;;  %v573_v50 = vsel %vm552_vm1, %v571_v45, %v572_v5  ;;  %v619_v18 = vsel %vm552_vm1, %v572_v5, 0.0 }
  0xbc   : > { %v679_v24 = vpack.c.bf16 %v619_v18, %v573_v50  ;;  %v576_v31 = vsel %vm552_vm1, %v574_v46, %v575_v47  ;;  %v620_v39 = vsel %vm552_vm1, %v575_v47, 0.0  ;;  %v578_v53 = vrot.slane %v5826_v11, 1 }
  0xbd   : > { %689 = vst [vmem:[#allocation2 + $0x70] sm:$0xff] %v677_v49  ;;  %690 = vst [vmem:[#allocation2 + $0x88] sm:$0xff] %v678_v17  ;;  %v680_v52 = vpack.c.bf16 %v620_v39, %v576_v31  ;;  %v580_v54 = vrot.slane %v5828_v14, 1  ;;  %v581_v55 = vrot.slane %v5831_v19, 1  ;;  %v583_v56 = vrot.slane %v5834_v21, 1 }
  0xbe   : > { %691 = vst [vmem:[#allocation2 + $0xa0] sm:$0xff] %v679_v24  ;;  %v584_v57 = vrot.slane %v5842_v2, 1  ;;  %v586_v58 = vrot.slane %v5845_v40, 1  ;;  %v587_v59 = vrot.slane %v5850_v44, 1  ;;  %v579_v10 = vsel %vm552_vm1, %v577_v51, %v578_v53  ;;  %700 = sbr.rel (%p3816_p4) target bundleno = 197 (0xc5), region = 64 }
  0xbf   : > { %692 = vst [vmem:[#allocation2 + $0xb8] sm:$0xff] %v680_v52  ;;  %v621_v60 = vsel %vm552_vm1, %v578_v53, 0.0  ;;  %v582_v11 = vsel %vm552_vm1, %v580_v54, %v581_v55  ;;  %v622_v14 = vsel %vm552_vm1, %v581_v55, 0.0  ;;  %v5401_v0 = vmov (!%p3816_p4), 0  }
  0xc0   : > { %v681_v19 = vpack.c.bf16 %v621_v60, %v579_v10  ;;  %v682_v61 = vpack.c.bf16 %v622_v14, %v582_v11  ;;  %v585_v21 = vsel %vm552_vm1, %v583_v56, %v584_v57  ;;  %v623_v2 = vsel %vm552_vm1, %v584_v57, 0.0  ;;  %701 = vst [vmem:[#allocation2] sm:$0xff] (!%p3816_p4), %v5401_v0  ;;  %702 = vst [vmem:[#allocation2 + $0x8] sm:$0xff] (!%p3816_p4), %v5401_v0 }
  0xc1   : > { %v683_v62 = vpack.c.bf16 %v623_v2, %v585_v21  ;;  %v588_v40 = vsel %vm552_vm1, %v586_v58, %v587_v59  ;;  %v624_v44 = vsel %vm552_vm1, %v587_v59, 0.0  ;;  %703 = vst [vmem:[#allocation2 + $0x10] sm:$0xff] (!%p3816_p4), %v5401_v0  ;;  %704 = vst [vmem:[#allocation2 + $0x18] sm:$0xff] (!%p3816_p4), %v5401_v0 }
  0xc2   : > { %693 = vst [vmem:[#allocation2 + $0xd0] sm:$0xff] %v681_v19  ;;  %694 = vst [vmem:[#allocation2 + $0xe8] sm:$0xff] %v682_v61  ;;  %v684_v63 = vpack.c.bf16 %v624_v44, %v588_v40 }
  0xc3   : > { %695 = vst [vmem:[#allocation2 + $0x100] sm:$0xff] %v683_v62  ;;  %705 = vst [vmem:[#allocation2 + $0x20] sm:$0xff] (!%p3816_p4), %v5401_v0 }
  0xc4   : > { %696 = vst [vmem:[#allocation2 + $0x118] sm:$0xff] %v684_v63  ;;  %706 = vst [vmem:[#allocation2 + $0x28] sm:$0xff] (!%p3816_p4), %v5401_v0 }
  0xc5 PF: > { %p3817_p1 = scmp.ne.s32.totalorder %s5376_s30, 1 }
  0xc6   : > { %v5402_v1 = vmov (!%p3817_p1), 0  }
  0xc7   : > { %710 = sbr.rel (%p3817_p1) target bundleno = 206 (0xce), region = 68  ;;  %712 = vst [vmem:[#allocation2 + $0xf0] sm:$0xff] (!%p3817_p1), %v5402_v1  ;;  %713 = vst [vmem:[#allocation2 + $0xf8] sm:$0xff] (!%p3817_p1), %v5402_v1 }
  0xc8   : > { %714 = vst [vmem:[#allocation2 + $0x100] sm:$0xff] (!%p3817_p1), %v5402_v1  ;;  %715 = vst [vmem:[#allocation2 + $0x108] sm:$0xff] (!%p3817_p1), %v5402_v1 }
  0xc9   : > { %716 = vst [vmem:[#allocation2 + $0x110] sm:$0xff] (!%p3817_p1), %v5402_v1  ;;  %717 = vst [vmem:[#allocation2 + $0x118] sm:$0xff] (!%p3817_p1), %v5402_v1 }
  0xce PF: > { %v5036_v3 = vld [vmem:[#allocation6 + $0x100] sm:$0xff]   ;;  %v5040_v8 = vld [vmem:[#allocation6 + $0x108] sm:$0xff]   ;;  %v5044_v25 = vld [vmem:[#allocation6 + $0x110] sm:$0xff]   ;;  %s6700_s17 = sld [smem:[#allocation21_spill]] }
  0xcf   : > { %v5037_v4 = vld [vmem:[#allocation6 + $0xc0] sm:$0xff]   ;;  %3994 = vmatprep.subr.bf16.mxu0 %v5036_v3  ;;  %v5041_v9 = vld [vmem:[#allocation6 + $0xc8] sm:$0xff]   ;;  %v5045_v28 = vld [vmem:[#allocation6 + $0xd0] sm:$0xff]  }
  0xd0   : > { %v5038_v6 = vld [vmem:[#allocation6 + $0x40] sm:$0xff]   ;;  %3995 = vmatpush3.bf16.msra.mxu0 %v5037_v4  ;;  %v5042_v15 = vld [vmem:[#allocation6 + $0x48] sm:$0xff]   ;;  %v5046_v22 = vld [vmem:[#allocation6 + $0x50] sm:$0xff]  }
  0xd1   : > { %v5039_v7 = vld [vmem:[#allocation6] sm:$0xff]   ;;  %4088 = vmatprep.subr.bf16.mxu1 %v5038_v6  ;;  %3996 = vmatprep.subr.bf16.mxu0 %v5040_v8  ;;  %v5043_v20 = vld [vmem:[#allocation6 + $0x8] sm:$0xff]   ;;  %v5047_v23 = vld [vmem:[#allocation6 + $0x10] sm:$0xff]  }
  0xd2   : > { %4089 = vmatpush3.bf16.msra.mxu1 %v5039_v7  ;;  %v5048_v26 = vld [vmem:[#allocation6 + $0x118] sm:$0xff]   ;;  %v5052_v34 = vld [vmem:[#allocation6 + $0x120] sm:$0xff]   ;;  %v5056_v36 = vld [vmem:[#allocation6 + $0x128] sm:$0xff]  }
  0xd3   : > { %4090 = vmatprep.subr.bf16.mxu1 %v5042_v15  ;;  %v5049_v27 = vld [vmem:[#allocation6 + $0xd8] sm:$0xff]   ;;  %v5053_v32 = vld [vmem:[#allocation6 + $0xe0] sm:$0xff]   ;;  %v5057_v37 = vld [vmem:[#allocation6 + $0xe8] sm:$0xff]  }
  0xd4   : > { %3997 = vmatpush3.bf16.msra.mxu0 %v5041_v9  ;;  %v5050_v29 = vld [vmem:[#allocation6 + $0x58] sm:$0xff]   ;;  %v5054_v35 = vld [vmem:[#allocation6 + $0x60] sm:$0xff]   ;;  %v5058_v38 = vld [vmem:[#allocation6 + $0x68] sm:$0xff]  }
  0xd5   : > { %3998 = vmatprep.subr.bf16.mxu0 %v5044_v25  ;;  %v5051_v30 = vld [vmem:[#allocation6 + $0x18] sm:$0xff]   ;;  %v5055_v33 = vld [vmem:[#allocation6 + $0x20] sm:$0xff]   ;;  %v5059_v41 = vld [vmem:[#allocation6 + $0x28] sm:$0xff]  }
  0xd6   : > { %4091 = vmatpush3.bf16.msra.mxu1 %v5043_v20  ;;  %v5060_v42 = vld [vmem:[#allocation6 + $0x130] sm:$0xff]   ;;  %v5064_v46 = vld [vmem:[#allocation6 + $0x138] sm:$0xff]   ;;  %v798_v48 = vld [vmem:[#allocation2 + $0x20] sm:$0xff] }
  0xd7   : > { %4092 = vmatprep.subr.bf16.mxu1 %v5046_v22  ;;  %v5061_v43 = vld [vmem:[#allocation6 + $0xf0] sm:$0xff]   ;;  %v5065_v47 = vld [vmem:[#allocation6 + $0xf8] sm:$0xff]   ;;  %1052 = vmatprep.mubr.bf16.mxu0 %v798_v48  ;;  %v5068_v49 = vld [vmem:[#allocation6 + $0x140] sm:$0xff]  }
  0xd8   : > { %3999 = vmatpush3.bf16.msra.mxu0 %v5045_v28  ;;  %v5062_v45 = vld [vmem:[#allocation6 + $0x70] sm:$0xff]   ;;  %v5066_v12 = vld [vmem:[#allocation6 + $0x78] sm:$0xff]   ;;  %v719_v17 = vld [vmem:[#allocation2 + $0x8] sm:$0xff] }
  0xd9   : > { %4000 = vmatprep.subr.bf16.mxu0 %v5048_v26  ;;  %v5063_v5 = vld [vmem:[#allocation6 + $0x30] sm:$0xff]   ;;  %v5067_v13 = vld [vmem:[#allocation6 + $0x38] sm:$0xff]   ;;  %v718_v50 = vld [vmem:[#allocation2] sm:$0xff]  ;;  %1422 = vmatprep.mubr.bf16.mxu1 %v719_v17 }
  0xda   : > { %4093 = vmatpush3.bf16.msra.mxu1 %v5047_v23  ;;  %v797_v16 = vld [vmem:[#allocation2 + $0x18] sm:$0xff]  ;;  %v5069_v24 = vld [vmem:[#allocation6 + $0x148] sm:$0xff]   ;;  %v5070_v31 = vld [vmem:[#allocation6 + $0x150] sm:$0xff]  }
  0xdb   : > { %4094 = vmatprep.subr.bf16.mxu1 %v5050_v29  ;;  %v5941_v18 = vld [vmem:[#allocation2 + $0x38] sm:$0xff]  ;;  %v5944_v39 = vld [vmem:[#allocation2 + $0x30] sm:$0xff]  ;;  %v5073_v53 = vld [vmem:[#allocation6 + $0x80] sm:$0xff]  }
  0xdc   : > { %4001 = vmatpush3.bf16.msra.mxu0 %v5049_v27  ;;  %v5946_v51 = vld [vmem:[#allocation2 + $0x50] sm:$0xff]  ;;  %v5071_v52 = vld [vmem:[#allocation6 + $0x158] sm:$0xff]   ;;  %v5072_v54 = vld [vmem:[#allocation6 + $0x160] sm:$0xff]  }
  0xdd   : > { %4002 = vmatprep.subr.bf16.mxu0 %v5052_v34  ;;  %v5075_v55 = vld [vmem:[#allocation6 + $0x88] sm:$0xff]   ;;  %v5076_v57 = vld [vmem:[#allocation6 + $0x90] sm:$0xff]   ;;  %v5078_v10 = vld [vmem:[#allocation6 + $0x98] sm:$0xff]  }
  0xde   : > { %4095 = vmatpush3.bf16.msra.mxu1 %v5051_v30  ;;  %v5950_v56 = vld [vmem:[#allocation2 + $0x48] sm:$0xff]  ;;  %v5077_v60 = vld [vmem:[#allocation6 + $0x170] sm:$0xff]   ;;  %v5959_v11 = vld [vmem:[#allocation2 + $0x60] sm:$0xff] }
  0xdf   : > { %4096 = vmatprep.subr.bf16.mxu1 %v5054_v35  ;;  %v5953_v58 = vld [vmem:[#allocation2 + $0x68] sm:$0xff]  ;;  %v5079_v14 = vld [vmem:[#allocation6 + $0xa0] sm:$0xff]   ;;  %v5080_v61 = vld [vmem:[#allocation6 + $0x178] sm:$0xff]  }
  0xe0   : > { %4003 = vmatpush3.bf16.msra.mxu0 %v5053_v32  ;;  %v5074_v59 = vld [vmem:[#allocation6 + $0x168] sm:$0xff]   ;;  %v5961_v19 = vld [vmem:[#allocation2 + $0x80] sm:$0xff]  ;;  %v5966_v62 = vld [vmem:[#allocation2 + $0x78] sm:$0xff] }
  0xe1   : > { %4004 = vmatprep.subr.bf16.mxu0 %v5056_v36  ;;  %v5081_v21 = vld [vmem:[#allocation6 + $0xa8] sm:$0xff]   ;;  %v5084_v2 = vld [vmem:[#allocation6 + $0x1c0] sm:$0xff]   ;;  %v5082_v40 = vld [vmem:[#allocation6 + $0xb0] sm:$0xff]  }
  0xe2   : > { %4097 = vmatpush3.bf16.msra.mxu1 %v5055_v33  ;;  %v5969_v44 = vld [vmem:[#allocation2 + $0x98] sm:$0xff]  ;;  %v5975_v0 = vld [vmem:[#allocation2 + $0x90] sm:$0xff]  ;;  %v5089_v1 = vld [vmem:[#allocation6 + $0x200] sm:$0xff]  }
  0xe3   : > { %4098 = vmatprep.subr.bf16.mxu1 %v5058_v38  ;;  %v5083_v63 = vld [vmem:[#allocation6 + $0xb8] sm:$0xff]   ;;  %v5977_v3 = vld [vmem:[#allocation2 + $0xb0] sm:$0xff]  ;;  %v5983_v4 = vld [vmem:[#allocation2 + $0xa8] sm:$0xff] }
  0xe4   : > { %4005 = vmatpush3.bf16.msra.mxu0 %v5057_v37  ;;  %v5985_v6 = vld [vmem:[#allocation2 + $0xc8] sm:$0xff]  ;;  %v5991_v7 = vld [vmem:[#allocation2 + $0xc0] sm:$0xff]  ;;  %v5999_v9 = vld [vmem:[#allocation2 + $0xd8] sm:$0xff] }
  0xe5   : > { %4006 = vmatprep.subr.bf16.mxu0 %v5060_v42  ;;  %v5993_v8 = vld [vmem:[#allocation2 + $0xe0] sm:$0xff]  ;;  %v6001_v15 = vld [vmem:[#allocation2 + $0xf8] sm:$0xff]  ;;  %v6007_v20 = vld [vmem:[#allocation2 + $0xf0] sm:$0xff] }
  0xe6   : > { %4099 = vmatpush3.bf16.msra.mxu1 %v5059_v41  ;;  %v799_v25 = vld [vmem:[#allocation2 + $0x28] sm:$0xff]  ;;  %v720_v28 = vld [vmem:[#allocation2 + $0x10] sm:$0xff]  ;;  %v6011_v22 = vld [vmem:[#allocation2 + $0x40] sm:$0xff] }
  0xe7   : > { %4100 = vmatprep.subr.bf16.mxu1 %v5062_v45  ;;  %v5085_v23 = vld [vmem:[#allocation6 + $0x180] sm:$0xff]   ;;  %v5086_v26 = vld [vmem:[#allocation6 + $0x1c8] sm:$0xff]   ;;  %v6013_v27 = vld [vmem:[#allocation2 + $0x58] sm:$0xff] }
  0xe8   : > { %4007 = vmatpush3.bf16.msra.mxu0 %v5061_v43  ;;  %v5087_v29 = vld [vmem:[#allocation6 + $0x188] sm:$0xff]   ;;  %v5088_v34 = vld [vmem:[#allocation6 + $0x1d0] sm:$0xff]   ;;  %v5092_v36 = vld [vmem:[#allocation6 + $0x1d8] sm:$0xff]  }
  0xe9   : > { %4008 = vmatprep.subr.bf16.mxu0 %v5064_v46  ;;  %v5091_v30 = vld [vmem:[#allocation6 + $0x208] sm:$0xff]   ;;  %v6018_v32 = vld [vmem:[#allocation2 + $0x70] sm:$0xff]  ;;  %v5093_v38 = vld [vmem:[#allocation6 + $0x198] sm:$0xff]  }
  0xea   : > { %4101 = vmatpush3.bf16.msra.mxu1 %v5063_v5  ;;  %v5090_v35 = vld [vmem:[#allocation6 + $0x190] sm:$0xff]   ;;  %v6020_v33 = vld [vmem:[#allocation2 + $0x88] sm:$0xff]  ;;  %v5097_v41 = vld [vmem:[#allocation6 + $0x218] sm:$0xff]  }
  0xeb   : > { %4102 = vmatprep.subr.bf16.mxu1 %v5066_v12  ;;  %v5094_v37 = vld [vmem:[#allocation6 + $0x210] sm:$0xff]   ;;  %v5095_v42 = vld [vmem:[#allocation6 + $0x1e0] sm:$0xff]   ;;  %v817_v5 = vld [vmem:[#allocation2 + $0xb8] sm:$0xff] }
  0xec   : > { %4009 = vmatpush3.bf16.msra.mxu0 %v5065_v47  ;;  %v814_v43 = vld [vmem:[#allocation2 + $0xa0] sm:$0xff]  ;;  %v5098_v46 = vld [vmem:[#allocation6 + $0x1e8] sm:$0xff]  }
  0xed   : > { %4516 = vmatprep.subr.bf16.mxu0 %v5068_v49  ;;  %v5096_v45 = vld [vmem:[#allocation6 + $0x1a0] sm:$0xff]   ;;  %v5099_v12 = vld [vmem:[#allocation6 + $0x1a8] sm:$0xff]  }
  0xee   : > { %4103 = vmatpush3.bf16.msra.mxu1 %v5067_v13  ;;  %v5100_v47 = vld [vmem:[#allocation6 + $0x220] sm:$0xff]   ;;  %v5101_v13 = vld [vmem:[#allocation6 + $0x1f0] sm:$0xff]   ;;  %v823_v17 = vld [vmem:[#allocation2 + $0xe8] sm:$0xff] }
  0xef   : > { %1053 = vmatmul.mubr.bf16.vlgmr.msra.gmra.mrb[0].mxu0 %v797_v16  ;;  %4552 = vmatprep.subr.bf16.mxu1 %v5073_v53 }
  0xf0   : > { %4517 = vmatpush3.bf16.msra.mxu0 %v5068_v49  ;;  %1060 = vmatprep.mubr.bf16.mxu0 %v5941_v18  ;;  %v5103_v49 = vld [vmem:[#allocation6 + $0x1b0] sm:$0xff]  }
  0xf1   : > { %1423 = vmatmul.mubr.bf16.vlgmr.msra.gmra.mrb[0].mxu1 %v718_v50  ;;  %4518 = vmatprep.subr.bf16.mxu0 %v5069_v24  ;;  %v5104_v50 = vld [vmem:[#allocation6 + $0x230] sm:$0xff]  }
  0xf2   : > { %1430 = vmatprep.mubr.bf16.mxu1 %v798_v48  ;;  %4553 = vmatpush3.bf16.msra.mxu1 %v5073_v53  ;;  %v5102_v48 = vld [vmem:[#allocation6 + $0x228] sm:$0xff]   ;;  %v826_v53 = vld [vmem:[#allocation2 + $0x100] sm:$0xff] }
  0xf3   : > { %4554 = vmatprep.subr.bf16.mxu1 %v5075_v55 }
  0xf4   : > { %4519 = vmatpush3.bf16.msra.mxu0 %v5069_v24  ;;  %v5105_v24 = vld [vmem:[#allocation6 + $0x1f8] sm:$0xff]  }
  0xf5   : > { %4520 = vmatprep.subr.bf16.mxu0 %v5070_v31 }
  0xf6   : > { %4555 = vmatpush3.bf16.msra.mxu1 %v5075_v55 }
  0xf7   : > { %1061 = vmatmul.mubr.bf16.gmra.mrb[4].mxu0 %v5944_v39  ;;  %4556 = vmatprep.subr.bf16.mxu1 %v5076_v57 }
  0xf8   : > { %1068 = vmatprep.mubr.bf16.mxu0 %v5946_v51  ;;  %4521 = vmatpush3.bf16.msra.mxu0 %v5070_v31  ;;  %v5106_v31 = vld [vmem:[#allocation6 + $0x1b8] sm:$0xff]  }
  0xf9   : > { %1431 = vmatmul.mubr.bf16.gmra.mrb[4].mxu1 %v797_v16  ;;  %4522 = vmatprep.subr.bf16.mxu0 %v5071_v52  ;;  %v820_v16 = vld [vmem:[#allocation2 + $0xd0] sm:$0xff] }
  0xfa   : > { %1438 = vmatprep.mubr.bf16.mxu1 %v5941_v18  ;;  %4557 = vmatpush3.bf16.msra.mxu1 %v5076_v57 }
  0xfb   : > { %4558 = vmatprep.subr.bf16.mxu1 %v5078_v10 }
  0xfc   : > { %4523 = vmatpush3.bf16.msra.mxu0 %v5071_v52  ;;  %v5107_v52 = vld [vmem:[#allocation6 + $0x238] sm:$0xff]  }
  0xfd   : > { %4524 = vmatprep.subr.bf16.mxu0 %v5072_v54 }
  0xfe   : > { %4559 = vmatpush3.bf16.msra.mxu1 %v5078_v10 }
  0xff   : > { %1069 = vmatmul.mubr.bf16.gmra.mrb[8].mxu0 %v5950_v56  ;;  %4560 = vmatprep.subr.bf16.mxu1 %v5079_v14 }
 0x100   : > { %1076 = vmatprep.mubr.bf16.mxu0 %v5953_v58  ;;  %4525 = vmatpush3.bf16.msra.mxu0 %v5072_v54 }
 0x101   : > { %1439 = vmatmul.mubr.bf16.gmra.mrb[8].mxu1 %v5944_v39  ;;  %4526 = vmatprep.subr.bf16.mxu0 %v5074_v59 }
 0x102   : > { %1446 = vmatprep.mubr.bf16.mxu1 %v5946_v51  ;;  %4561 = vmatpush3.bf16.msra.mxu1 %v5079_v14 }
 0x103   : > { %4562 = vmatprep.subr.bf16.mxu1 %v5081_v21 }
 0x104   : > { %4527 = vmatpush3.bf16.msra.mxu0 %v5074_v59 }
 0x105   : > { %4528 = vmatprep.subr.bf16.mxu0 %v5077_v60 }
 0x106   : > { %4563 = vmatpush3.bf16.msra.mxu1 %v5081_v21 }
 0x107   : > { %1077 = vmatmul.mubr.bf16.gmra.mrb[12].mxu0 %v5959_v11  ;;  %4564 = vmatprep.subr.bf16.mxu1 %v5082_v40 }
 0x108   : > { %1084 = vmatprep.mubr.bf16.mxu0 %v5961_v19  ;;  %4529 = vmatpush3.bf16.msra.mxu0 %v5077_v60 }
 0x109   : > { %1447 = vmatmul.mubr.bf16.gmra.mrb[12].mxu1 %v5950_v56  ;;  %4530 = vmatprep.subr.bf16.mxu0 %v5080_v61 }
 0x10a   : > { %1454 = vmatprep.mubr.bf16.mxu1 %v5953_v58  ;;  %4565 = vmatpush3.bf16.msra.mxu1 %v5082_v40 }
 0x10b   : > { %4566 = vmatprep.subr.bf16.mxu1 %v5083_v63 }
 0x10c   : > { %4531 = vmatpush3.bf16.msra.mxu0 %v5080_v61 }
 0x10d   : > { %4182 = vmatprep.subr.bf16.mxu0 %v5084_v2 }
 0x10e   : > { %4567 = vmatpush3.bf16.msra.mxu1 %v5083_v63 }
 0x10f   : > { %1085 = vmatmul.mubr.bf16.gmra.mrb[16].mxu0 %v5966_v62  ;;  %4588 = vmatprep.subr.bf16.mxu1 %v5089_v1 }
 0x110   : > { %1092 = vmatprep.mubr.bf16.mxu0 %v5969_v44 }
 0x111   : > { %1455 = vmatmul.mubr.bf16.gmra.mrb[16].mxu1 %v5959_v11 }
 0x112   : > { %1462 = vmatprep.mubr.bf16.mxu1 %v5961_v19 }
 0x117   : > { %1093 = vmatmul.mubr.bf16.gmra.mrb[20].mxu0 %v5975_v0 }
 0x118   : > { %1100 = vmatprep.mubr.bf16.mxu0 %v5977_v3 }
 0x119   : > { %1463 = vmatmul.mubr.bf16.gmra.mrb[20].mxu1 %v5966_v62 }
 0x11a   : > { %1470 = vmatprep.mubr.bf16.mxu1 %v5969_v44 }
 0x11f   : > { %1101 = vmatmul.mubr.bf16.gmra.mrb[24].mxu0 %v5983_v4 }
 0x120   : > { %1108 = vmatprep.mubr.bf16.mxu0 %v5985_v6 }
 0x121   : > { %1471 = vmatmul.mubr.bf16.gmra.mrb[24].mxu1 %v5975_v0 }
 0x122   : > { %1478 = vmatprep.mubr.bf16.mxu1 %v5977_v3 }
 0x127   : > { %1109 = vmatmul.mubr.bf16.gmra.mrb[28].mxu0 %v5991_v7 }
 0x128   : > { %1116 = vmatprep.mubr.bf16.mxu0 %v5993_v8 }
 0x129   : > { %1479 = vmatmul.mubr.bf16.gmra.mrb[28].mxu1 %v5983_v4 }
 0x12a   : > { %1486 = vmatprep.mubr.bf16.mxu1 %v5985_v6 }
 0x12f   : > { %1117 = vmatmul.mubr.bf16.gmra.mrb[32].mxu0 %v5999_v9 }
 0x130   : > { %1124 = vmatprep.mubr.bf16.mxu0 %v6001_v15 }
 0x131   : > { %1487 = vmatmul.mubr.bf16.gmra.mrb[32].mxu1 %v5991_v7 }
 0x132   : > { %1494 = vmatprep.mubr.bf16.mxu1 %v5993_v8 }
 0x137   : > { %1125 = vmatmul.mubr.bf16.gmra.mrb[36].mxu0 %v6007_v20 }
 0x138   : > { %4532 = vmatprep.mubr.bf16.mxu0 %v799_v25 }
 0x139   : > { %1495 = vmatmul.mubr.bf16.gmra.mrb[36].mxu1 %v5999_v9 }
 0x13a   : > { %4568 = vmatprep.mubr.bf16.mxu1 %v720_v28 }
 0x13f   : > { %4533 = vmatmul.mubr.bf16.vlgmr.msra.gmra.mrb[40].mxu0 %v6011_v22 }
 0x140   : > { %4183 = vmatpush3.bf16.msra.mxu0 %v5085_v23  ;;  %4536 = vmatprep.mubr.bf16.mxu0 %v6013_v27 }
 0x141   : > { %4184 = vmatprep.subr.bf16.mxu0 %v5086_v26  ;;  %4569 = vmatmul.mubr.bf16.vlgmr.msra.gmra.mrb[40].mxu1 %v799_v25 }
 0x142   : > { %4572 = vmatprep.mubr.bf16.mxu1 %v6011_v22  ;;  %4589 = vmatpush3.bf16.msra.mxu1 %v5089_v1 }
 0x143   : > { %4590 = vmatprep.subr.bf16.mxu1 %v5091_v30 }
 0x144   : > { %4185 = vmatpush3.bf16.msra.mxu0 %v5087_v29 }
 0x145   : > { %4186 = vmatprep.subr.bf16.mxu0 %v5088_v34 }
 0x146   : > { %4591 = vmatpush3.bf16.msra.mxu1 %v5091_v30 }
 0x147   : > { %4537 = vmatmul.mubr.bf16.gmra.mrb[44].mxu0 %v6018_v32  ;;  %4592 = vmatprep.subr.bf16.mxu1 %v5094_v37 }
 0x148   : > { %4187 = vmatpush3.bf16.msra.mxu0 %v5090_v35  ;;  %4540 = vmatprep.mubr.bf16.mxu0 %v6020_v33 }
 0x149   : > { %4188 = vmatprep.subr.bf16.mxu0 %v5092_v36  ;;  %4573 = vmatmul.mubr.bf16.gmra.mrb[44].mxu1 %v6013_v27 }
 0x14a   : > { %4576 = vmatprep.mubr.bf16.mxu1 %v6018_v32  ;;  %4593 = vmatpush3.bf16.msra.mxu1 %v5094_v37 }
 0x14b   : > { %4594 = vmatprep.subr.bf16.mxu1 %v5097_v41 }
 0x14c   : > { %4189 = vmatpush3.bf16.msra.mxu0 %v5093_v38 }
 0x14d   : > { %4190 = vmatprep.subr.bf16.mxu0 %v5095_v42 }
 0x14e   : > { %4595 = vmatpush3.bf16.msra.mxu1 %v5097_v41 }
 0x14f   : > { %4541 = vmatmul.mubr.bf16.gmra.mrb[48].mxu0 %v814_v43  ;;  %4596 = vmatprep.subr.bf16.mxu1 %v5100_v47 }
 0x150   : > { %4191 = vmatpush3.bf16.msra.mxu0 %v5096_v45  ;;  %4544 = vmatprep.mubr.bf16.mxu0 %v817_v5 }
 0x151   : > { %4192 = vmatprep.subr.bf16.mxu0 %v5098_v46  ;;  %4577 = vmatmul.mubr.bf16.gmra.mrb[48].mxu1 %v6020_v33 }
 0x152   : > { %4580 = vmatprep.mubr.bf16.mxu1 %v814_v43  ;;  %4597 = vmatpush3.bf16.msra.mxu1 %v5100_v47 }
 0x153   : > { %4598 = vmatprep.subr.bf16.mxu1 %v5102_v48 }
 0x154   : > { %4193 = vmatpush3.bf16.msra.mxu0 %v5099_v12 }
 0x155   : > { %4194 = vmatprep.subr.bf16.mxu0 %v5101_v13 }
 0x156   : > { %4599 = vmatpush3.bf16.msra.mxu1 %v5102_v48 }
 0x157   : > { %4545 = vmatmul.mubr.bf16.gmra.mrb[52].mxu0 %v820_v16  ;;  %4600 = vmatprep.subr.bf16.mxu1 %v5104_v50 }
 0x158   : > { %4548 = vmatprep.mubr.bf16.mxu0 %v823_v17  ;;  %4195 = vmatpush3.bf16.msra.mxu0 %v5103_v49 }
 0x159   : > { %4196 = vmatprep.subr.bf16.mxu0 %v5105_v24  ;;  %4581 = vmatmul.mubr.bf16.gmra.mrb[52].mxu1 %v817_v5 }
 0x15a   : > { %4584 = vmatprep.mubr.bf16.mxu1 %v820_v16  ;;  %4601 = vmatpush3.bf16.msra.mxu1 %v5104_v50 }
 0x15b   : > { %4602 = vmatprep.subr.bf16.mxu1 %v5107_v52 }
 0x15c   : > { %4197 = vmatpush3.bf16.msra.mxu0 %v5106_v31 }
 0x15e   : > { %4603 = vmatpush3.bf16.msra.mxu1 %v5107_v52 }
 0x15f   : > { %4549 = vmatmul.mubr.bf16.gmra.mrb[56].mxu0 %v826_v53 }
 0x160   : > { %1872 = vmatprep.mubr.bf16.mxu0 %v5941_v18  ;;  %v1646_v18 = vld [vmem:[#allocation2 + $0x118] sm:$0xff] }
 0x161   : > { %4585 = vmatmul.mubr.bf16.gmra.mrb[56].mxu1 %v823_v17 }
 0x162   : > { %4604 = vmatprep.mubr.bf16.mxu1 %v6011_v22 }
 0x167   : > { %1873 = vmatmul.mubr.bf16.vlgmr.msra.gmra.mrb[60].mxu0 %v5944_v39  ;;  %v1645_v39 = vld [vmem:[#allocation2 + $0x110] sm:$0xff] }
 0x168   : > { %1880 = vmatprep.mubr.bf16.mxu0 %v5946_v51  ;;  %v1644_v51 = vld [vmem:[#allocation2 + $0x108] sm:$0xff] }
 0x169   : > { %4605 = vmatmul.mubr.bf16.vlgmr.msra.gmra.mrb[40].mxu1 %v6013_v27 }
 0x16a   : > { %4608 = vmatprep.mubr.bf16.mxu1 %v6018_v32 }
 0x16f   : > { %1881 = vmatmul.mubr.bf16.gmra.mrb[64].mxu0 %v5950_v56 }
 0x170   : > { %1888 = vmatprep.mubr.bf16.mxu0 %v5953_v58 }
 0x171   : > { %4609 = vmatmul.mubr.bf16.gmra.mrb[44].mxu1 %v6020_v33 }
 0x172   : > { %4612 = vmatprep.mubr.bf16.mxu1 %v814_v43 }
 0x177   : > { %1889 = vmatmul.mubr.bf16.gmra.mrb[68].mxu0 %v5959_v11 }
 0x178   : > { %1896 = vmatprep.mubr.bf16.mxu0 %v5961_v19 }
 0x179   : > { %4613 = vmatmul.mubr.bf16.gmra.mrb[48].mxu1 %v817_v5 }
 0x17a   : > { %4616 = vmatprep.mubr.bf16.mxu1 %v820_v16 }
 0x17f   : > { %1897 = vmatmul.mubr.bf16.gmra.mrb[72].mxu0 %v5966_v62 }
 0x180   : > { %1904 = vmatprep.mubr.bf16.mxu0 %v5969_v44 }
 0x181   : > { %4617 = vmatmul.mubr.bf16.gmra.mrb[52].mxu1 %v823_v17 }
 0x182   : > { %4620 = vmatprep.mubr.bf16.mxu1 %v826_v53 }
 0x187   : > { %1905 = vmatmul.mubr.bf16.gmra.mrb[76].mxu0 %v5975_v0 }
 0x188   : > { %1912 = vmatprep.mubr.bf16.mxu0 %v5977_v3 }
 0x189   : > { %4621 = vmatmul.mubr.bf16.gmra.mrb[56].mxu1 %v1646_v18 }
 0x18f   : > { %1913 = vmatmul.mubr.bf16.gmra.mrb[80].mxu0 %v5983_v4 }
 0x190   : > { %1920 = vmatprep.mubr.bf16.mxu0 %v5985_v6 }
 0x197   : > { %1921 = vmatmul.mubr.bf16.gmra.mrb[84].mxu0 %v5991_v7 }
 0x198   : > { %1928 = vmatprep.mubr.bf16.mxu0 %v5993_v8 }
 0x19f   : > { %1929 = vmatmul.mubr.bf16.gmra.mrb[88].mxu0 %v5999_v9 }
 0x1a0   : > { %1936 = vmatprep.mubr.bf16.mxu0 %v6001_v15 }
 0x1a7   : > { %1937 = vmatmul.mubr.bf16.gmra.mrb[92].mxu0 %v6007_v20 }
 0x1a8   : > { %1944 = vmatprep.mubr.bf16.mxu0 %v1645_v39 }
 0x1af   : > { %1945 = vmatmul.mubr.bf16.gmra.mrb[96].mxu0 %v1644_v51 }
 0x1c2   : > { %v4010_v54 = vpop.f32.mrb[0].mxu0 }
 0x1c3   : > { %v4011_v55 = vpop.f32.mrb[1].mxu0 }
 0x1c4   : > { %v6049_v56 = vadd.f32 %v4011_v55, %v4010_v54  ;;  %v4013_v57 = vpop.f32.mrb[2].mxu0  ;;  %v4104_v59 = vpop.f32.mrb[0].mxu1 }
 0x1c5   : > { %v4014_v58 = vpop.f32.mrb[3].mxu0  ;;  %v4105_v60 = vpop.f32.mrb[1].mxu1 }
 0x1c6   : > { %v6051_v10 = vadd.f32 %v4014_v58, %v4013_v57  ;;  %v6053_v11 = vadd.f32 %v4105_v60, %v4104_v59  ;;  %v4107_v14 = vpop.f32.mrb[2].mxu1 }
 0x1c7   : > { %v4108_v19 = vpop.f32.mrb[3].mxu1 }
 0x1c8   : > { %v6055_v61 = vadd.f32 %v4108_v19, %v4107_v14 }
 0x1ca   : > { %v4016_v21 = vpop.f32.mrb[4].mxu0 }
 0x1cb   : > { %v4017_v2 = vpop.f32.mrb[5].mxu0 }
 0x1cc   : > { %v6057_v62 = vadd.f32 %v4017_v2, %v4016_v21  ;;  %v4019_v40 = vpop.f32.mrb[6].mxu0  ;;  %v4110_v63 = vpop.f32.mrb[4].mxu1 }
 0x1cd   : > { %v4020_v44 = vpop.f32.mrb[7].mxu0  ;;  %v4111_v1 = vpop.f32.mrb[5].mxu1 }
 0x1ce   : > { %v6059_v0 = vadd.f32 %v4020_v44, %v4019_v40  ;;  %v6061_v3 = vadd.f32 %v4111_v1, %v4110_v63  ;;  %v4113_v4 = vpop.f32.mrb[6].mxu1 }
 0x1cf   : > { %v4114_v6 = vpop.f32.mrb[7].mxu1 }
 0x1d0   : > { %v6063_v7 = vadd.f32 %v4114_v6, %v4113_v4 }
 0x1d2   : > { %v4022_v8 = vpop.f32.mrb[8].mxu0 }
 0x1d3   : > { %v4023_v9 = vpop.f32.mrb[9].mxu0 }
 0x1d4   : > { %v6065_v15 = vadd.f32 %v4023_v9, %v4022_v8  ;;  %v4025_v20 = vpop.f32.mrb[10].mxu0  ;;  %v4116_v28 = vpop.f32.mrb[8].mxu1 }
 0x1d5   : > { %v4026_v25 = vpop.f32.mrb[11].mxu0  ;;  %v4117_v23 = vpop.f32.mrb[9].mxu1 }
 0x1d6   : > { %v6067_v22 = vadd.f32 %v4026_v25, %v4025_v20  ;;  %v6069_v26 = vadd.f32 %v4117_v23, %v4116_v28  ;;  %v4119_v27 = vpop.f32.mrb[10].mxu1 }
 0x1d7   : > { %v4120_v29 = vpop.f32.mrb[11].mxu1 }
 0x1d8   : > { %v6071_v30 = vadd.f32 %v4120_v29, %v4119_v27 }
 0x1da   : > { %v4028_v34 = vpop.f32.mrb[12].mxu0 }
 0x1db   : > { %v4029_v32 = vpop.f32.mrb[13].mxu0 }
 0x1dc   : > { %v6073_v35 = vadd.f32 %v4029_v32, %v4028_v34  ;;  %v4031_v33 = vpop.f32.mrb[14].mxu0  ;;  %v4122_v37 = vpop.f32.mrb[12].mxu1 }
 0x1dd   : > { %v4032_v36 = vpop.f32.mrb[15].mxu0  ;;  %v4123_v41 = vpop.f32.mrb[13].mxu1 }
 0x1de   : > { %v6075_v38 = vadd.f32 %v4032_v36, %v4031_v33  ;;  %v6077_v42 = vadd.f32 %v4123_v41, %v4122_v37  ;;  %v4125_v43 = vpop.f32.mrb[14].mxu1 }
 0x1df   : > { %v4126_v45 = vpop.f32.mrb[15].mxu1 }
 0x1e0   : > { %v6079_v5 = vadd.f32 %v4126_v45, %v4125_v43 }
 0x1e2   : > { %v4034_v46 = vpop.f32.mrb[16].mxu0 }
 0x1e3   : > { %v4035_v47 = vpop.f32.mrb[17].mxu0 }
 0x1e4   : > { %v6081_v12 = vadd.f32 %v4035_v47, %v4034_v46  ;;  %v4037_v48 = vpop.f32.mrb[18].mxu0  ;;  %v4128_v16 = vpop.f32.mrb[16].mxu1 }
 0x1e5   : > { %v4038_v13 = vpop.f32.mrb[19].mxu0  ;;  %v4129_v17 = vpop.f32.mrb[17].mxu1 }
 0x1e6   : > { %v6083_v49 = vadd.f32 %v4038_v13, %v4037_v48  ;;  %v6085_v50 = vadd.f32 %v4129_v17, %v4128_v16  ;;  %v4131_v24 = vpop.f32.mrb[18].mxu1 }
 0x1e7   : > { %v4132_v31 = vpop.f32.mrb[19].mxu1 }
 0x1e8   : > { %v6087_v52 = vadd.f32 %v4132_v31, %v4131_v24 }
 0x1ea   : > { %v4040_v53 = vpop.f32.mrb[20].mxu0 }
 0x1eb   : > { %v4041_v18 = vpop.f32.mrb[21].mxu0 }
 0x1ec   : > { %v6089_v39 = vadd.f32 %v4041_v18, %v4040_v53  ;;  %v4043_v51 = vpop.f32.mrb[22].mxu0  ;;  %v4134_v55 = vpop.f32.mrb[20].mxu1 }
 0x1ed   : > { %v4044_v54 = vpop.f32.mrb[23].mxu0  ;;  %v4135_v58 = vpop.f32.mrb[21].mxu1 }
 0x1ee   : > { %v6091_v57 = vadd.f32 %v4044_v54, %v4043_v51  ;;  %v6093_v59 = vadd.f32 %v4135_v58, %v4134_v55  ;;  %v4137_v60 = vpop.f32.mrb[22].mxu1 }
 0x1ef   : > { %v4138_v14 = vpop.f32.mrb[23].mxu1 }
 0x1f0   : > { %v6095_v19 = vadd.f32 %v4138_v14, %v4137_v60 }
 0x1f2   : > { %v4046_v21 = vpop.f32.mrb[24].mxu0 }
 0x1f3   : > { %v4047_v2 = vpop.f32.mrb[25].mxu0 }
 0x1f4   : > { %v6097_v40 = vadd.f32 %v4047_v2, %v4046_v21  ;;  %v4049_v44 = vpop.f32.mrb[26].mxu0  ;;  %v4140_v1 = vpop.f32.mrb[24].mxu1 }
 0x1f5   : > { %v4050_v63 = vpop.f32.mrb[27].mxu0  ;;  %v4141_v6 = vpop.f32.mrb[25].mxu1 }
 0x1f6   : > { %v6099_v4 = vadd.f32 %v4050_v63, %v4049_v44  ;;  %v6101_v8 = vadd.f32 %v4141_v6, %v4140_v1  ;;  %v4143_v9 = vpop.f32.mrb[26].mxu1 }
 0x1f7   : > { %v4144_v20 = vpop.f32.mrb[27].mxu1 }
 0x1f8   : > { %v6103_v25 = vadd.f32 %v4144_v20, %v4143_v9 }
 0x1fa   : > { %v4052_v28 = vpop.f32.mrb[28].mxu0 }
 0x1fb   : > { %v4053_v23 = vpop.f32.mrb[29].mxu0 }
 0x1fc   : > { %v6105_v27 = vadd.f32 %v4053_v23, %v4052_v28  ;;  %v4055_v29 = vpop.f32.mrb[30].mxu0  ;;  %v4146_v32 = vpop.f32.mrb[28].mxu1 }
 0x1fd   : > { %v4056_v34 = vpop.f32.mrb[31].mxu0  ;;  %v4147_v36 = vpop.f32.mrb[29].mxu1 }
 0x1fe   : > { %v6107_v33 = vadd.f32 %v4056_v34, %v4055_v29  ;;  %v6109_v37 = vadd.f32 %v4147_v36, %v4146_v32  ;;  %v4149_v41 = vpop.f32.mrb[30].mxu1 }
 0x1ff   : > { %v4150_v43 = vpop.f32.mrb[31].mxu1 }
 0x200   : > { %v6111_v45 = vadd.f32 %v4150_v43, %v4149_v41 }
 0x202   : > { %v4058_v46 = vpop.f32.mrb[32].mxu0 }
 0x203   : > { %v4059_v47 = vpop.f32.mrb[33].mxu0 }
 0x204   : > { %v6113_v48 = vadd.f32 %v4059_v47, %v4058_v46  ;;  %v4061_v13 = vpop.f32.mrb[34].mxu0  ;;  %v4152_v17 = vpop.f32.mrb[32].mxu1 }
 0x205   : > { %v4062_v16 = vpop.f32.mrb[35].mxu0  ;;  %v4153_v31 = vpop.f32.mrb[33].mxu1 }
 0x206   : > { %v6115_v24 = vadd.f32 %v4062_v16, %v4061_v13  ;;  %v6117_v53 = vadd.f32 %v4153_v31, %v4152_v17  ;;  %v4155_v18 = vpop.f32.mrb[34].mxu1 }
 0x207   : > { %v4156_v51 = vpop.f32.mrb[35].mxu1 }
 0x208   : > { %v6119_v54 = vadd.f32 %v4156_v51, %v4155_v18 }
 0x20a   : > { %v4064_v55 = vpop.f32.mrb[36].mxu0 }
 0x20b   : > { %v4065_v58 = vpop.f32.mrb[37].mxu0 }
 0x20c   : > { %v4066_v60 = vadd.f32 %v4065_v58, %v4064_v55  ;;  %v4067_v14 = vpop.f32.mrb[38].mxu0  ;;  %v4158_v2 = vpop.f32.mrb[36].mxu1 }
 0x20d   : > { %v4068_v21 = vpop.f32.mrb[39].mxu0  ;;  %v4159_v63 = vpop.f32.mrb[37].mxu1 }
 0x20e   : > { %v4069_v44 = vadd.f32 %v4068_v21, %v4067_v14  ;;  %v4160_v1 = vadd.f32 %v4159_v63, %v4158_v2  ;;  %v4161_v6 = vpop.f32.mrb[38].mxu1 }
 0x20f   : > { %v4162_v9 = vpop.f32.mrb[39].mxu1 }
 0x210   : > { %v4163_v20 = vadd.f32 %v4162_v9, %v4161_v6 }
 0x212   : > { %v4534_v28 = vpop.f32.mrb[40].mxu0 }
 0x213   : > { %v1176_v23 = vadd.f32 %v4534_v28, %v6057_v62  ;;  %v1167_v29 = vpop.f32.mrb[41].mxu0 }
 0x214   : > { %v1168_v34 = vadd.f32 %v6049_v56, %v1167_v29  ;;  %v4535_v32 = vpop.f32.mrb[42].mxu0 }
 0x215   : > { %v6124_v36 = vadd.f32 %v6061_v3, %v1176_v23  ;;  %v1179_v41 = vadd.f32 %v4535_v32, %v6059_v0  ;;  %v1170_v43 = vpop.f32.mrb[43].mxu0 }
 0x216   : > { %v1425_v46 = vadd.f32 %v6053_v11, %v1168_v34  ;;  %v1171_v47 = vadd.f32 %v6051_v10, %v1170_v43 }
 0x217   : > { %v6130_v13 = vadd.f32 %v6063_v7, %v1179_v41 }
 0x218   : > { %v1428_v16 = vadd.f32 %v6055_v61, %v1171_v47 }
 0x21a   : > { %v4538_v62 = vpop.f32.mrb[44].mxu0 }
 0x21b   : > { %v1192_v17 = vadd.f32 %v4538_v62, %v6073_v35  ;;  %v1183_v56 = vpop.f32.mrb[45].mxu0 }
 0x21c   : > { %v1184_v31 = vadd.f32 %v6065_v15, %v1183_v56  ;;  %v4539_v3 = vpop.f32.mrb[46].mxu0 }
 0x21d   : > { %v6136_v18 = vadd.f32 %v6077_v42, %v1192_v17  ;;  %v1195_v0 = vadd.f32 %v4539_v3, %v6075_v38  ;;  %v1186_v11 = vpop.f32.mrb[47].mxu0 }
 0x21e   : > { %v6140_v10 = vadd.f32 %v6069_v26, %v1184_v31  ;;  %v1187_v7 = vadd.f32 %v6067_v22, %v1186_v11 }
 0x21f   : > { %v6144_v61 = vadd.f32 %v6079_v5, %v1195_v0 }
 0x220   : > { %v6147_v35 = vadd.f32 %v6071_v30, %v1187_v7 }
 0x222   : > { %v4542_v51 = vpop.f32.mrb[48].mxu0 }
 0x223   : > { %v1208_v15 = vadd.f32 %v4542_v51, %v6089_v39  ;;  %v1199_v55 = vpop.f32.mrb[49].mxu0 }
 0x224   : > { %v1200_v42 = vadd.f32 %v6081_v12, %v1199_v55  ;;  %v4543_v58 = vpop.f32.mrb[50].mxu0 }
 0x225   : > { %v6152_v38 = vadd.f32 %v6093_v59, %v1208_v15  ;;  %v1211_v26 = vadd.f32 %v4543_v58, %v6091_v57  ;;  %v1202_v14 = vpop.f32.mrb[51].mxu0 }
 0x226   : > { %v6156_v22 = vadd.f32 %v6085_v50, %v1200_v42  ;;  %v1203_v5 = vadd.f32 %v6083_v49, %v1202_v14 }
 0x227   : > { %v6160_v30 = vadd.f32 %v6095_v19, %v1211_v26 }
 0x228   : > { %v6163_v39 = vadd.f32 %v6087_v52, %v1203_v5 }
 0x22a   : > { %v4546_v21 = vpop.f32.mrb[52].mxu0 }
 0x22b   : > { %v1224_v12 = vadd.f32 %v4546_v21, %v6105_v27  ;;  %v1215_v2 = vpop.f32.mrb[53].mxu0 }
 0x22c   : > { %v1216_v59 = vadd.f32 %v6097_v40, %v1215_v2  ;;  %v4547_v63 = vpop.f32.mrb[54].mxu0 }
 0x22d   : > { %v6168_v57 = vadd.f32 %v6109_v37, %v1224_v12  ;;  %v1227_v50 = vadd.f32 %v4547_v63, %v6107_v33  ;;  %v1218_v6 = vpop.f32.mrb[55].mxu0 }
 0x22e   : > { %v6172_v49 = vadd.f32 %v6101_v8, %v1216_v59  ;;  %v1219_v19 = vadd.f32 %v6099_v4, %v1218_v6 }
 0x22f   : > { %v6176_v52 = vadd.f32 %v6111_v45, %v1227_v50 }
 0x230   : > { %v6179_v27 = vadd.f32 %v6103_v25, %v1219_v19 }
 0x232   : > { %v4550_v9 = vpop.f32.mrb[56].mxu0 }
 0x233   : > { %v1240_v40 = vadd.f32 %v4550_v9, %v4066_v60  ;;  %v1231_v28 = vpop.f32.mrb[57].mxu0 }
 0x234   : > { %v1232_v37 = vadd.f32 %v6113_v48, %v1231_v28  ;;  %v4551_v23 = vpop.f32.mrb[58].mxu0 }
 0x235   : > { %v6182_v29 = vadd.f32 %v4160_v1, %v1240_v40  ;;  %v1243_v33 = vadd.f32 %v4551_v23, %v4069_v44  ;;  %v1234_v34 = vpop.f32.mrb[59].mxu0 }
 0x236   : > { %v6185_v8 = vadd.f32 %v6117_v53, %v1232_v37  ;;  %v1235_v4 = vadd.f32 %v6115_v24, %v1234_v34  ;;  %v6196_v53 = vld [vmem:[%s6661_s5] ss:$0 sm:$0xff] }
 0x237   : > { %v6188_v45 = vadd.f32 %v4163_v20, %v1243_v33 }
 0x238   : > { %v6191_v25 = vadd.f32 %v6119_v54, %v1235_v4  ;;  %v6201_v54 = vld [vmem:[%s6700_s17] ss:$0 sm:$0xff] }
 0x23a   : > { %v4198_v32 = vpop.f32.mrb[60].mxu0 }
 0x23b   : > { %v4199_v60 = vpop.f32.mrb[61].mxu0 }
 0x23c   : > { %v4200_v41 = vadd.f32 %v4199_v60, %v4198_v32  ;;  %v4201_v43 = vpop.f32.mrb[62].mxu0  ;;  %v4606_v48 = vpop.f32.mrb[40].mxu1 }
 0x23d   : > { %v4202_v47 = vpop.f32.mrb[63].mxu0  ;;  %v1987_v62 = vpop.f32.mrb[41].mxu1 }
 0x23e   : > { %v4203_v1 = vadd.f32 %v4202_v47, %v4201_v43  ;;  %v4726_v44 = vadd.f32 %v4200_v41, %v1425_v46  ;;  %v4607_v24 = vpop.f32.mrb[42].mxu1 }
 0x23f   : > { %v1990_v17 = vpop.f32.mrb[43].mxu1 }
 0x240   : > { %v4727_v20 = vadd.f32 %v4726_v44, %v1987_v62  ;;  %v4734_v56 = vadd.f32 %v4203_v1, %v1428_v16 }
 0x242   : > { %v2093_v31 = vmul.f32 %v4727_v20, %v6196_v53  ;;  %v4735_v3 = vadd.f32 %v4734_v56, %v1990_v17  ;;  %v4204_v0 = vpop.f32.mrb[64].mxu0 }
 0x243   : > { %v4205_v11 = vpop.f32.mrb[65].mxu0 }
 0x244   : > { %v2120_v46 = vadd.f32 %v6201_v54, %v2093_v31  ;;  %v2094_v7 = vmul.f32 %v4735_v3, %v6196_v53  ;;  %v4206_v51 = vadd.f32 %v4205_v11, %v4204_v0  ;;  %v4207_v15 = vpop.f32.mrb[66].mxu0  ;;  %v6206_v55 = vpop.f32.mrb[44].mxu1 }
 0x245   : > { %v4208_v42 = vpop.f32.mrb[67].mxu0  ;;  %v2003_v5 = vpop.f32.mrb[45].mxu1 }
 0x246   : > { %v2140_v16 = vmax.f32 %v2120_v46, 0.0  ;;  %v2121_v58 = vadd.f32 %v6201_v54, %v2094_v7  ;;  %v4722_v26 = vadd.f32 %v4206_v51, %v6124_v36  ;;  %v4209_v14 = vadd.f32 %v4208_v42, %v4207_v15  ;;  %v6210_v21 = vpop.f32.mrb[46].mxu1 }
 0x247   : > { %v2006_v63 = vpop.f32.mrb[47].mxu1 }
 0x248   : > { %v2180_v12 = vrot.slane %v2140_v16, 7  ;;  %v2141_v2 = vmax.f32 %v2121_v58, 0.0  ;;  %v4723_v59 = vadd.f32 %v4722_v26, %v4606_v48  ;;  %v4730_v50 = vadd.f32 %v4209_v14, %v6130_v13 }
 0x249   : > { %v2240_v6 = vrot.slane %v2140_v16, 1 }
 0x24a   : > { %v2181_v19 = vrot.slane %v2141_v2, 7  ;;  %v2241_v9 = vrot.slane %v2141_v2, 1  ;;  %v2320_v40 = vpack.c.bf16 %v2141_v2, %v2140_v16  ;;  %v4210_v28 = vpop.f32.mrb[68].mxu0  ;;  %v2230_v37 = vsel %vm479_vm0, 0.0, %v2180_v12 }
 0x24b   : > { %v2095_v23 = vmul.f32 %v4723_v59, %v6196_v53  ;;  %v4731_v36 = vadd.f32 %v4730_v50, %v4607_v24  ;;  %v4211_v33 = vpop.f32.mrb[69].mxu0 }
 0x24c   : > { %v2182_v34 = vsel %vm479_vm0, %v2180_v12, %v2181_v19  ;;  %v2242_v4 = vsel %vm552_vm1, %v2240_v6, %v2241_v9  ;;  %v2290_v32 = vsel %vm552_vm1, %v2241_v9, 0.0  ;;  %2330 = vst [vmem:[#allocation2 + $0x8] sm:$0xff] %v2320_v40  ;;  %v4212_v60 = vadd.f32 %v4211_v33, %v4210_v28  ;;  %v4213_v13 = vpop.f32.mrb[70].mxu0  ;;  %v6220_v1 = vpop.f32.mrb[48].mxu1 }
 0x24d   : > { %v2300_v41 = vpack.c.bf16 %v2182_v34, %v2230_v37  ;;  %v2340_v43 = vpack.c.bf16 %v2290_v32, %v2242_v4  ;;  %v2122_v48 = vadd.f32 %v6201_v54, %v2095_v23  ;;  %v2096_v47 = vmul.f32 %v4731_v36, %v6196_v53  ;;  %v4214_v62 = vpop.f32.mrb[71].mxu0  ;;  %v6223_v20 = vpop.f32.mrb[49].mxu1 }
 0x24e   : > { %v4742_v44 = vadd.f32 %v4212_v60, %v6140_v10  ;;  %v4215_v24 = vadd.f32 %v4214_v62, %v4213_v13  ;;  %v6226_v31 = vpop.f32.mrb[50].mxu1 }
 0x24f   : > { %2310 = vst [vmem:[#allocation2] sm:$0xff] %v2300_v41  ;;  %2350 = vst [vmem:[#allocation2 + $0x10] sm:$0xff] %v2340_v43  ;;  %v2142_v17 = vmax.f32 %v2122_v48, 0.0  ;;  %v2123_v56 = vadd.f32 %v6201_v54, %v2096_v47  ;;  %v6229_v11 = vpop.f32.mrb[51].mxu1 }
 0x250   : > { %v4743_v3 = vadd.f32 %v4742_v44, %v2003_v5  ;;  %v4750_v0 = vadd.f32 %v4215_v24, %v6147_v35 }
 0x251   : > { %v2183_v46 = vrot.slane %v2142_v17, 7  ;;  %v2143_v7 = vmax.f32 %v2123_v56, 0.0  ;;  %v2243_v42 = vrot.slane %v2142_v17, 1 }
 0x252   : > { %v2097_v51 = vmul.f32 %v4743_v3, %v6196_v53  ;;  %v4751_v10 = vadd.f32 %v4750_v0, %v2006_v63  ;;  %v4216_v15 = vpop.f32.mrb[72].mxu0 }
 0x253   : > { %v2184_v16 = vrot.slane %v2143_v7, 7  ;;  %v2244_v58 = vrot.slane %v2143_v7, 1  ;;  %v2321_v26 = vpack.c.bf16 %v2143_v7, %v2142_v17  ;;  %v4217_v14 = vpop.f32.mrb[73].mxu0  ;;  %v2231_v35 = vsel %vm479_vm0, 0.0, %v2183_v46 }
 0x254   : > { %v2124_v12 = vadd.f32 %v6201_v54, %v2097_v51  ;;  %v2098_v2 = vmul.f32 %v4751_v10, %v6196_v53  ;;  %v4218_v5 = vadd.f32 %v4217_v14, %v4216_v15  ;;  %v4219_v59 = vpop.f32.mrb[74].mxu0  ;;  %v6238_v19 = vpop.f32.mrb[52].mxu1 }
 0x255   : > { %v2185_v50 = vsel %vm479_vm0, %v2183_v46, %v2184_v16  ;;  %v2245_v6 = vsel %vm552_vm1, %v2243_v42, %v2244_v58  ;;  %v2291_v63 = vsel %vm552_vm1, %v2244_v58, 0.0  ;;  %2331 = vst [vmem:[#allocation2 + $0x20] sm:$0xff] %v2321_v26  ;;  %v4220_v9 = vpop.f32.mrb[75].mxu0  ;;  %v6241_v36 = vpop.f32.mrb[53].mxu1 }
 0x256   : > { %v2301_v40 = vpack.c.bf16 %v2185_v50, %v2231_v35  ;;  %v2341_v28 = vpack.c.bf16 %v2291_v63, %v2245_v6  ;;  %v2144_v37 = vmax.f32 %v2124_v12, 0.0  ;;  %v2125_v23 = vadd.f32 %v6201_v54, %v2098_v2  ;;  %v6244_v4 = vpop.f32.mrb[54].mxu1 }
 0x257   : > { %v4738_v33 = vadd.f32 %v4218_v5, %v6136_v18  ;;  %v4221_v34 = vadd.f32 %v4220_v9, %v4219_v59  ;;  %v6246_v13 = vpop.f32.mrb[55].mxu1 }
 0x258   : > { %2311 = vst [vmem:[#allocation2 + $0x18] sm:$0xff] %v2301_v40  ;;  %2351 = vst [vmem:[#allocation2 + $0x28] sm:$0xff] %v2341_v28  ;;  %v2186_v32 = vrot.slane %v2144_v37, 7  ;;  %v2145_v60 = vmax.f32 %v2125_v23, 0.0  ;;  %v2246_v48 = vrot.slane %v2144_v37, 1 }
 0x259   : > { %v4739_v41 = vadd.f32 %v4738_v33, %v6206_v55  ;;  %v4746_v43 = vadd.f32 %v4221_v34, %v6144_v61 }
 0x25a   : > { %v2187_v47 = vrot.slane %v2145_v60, 7  ;;  %v2247_v62 = vrot.slane %v2145_v60, 1  ;;  %v2322_v44 = vpack.c.bf16 %v2145_v60, %v2144_v37  ;;  %v4222_v24 = vpop.f32.mrb[76].mxu0  ;;  %v2232_v18 = vsel %vm479_vm0, 0.0, %v2186_v32 }
 0x25b   : > { %v2099_v17 = vmul.f32 %v4739_v41, %v6196_v53  ;;  %v4747_v56 = vadd.f32 %v4746_v43, %v6210_v21  ;;  %v4223_v3 = vpop.f32.mrb[77].mxu0 }
 0x25c   : > { %v2188_v0 = vsel %vm479_vm0, %v2186_v32, %v2187_v47  ;;  %v2248_v46 = vsel %vm552_vm1, %v2246_v48, %v2247_v62  ;;  %v2292_v55 = vsel %vm552_vm1, %v2247_v62, 0.0  ;;  %2332 = vst [vmem:[#allocation2 + $0x38] sm:$0xff] %v2322_v44  ;;  %v4224_v61 = vadd.f32 %v4223_v3, %v4222_v24  ;;  %v4225_v7 = vpop.f32.mrb[78].mxu0  ;;  %v6258_v16 = vpop.f32.mrb[56].mxu1 }
 0x25d   : > { %v2302_v51 = vpack.c.bf16 %v2188_v0, %v2232_v18  ;;  %v2342_v10 = vpack.c.bf16 %v2292_v55, %v2248_v46  ;;  %v2126_v15 = vadd.f32 %v6201_v54, %v2099_v17  ;;  %v2100_v42 = vmul.f32 %v4747_v56, %v6196_v53  ;;  %v4226_v58 = vpop.f32.mrb[79].mxu0  ;;  %v6261_v14 = vpop.f32.mrb[57].mxu1 }
 0x25e   : > { %v4758_v21 = vadd.f32 %v4224_v61, %v6156_v22  ;;  %v4227_v26 = vadd.f32 %v4226_v58, %v4225_v7  ;;  %v6264_v5 = vpop.f32.mrb[58].mxu1 }
 0x25f   : > { %2312 = vst [vmem:[#allocation2 + $0x30] sm:$0xff] %v2302_v51  ;;  %2352 = vst [vmem:[#allocation2 + $0x40] sm:$0xff] %v2342_v10  ;;  %v2146_v12 = vmax.f32 %v2126_v15, 0.0  ;;  %v2127_v2 = vadd.f32 %v6201_v54, %v2100_v42  ;;  %v6268_v50 = vpop.f32.mrb[59].mxu1 }
 0x260   : > { %v4759_v59 = vadd.f32 %v4758_v21, %v6223_v20  ;;  %v4766_v35 = vadd.f32 %v4227_v26, %v6163_v39 }
 0x261   : > { %v2189_v6 = vrot.slane %v2146_v12, 7  ;;  %v2147_v63 = vmax.f32 %v2127_v2, 0.0  ;;  %v2249_v28 = vrot.slane %v2146_v12, 1 }
 0x262   : > { %v2101_v22 = vmul.f32 %v4759_v59, %v6196_v53  ;;  %v4767_v9 = vadd.f32 %v4766_v35, %v6229_v11  ;;  %v4228_v40 = vpop.f32.mrb[80].mxu0 }
 0x263   : > { %v2190_v37 = vrot.slane %v2147_v63, 7  ;;  %v2250_v23 = vrot.slane %v2147_v63, 1  ;;  %v2323_v33 = vpack.c.bf16 %v2147_v63, %v2146_v12  ;;  %v4229_v34 = vpop.f32.mrb[81].mxu0  ;;  %v2233_v41 = vsel %vm479_vm0, 0.0, %v2189_v6 }
 0x264   : > { %v2128_v32 = vadd.f32 %v6201_v54, %v2101_v22  ;;  %v2102_v20 = vmul.f32 %v4767_v9, %v6196_v53  ;;  %v4230_v60 = vadd.f32 %v4229_v34, %v4228_v40  ;;  %v4231_v39 = vpop.f32.mrb[82].mxu0 }
 0x265   : > { %v2191_v43 = vsel %vm479_vm0, %v2189_v6, %v2190_v37  ;;  %v2251_v48 = vsel %vm552_vm1, %v2249_v28, %v2250_v23  ;;  %v2293_v11 = vsel %vm552_vm1, %v2250_v23, 0.0  ;;  %2333 = vst [vmem:[#allocation2 + $0x50] sm:$0xff] %v2323_v33  ;;  %v4232_v47 = vpop.f32.mrb[83].mxu0 }
 0x266   : > { %v2303_v62 = vpack.c.bf16 %v2191_v43, %v2233_v41  ;;  %v2343_v44 = vpack.c.bf16 %v2293_v11, %v2251_v48  ;;  %v2148_v24 = vmax.f32 %v2128_v32, 0.0  ;;  %v2129_v18 = vadd.f32 %v6201_v54, %v2102_v20 }
 0x267   : > { %v4754_v17 = vadd.f32 %v4230_v60, %v6152_v38  ;;  %v4233_v56 = vadd.f32 %v4232_v47, %v4231_v39 }
 0x268   : > { %2313 = vst [vmem:[#allocation2 + $0x48] sm:$0xff] %v2303_v62  ;;  %2353 = vst [vmem:[#allocation2 + $0x58] sm:$0xff] %v2343_v44  ;;  %v2192_v3 = vrot.slane %v2148_v24, 7  ;;  %v2149_v0 = vmax.f32 %v2129_v18, 0.0  ;;  %v2252_v61 = vrot.slane %v2148_v24, 1 }
 0x269   : > { %v4755_v46 = vadd.f32 %v4754_v17, %v6220_v1  ;;  %v4762_v55 = vadd.f32 %v4233_v56, %v6160_v30 }
 0x26a   : > { %v2193_v7 = vrot.slane %v2149_v0, 7  ;;  %v2253_v51 = vrot.slane %v2149_v0, 1  ;;  %v2324_v10 = vpack.c.bf16 %v2149_v0, %v2148_v24  ;;  %v4234_v15 = vpop.f32.mrb[84].mxu0  ;;  %v2234_v42 = vsel %vm479_vm0, 0.0, %v2192_v3 }
 0x26b   : > { %v2103_v58 = vmul.f32 %v4755_v46, %v6196_v53  ;;  %v4763_v38 = vadd.f32 %v4762_v55, %v6226_v31  ;;  %v4235_v21 = vpop.f32.mrb[85].mxu0 }
 0x26c   : > { %v2194_v26 = vsel %vm479_vm0, %v2192_v3, %v2193_v7  ;;  %v2254_v12 = vsel %vm552_vm1, %v2252_v61, %v2253_v51  ;;  %v2294_v1 = vsel %vm552_vm1, %v2253_v51, 0.0  ;;  %2334 = vst [vmem:[#allocation2 + $0x68] sm:$0xff] %v2324_v10  ;;  %v4236_v30 = vadd.f32 %v4235_v21, %v4234_v15  ;;  %v4237_v2 = vpop.f32.mrb[86].mxu0 }
 0x26d   : > { %v2304_v59 = vpack.c.bf16 %v2194_v26, %v2234_v42  ;;  %v2344_v35 = vpack.c.bf16 %v2294_v1, %v2254_v12  ;;  %v2130_v6 = vadd.f32 %v6201_v54, %v2103_v58  ;;  %v2104_v63 = vmul.f32 %v4763_v38, %v6196_v53  ;;  %v4238_v22 = vpop.f32.mrb[87].mxu0 }
 0x26e   : > { %v4774_v9 = vadd.f32 %v4236_v30, %v6172_v49  ;;  %v4239_v31 = vadd.f32 %v4238_v22, %v4237_v2 }
 0x26f   : > { %2314 = vst [vmem:[#allocation2 + $0x60] sm:$0xff] %v2304_v59  ;;  %2354 = vst [vmem:[#allocation2 + $0x70] sm:$0xff] %v2344_v35  ;;  %v2150_v40 = vmax.f32 %v2130_v6, 0.0  ;;  %v2131_v28 = vadd.f32 %v6201_v54, %v2104_v63 }
 0x270   : > { %v4775_v37 = vadd.f32 %v4774_v9, %v6241_v36  ;;  %v4782_v23 = vadd.f32 %v4239_v31, %v6179_v27 }
 0x271   : > { %v2195_v33 = vrot.slane %v2150_v40, 7  ;;  %v2151_v34 = vmax.f32 %v2131_v28, 0.0  ;;  %v2255_v39 = vrot.slane %v2150_v40, 1 }
 0x272   : > { %v2105_v32 = vmul.f32 %v4775_v37, %v6196_v53  ;;  %v4783_v20 = vadd.f32 %v4782_v23, %v6246_v13  ;;  %v4240_v60 = vpop.f32.mrb[88].mxu0 }
 0x273   : > { %v2196_v41 = vrot.slane %v2151_v34, 7  ;;  %v2256_v49 = vrot.slane %v2151_v34, 1  ;;  %v2325_v43 = vpack.c.bf16 %v2151_v34, %v2150_v40  ;;  %v4241_v48 = vpop.f32.mrb[89].mxu0  ;;  %v2235_v27 = vsel %vm479_vm0, 0.0, %v2195_v33 }
 0x274   : > { %v2132_v11 = vadd.f32 %v6201_v54, %v2105_v32  ;;  %v2106_v47 = vmul.f32 %v4783_v20, %v6196_v53  ;;  %v4242_v62 = vadd.f32 %v4241_v48, %v4240_v60  ;;  %v4243_v36 = vpop.f32.mrb[90].mxu0 }
 0x275   : > { %v2197_v44 = vsel %vm479_vm0, %v2195_v33, %v2196_v41  ;;  %v2257_v24 = vsel %vm552_vm1, %v2255_v39, %v2256_v49  ;;  %v2295_v13 = vsel %vm552_vm1, %v2256_v49, 0.0  ;;  %2335 = vst [vmem:[#allocation2 + $0x80] sm:$0xff] %v2325_v43  ;;  %v4244_v18 = vpop.f32.mrb[91].mxu0 }
 0x276   : > { %v2305_v17 = vpack.c.bf16 %v2197_v44, %v2235_v27  ;;  %v2345_v56 = vpack.c.bf16 %v2295_v13, %v2257_v24  ;;  %v2152_v3 = vmax.f32 %v2132_v11, 0.0  ;;  %v2133_v0 = vadd.f32 %v6201_v54, %v2106_v47 }
 0x277   : > { %v4770_v46 = vadd.f32 %v4242_v62, %v6168_v57  ;;  %v4245_v55 = vadd.f32 %v4244_v18, %v4243_v36 }
 0x278   : > { %2315 = vst [vmem:[#allocation2 + $0x78] sm:$0xff] %v2305_v17  ;;  %2355 = vst [vmem:[#allocation2 + $0x88] sm:$0xff] %v2345_v56  ;;  %v2198_v61 = vrot.slane %v2152_v3, 7  ;;  %v2153_v7 = vmax.f32 %v2133_v0, 0.0  ;;  %v2258_v15 = vrot.slane %v2152_v3, 1 }
 0x279   : > { %v4771_v51 = vadd.f32 %v4770_v46, %v6238_v19  ;;  %v4778_v10 = vadd.f32 %v4245_v55, %v6176_v52 }
 0x27a   : > { %v2199_v42 = vrot.slane %v2153_v7, 7  ;;  %v2259_v58 = vrot.slane %v2153_v7, 1  ;;  %v2326_v38 = vpack.c.bf16 %v2153_v7, %v2152_v3  ;;  %v4246_v21 = vpop.f32.mrb[92].mxu0  ;;  %v2236_v26 = vsel %vm479_vm0, 0.0, %v2198_v61 }
 0x27b   : > { %v2107_v12 = vmul.f32 %v4771_v51, %v6196_v53  ;;  %v4779_v57 = vadd.f32 %v4778_v10, %v6244_v4  ;;  %v4247_v1 = vpop.f32.mrb[93].mxu0 }
 0x27c   : > { %v2200_v30 = vsel %vm479_vm0, %v2198_v61, %v2199_v42  ;;  %v2260_v2 = vsel %vm552_vm1, %v2258_v15, %v2259_v58  ;;  %v2296_v19 = vsel %vm552_vm1, %v2259_v58, 0.0  ;;  %2336 = vst [vmem:[#allocation2 + $0x98] sm:$0xff] %v2326_v38  ;;  %v4248_v52 = vadd.f32 %v4247_v1, %v4246_v21  ;;  %v4249_v59 = vpop.f32.mrb[94].mxu0 }
 0x27d   : > { %v2306_v35 = vpack.c.bf16 %v2200_v30, %v2236_v26  ;;  %v2346_v6 = vpack.c.bf16 %v2296_v19, %v2260_v2  ;;  %v2134_v63 = vadd.f32 %v6201_v54, %v2107_v12  ;;  %v2108_v22 = vmul.f32 %v4779_v57, %v6196_v53  ;;  %v4250_v9 = vpop.f32.mrb[95].mxu0 }
 0x27e   : > { %v4790_v31 = vadd.f32 %v4248_v52, %v6185_v8  ;;  %v4251_v4 = vadd.f32 %v4250_v9, %v4249_v59 }
 0x27f   : > { %2316 = vst [vmem:[#allocation2 + $0x90] sm:$0xff] %v2306_v35  ;;  %2356 = vst [vmem:[#allocation2 + $0xa0] sm:$0xff] %v2346_v6  ;;  %v2154_v40 = vmax.f32 %v2134_v63, 0.0  ;;  %v2135_v28 = vadd.f32 %v6201_v54, %v2108_v22 }
 0x280   : > { %v4791_v37 = vadd.f32 %v4790_v31, %v6261_v14  ;;  %v4798_v23 = vadd.f32 %v4251_v4, %v6191_v25 }
 0x281   : > { %v2201_v33 = vrot.slane %v2154_v40, 7  ;;  %v2155_v34 = vmax.f32 %v2135_v28, 0.0  ;;  %v2261_v39 = vrot.slane %v2154_v40, 1 }
 0x282   : > { %v2109_v32 = vmul.f32 %v4791_v37, %v6196_v53  ;;  %v4799_v20 = vadd.f32 %v4798_v23, %v6268_v50  ;;  %v4252_v60 = vpop.f32.mrb[96].mxu0 }
 0x283   : > { %v2202_v41 = vrot.slane %v2155_v34, 7  ;;  %v2262_v8 = vrot.slane %v2155_v34, 1  ;;  %v2327_v49 = vpack.c.bf16 %v2155_v34, %v2154_v40  ;;  %v4253_v43 = vpop.f32.mrb[97].mxu0  ;;  %v2237_v25 = vsel %vm479_vm0, 0.0, %v2201_v33 }
 0x284   : > { %v2136_v48 = vadd.f32 %v6201_v54, %v2109_v32  ;;  %v2110_v11 = vmul.f32 %v4799_v20, %v6196_v53  ;;  %v4254_v47 = vadd.f32 %v4253_v43, %v4252_v60  ;;  %v4255_v14 = vpop.f32.mrb[98].mxu0 }
 0x285   : > { %v2203_v62 = vsel %vm479_vm0, %v2201_v33, %v2202_v41  ;;  %v2263_v36 = vsel %vm552_vm1, %v2261_v39, %v2262_v8  ;;  %v2297_v50 = vsel %vm552_vm1, %v2262_v8, 0.0  ;;  %2337 = vst [vmem:[#allocation2 + $0xb0] sm:$0xff] %v2327_v49  ;;  %v4256_v27 = vpop.f32.mrb[99].mxu0 }
 0x286   : > { %v2307_v44 = vpack.c.bf16 %v2203_v62, %v2237_v25  ;;  %v2347_v24 = vpack.c.bf16 %v2297_v50, %v2263_v36  ;;  %v2156_v13 = vmax.f32 %v2136_v48, 0.0  ;;  %v2137_v18 = vadd.f32 %v6201_v54, %v2110_v11 }
 0x287   : > { %v4786_v17 = vadd.f32 %v4254_v47, %v6182_v29  ;;  %v4257_v56 = vadd.f32 %v4256_v27, %v4255_v14 }
 0x288   : > { %2317 = vst [vmem:[#allocation2 + $0xa8] sm:$0xff] %v2307_v44  ;;  %2357 = vst [vmem:[#allocation2 + $0xb8] sm:$0xff] %v2347_v24  ;;  %v2204_v3 = vrot.slane %v2156_v13, 7  ;;  %v2157_v0 = vmax.f32 %v2137_v18, 0.0  ;;  %v2264_v61 = vrot.slane %v2156_v13, 1 }
 0x289   : > { %v4787_v46 = vadd.f32 %v4786_v17, %v6258_v16  ;;  %v4794_v55 = vadd.f32 %v4257_v56, %v6188_v45 }
 0x28a   : > { %v2205_v7 = vrot.slane %v2157_v0, 7  ;;  %v2265_v51 = vrot.slane %v2157_v0, 1  ;;  %v2328_v10 = vpack.c.bf16 %v2157_v0, %v2156_v13  ;;  %v2238_v58 = vsel %vm479_vm0, 0.0, %v2204_v3 }
 0x28b   : > { %v2111_v15 = vmul.f32 %v4787_v46, %v6196_v53  ;;  %v4795_v42 = vadd.f32 %v4794_v55, %v6264_v5 }
 0x28c   : > { %v2206_v29 = vsel %vm479_vm0, %v2204_v3, %v2205_v7  ;;  %v2266_v38 = vsel %vm552_vm1, %v2264_v61, %v2265_v51  ;;  %v2298_v21 = vsel %vm552_vm1, %v2265_v51, 0.0  ;;  %2338 = vst [vmem:[#allocation2 + $0xc8] sm:$0xff] %v2328_v10 }
 0x28d   : > { %v2308_v16 = vpack.c.bf16 %v2206_v29, %v2238_v58  ;;  %v2348_v26 = vpack.c.bf16 %v2298_v21, %v2266_v38  ;;  %v2138_v45 = vadd.f32 %v6201_v54, %v2111_v15  ;;  %v2112_v12 = vmul.f32 %v4795_v42, %v6196_v53 }
 0x28f   : > { %2318 = vst [vmem:[#allocation2 + $0xc0] sm:$0xff] %v2308_v16  ;;  %2358 = vst [vmem:[#allocation2 + $0xd0] sm:$0xff] %v2348_v26  ;;  %v2158_v57 = vmax.f32 %v2138_v45, 0.0  ;;  %v2139_v5 = vadd.f32 %v6201_v54, %v2112_v12  ;;  %v5403_v54 = vmov (!%p3816_p4), 0  }
 0x290   : > { %2363 = vst [vmem:[#allocation2] sm:$0xff] (!%p3816_p4), %v5403_v54  ;;  %2364 = vst [vmem:[#allocation2 + $0x8] sm:$0xff] (!%p3816_p4), %v5403_v54 }
 0x291   : > { %v2207_v1 = vrot.slane %v2158_v57, 7  ;;  %v2159_v30 = vmax.f32 %v2139_v5, 0.0  ;;  %v2267_v2 = vrot.slane %v2158_v57, 1  ;;  %2365 = vst [vmem:[#allocation2 + $0x10] sm:$0xff] (!%p3816_p4), %v5403_v54 }
 0x292   : > { %2362 = sbr.rel (%p3816_p4) target bundleno = 665 (0x299), region = 72 }
 0x293   : > { %v2208_v19 = vrot.slane %v2159_v30, 7  ;;  %v2268_v52 = vrot.slane %v2159_v30, 1  ;;  %v2329_v59 = vpack.c.bf16 %v2159_v30, %v2158_v57  ;;  %v2239_v35 = vsel %vm479_vm0, 0.0, %v2207_v1 }
 0x295   : > { %v2209_v6 = vsel %vm479_vm0, %v2207_v1, %v2208_v19  ;;  %v2269_v63 = vsel %vm552_vm1, %v2267_v2, %v2268_v52  ;;  %v2299_v22 = vsel %vm552_vm1, %v2268_v52, 0.0  ;;  %2339 = vst [vmem:[#allocation2 + $0xe0] sm:$0xff] %v2329_v59 }
 0x296   : > { %v2309_v53 = vpack.c.bf16 %v2209_v6, %v2239_v35  ;;  %v2349_v9 = vpack.c.bf16 %v2299_v22, %v2269_v63 }
 0x298   : > { %2319 = vst [vmem:[#allocation2 + $0xd8] sm:$0xff] %v2309_v53  ;;  %2359 = vst [vmem:[#allocation2 + $0xe8] sm:$0xff] %v2349_v9 }
 0x299 PF: > { %2368 = sbr.rel (%p3817_p1) target bundleno = 672 (0x2a0), region = 76  ;;  %v5404_v31 = vmov (!%p3817_p1), 0  }
 0x29a   : > { %2370 = vst [vmem:[#allocation2 + $0xd8] sm:$0xff] (!%p3817_p1), %v5404_v31  ;;  %2371 = vst [vmem:[#allocation2 + $0xe0] sm:$0xff] (!%p3817_p1), %v5404_v31 }
 0x29b   : > { %2372 = vst [vmem:[#allocation2 + $0xe8] sm:$0xff] (!%p3817_p1), %v5404_v31 }
 0x2a0 PF: > { %v5108_v4 = vld [vmem:[#allocation8 + $0x100] sm:$0xff]   ;;  %v5111_v37 = vld [vmem:[#allocation8 + $0x108] sm:$0xff]   ;;  %v5114_v34 = vld [vmem:[#allocation8 + $0x110] sm:$0xff]   ;;  %s6701_s24 = sld [smem:[#allocation14_spill]]  ;;  %s3993_s18 = sshll.u32 %s5376_s30, 4 }
 0x2a1   : > { %v5109_v40 = vld [vmem:[#allocation8 + $0x140] sm:$0xff]   ;;  %4276 = vmatprep.subr.bf16.mxu0 %v5108_v4  ;;  %v5112_v23 = vld [vmem:[#allocation8 + $0x148] sm:$0xff]   ;;  %v5115_v32 = vld [vmem:[#allocation8 + $0x150] sm:$0xff]   ;;  %s3689_s21 = sshll.u32 %s5933_s13, 4  ;;  %s6702_s14 = sld [smem:[#allocation16_spill]]  ;;  %s6588_s21 = int_to_ptr.vmem [resolvable:$true] %s3689_s21 }
 0x2a2   : > { %v5110_v28 = vld [vmem:[#allocation8 + $0xc0] sm:$0xff]   ;;  %4624 = vmatprep.subr.bf16.mxu1 %v5109_v40  ;;  %v5113_v33 = vld [vmem:[#allocation8 + $0xc8] sm:$0xff]   ;;  %v5116_v20 = vld [vmem:[#allocation8 + $0xd0] sm:$0xff]   ;;  %s6703_s27 = sld [smem:[#allocation22_spill]]  ;;  %s5266_s22 = scalar_lea.vmem %s6588_s21, 2048 }
 0x2a3   : > { %4277 = vmatpush3.bf16.msra.mxu0 %v5110_v28  ;;  %4625 = vmatpush3.bf16.msra.mxu1 %v5109_v40  ;;  %v5117_v60 = vld [vmem:[#allocation8 + $0x118] sm:$0xff]   ;;  %v5120_v8 = vld [vmem:[#allocation8 + $0x120] sm:$0xff]   ;;  %v5123_v48 = vld [vmem:[#allocation8 + $0x128] sm:$0xff]   ;;  %p5267_p3 = scmp.ne.s32.totalorder %s6588_s21, %s5266_s22  ;;  %s5405_s1 = smov [#allocation9]  }
 0x2a4   : > { %4278 = vmatprep.subr.bf16.mxu0 %v5111_v37  ;;  %4626 = vmatprep.subr.bf16.mxu1 %v5112_v23  ;;  %v5118_v39 = vld [vmem:[#allocation8 + $0x158] sm:$0xff]   ;;  %v5121_v49 = vld [vmem:[#allocation8 + $0x160] sm:$0xff]   ;;  %v5124_v11 = vld [vmem:[#allocation8 + $0x168] sm:$0xff]   ;;  %s5270_s17 = sshll.u32 %s5405_s1, 4  ;;  %s5271_s17 = int_to_ptr.vmem [resolvable:$false] %s5270_s17 }
 0x2a5   : > { %v5119_v41 = vld [vmem:[#allocation8 + $0xd8] sm:$0xff]   ;;  %v5122_v43 = vld [vmem:[#allocation8 + $0xe0] sm:$0xff]   ;;  %v5125_v47 = vld [vmem:[#allocation8 + $0xe8] sm:$0xff]   ;;  %p5273_p11 = scmp.lt.s32.totalorder %s6588_s21, %s5271_s17 }
 0x2a6   : > { %v5126_v14 = vld [vmem:[#allocation8 + $0x130] sm:$0xff]   ;;  %v5129_v36 = vld [vmem:[#allocation8 + $0x138] sm:$0xff]   ;;  %v6347_v50 = vld [vmem:[#allocation2 + $0x20] sm:$0xff]  ;;  %s3987_s12 = sshll.u32 %s6701_s24, 5  ;;  %s5272_s24 = scalar_lea.vmem %s5271_s17, 4096 }
 0x2a7   : > { %4279 = vmatpush3.bf16.msra.mxu0 %v5113_v33  ;;  %4627 = vmatpush3.bf16.msra.mxu1 %v5112_v23  ;;  %v5127_v25 = vld [vmem:[#allocation8 + $0x170] sm:$0xff]   ;;  %v6349_v27 = vld [vmem:[#allocation2 + $0x28] sm:$0xff]  ;;  %v5130_v44 = vld [vmem:[#allocation8 + $0x178] sm:$0xff]   ;;  %s3686_s19 = sadd.s32 %s3993_s18, %s3987_s12  ;;  %p6705_p13 = scmp.ne.s32.totalorder %s6702_s14, 0 }
 0x2a8   : > { %4280 = vmatprep.subr.bf16.mxu0 %v5114_v34  ;;  %4628 = vmatprep.subr.bf16.mxu1 %v5115_v32  ;;  %v5128_v62 = vld [vmem:[#allocation8 + $0xf0] sm:$0xff]   ;;  %v5131_v24 = vld [vmem:[#allocation8 + $0xf8] sm:$0xff]   ;;  %v5132_v13 = vld [vmem:[#allocation8 + $0x80] sm:$0xff]   ;;  %s3988_s30 = sshll.u32 %s3686_s19, 7  ;;  %s6704_s23 = smov %s6703_s27 }
 0x2a9   : > { %2694 = vmatprep.mubr.bf16.mxu0 %v6347_v50  ;;  %4640 = vmatprep.mubr.bf16.mxu1 %v6349_v27  ;;  %v6353_v18 = vld [vmem:[#allocation2 + $0x18] sm:$0xff]  ;;  %v6355_v17 = vld [vmem:[#allocation2 + $0x40] sm:$0xff]  ;;  %v5133_v56 = vld [vmem:[#allocation8 + $0x88] sm:$0xff]   ;;  %s6586_s6 = scalar_lea.hbm %s6703_s27, %s3988_s30  ;;  %p5268_p7 = pnand %p5267_p3, %p6705_p13 }
 0x2aa   : > { %v6357_v3 = vld [vmem:[#allocation2 + $0x38] sm:$0xff]  ;;  %v5134_v46 = vld [vmem:[#allocation8 + $0x90] sm:$0xff]   ;;  %v5139_v55 = vld [vmem:[#allocation8 + $0x40] sm:$0xff]   ;;  %p5274_p5 = scmp.lt.s32.totalorder %s5272_s24, %s5266_s22 }
 0x2ab   : > { %4281 = vmatpush3.bf16.msra.mxu0 %v5116_v20  ;;  %4629 = vmatpush3.bf16.msra.mxu1 %v5115_v32  ;;  %v6359_v0 = vld [vmem:[#allocation2 + $0x58] sm:$0xff]  ;;  %v5140_v61 = vld [vmem:[#allocation8] sm:$0xff]   ;;  %v6365_v7 = vld [vmem:[#allocation2 + $0x30] sm:$0xff]  ;;  %p5269_p9 = pneg %p5268_p7 }
 0x2ac   : > { %4282 = vmatprep.subr.bf16.mxu0 %v5117_v60  ;;  %4630 = vmatprep.subr.bf16.mxu1 %v5118_v39  ;;  %v6367_v51 = vld [vmem:[#allocation2 + $0x70] sm:$0xff]  ;;  %v5135_v10 = vld [vmem:[#allocation8 + $0x98] sm:$0xff]   ;;  %v6371_v42 = vld [vmem:[#allocation2 + $0x88] sm:$0xff]  ;;  %p5275_p8 = por %p5274_p5, %p5273_p11 }
 0x2ad   : > { %v6369_v15 = vld [vmem:[#allocation2 + $0x50] sm:$0xff]  ;;  %v5144_v58 = vld [vmem:[#allocation8 + $0x48] sm:$0xff]   ;;  %v5136_v38 = vld [vmem:[#allocation8 + $0xa0] sm:$0xff]  }
 0x2ae   : > { %v5145_v29 = vld [vmem:[#allocation8 + $0x8] sm:$0xff]   ;;  %v6379_v16 = vld [vmem:[#allocation2 + $0xa0] sm:$0xff]  ;;  %v5148_v45 = vld [vmem:[#allocation8 + $0x50] sm:$0xff]   ;;  %p5276_p12 = pnand %p5275_p8, %p5269_p9 }
 0x2af   : > { %4283 = vmatpush3.bf16.msra.mxu0 %v5119_v41  ;;  %4631 = vmatpush3.bf16.msra.mxu1 %v5118_v39  ;;  %v6377_v21 = vld [vmem:[#allocation2 + $0x48] sm:$0xff]  ;;  %v6383_v57 = vld [vmem:[#allocation2 + $0xb8] sm:$0xff]  ;;  %v5150_v5 = vld [vmem:[#allocation8 + $0x10] sm:$0xff]  }
 0x2b0   : > { %4284 = vmatprep.subr.bf16.mxu0 %v5120_v8  ;;  %4632 = vmatprep.subr.bf16.mxu1 %v5121_v49  ;;  %v5137_v26 = vld [vmem:[#allocation8 + $0xa8] sm:$0xff]   ;;  %v5152_v1 = vld [vmem:[#allocation8 + $0x58] sm:$0xff]   ;;  %v5138_v30 = vld [vmem:[#allocation8 + $0xb0] sm:$0xff]  }
 0x2b1   : > { %v6381_v12 = vld [vmem:[#allocation2 + $0x68] sm:$0xff]  ;;  %v6389_v2 = vld [vmem:[#allocation2 + $0x60] sm:$0xff]  ;;  %v5154_v19 = vld [vmem:[#allocation8 + $0x18] sm:$0xff]  }
 0x2b2   : > { %v6391_v52 = vld [vmem:[#allocation2 + $0xd0] sm:$0xff]  ;;  %v5141_v59 = vld [vmem:[#allocation8 + $0xb8] sm:$0xff]   ;;  %v6393_v35 = vld [vmem:[#allocation2 + $0x80] sm:$0xff] }
 0x2b3   : > { %4285 = vmatpush3.bf16.msra.mxu0 %v5122_v43  ;;  %4633 = vmatpush3.bf16.msra.mxu1 %v5121_v49  ;;  %v2375_v6 = vld [vmem:[#allocation2 + $0x10] sm:$0xff]  ;;  %v5156_v63 = vld [vmem:[#allocation8 + $0x60] sm:$0xff]   ;;  %v5160_v53 = vld [vmem:[#allocation8 + $0x68] sm:$0xff]  }
 0x2b4   : > { %4286 = vmatprep.subr.bf16.mxu0 %v5123_v48  ;;  %4634 = vmatprep.subr.bf16.mxu1 %v5124_v11  ;;  %v5158_v22 = vld [vmem:[#allocation8 + $0x20] sm:$0xff]   ;;  %v6398_v54 = vld [vmem:[#allocation2 + $0x78] sm:$0xff]  ;;  %v5146_v4 = vld [vmem:[#allocation8 + $0x1c8] sm:$0xff]  }
 0x2b5   : > { %v5142_v9 = vld [vmem:[#allocation8 + $0x1c0] sm:$0xff]   ;;  %v6400_v40 = vld [vmem:[#allocation2 + $0x98] sm:$0xff]  ;;  %v5162_v28 = vld [vmem:[#allocation8 + $0x28] sm:$0xff]  }
 0x2b6   : > { %v5143_v31 = vld [vmem:[#allocation8 + $0x180] sm:$0xff]   ;;  %v5164_v37 = vld [vmem:[#allocation8 + $0x70] sm:$0xff]   ;;  %v5147_v23 = vld [vmem:[#allocation8 + $0x188] sm:$0xff]  }
 0x2b7   : > { %4287 = vmatpush3.bf16.msra.mxu0 %v5125_v47  ;;  %4635 = vmatpush3.bf16.msra.mxu1 %v5124_v11  ;;  %v5149_v33 = vld [vmem:[#allocation8 + $0x1d0] sm:$0xff]   ;;  %v5153_v60 = vld [vmem:[#allocation8 + $0x1d8] sm:$0xff]   ;;  %v5157_v43 = vld [vmem:[#allocation8 + $0x1e0] sm:$0xff]  }
 0x2b8   : > { %4288 = vmatprep.subr.bf16.mxu0 %v5126_v14  ;;  %4636 = vmatprep.subr.bf16.mxu1 %v5127_v25  ;;  %v5166_v34 = vld [vmem:[#allocation8 + $0x30] sm:$0xff]   ;;  %v5168_v41 = vld [vmem:[#allocation8 + $0x78] sm:$0xff]   ;;  %v6414_v48 = vld [vmem:[#allocation2 + $0xa8] sm:$0xff] }
 0x2b9   : > { %v6406_v32 = vld [vmem:[#allocation2 + $0x90] sm:$0xff]  ;;  %v5170_v8 = vld [vmem:[#allocation8 + $0x38] sm:$0xff]   ;;  %v5159_v11 = vld [vmem:[#allocation8 + $0x1a0] sm:$0xff]  }
 0x2ba   : > { %v5151_v20 = vld [vmem:[#allocation8 + $0x190] sm:$0xff]   ;;  %v5155_v49 = vld [vmem:[#allocation8 + $0x198] sm:$0xff]   ;;  %v5161_v47 = vld [vmem:[#allocation8 + $0x1e8] sm:$0xff]  }
 0x2bb   : > { %4289 = vmatpush3.bf16.msra.mxu0 %v5128_v62  ;;  %4637 = vmatpush3.bf16.msra.mxu1 %v5127_v25  ;;  %v6408_v39 = vld [vmem:[#allocation2 + $0xb0] sm:$0xff]  ;;  %v6416_v14 = vld [vmem:[#allocation2 + $0xc8] sm:$0xff] }
 0x2bc   : > { %4290 = vmatprep.subr.bf16.mxu0 %v5129_v36  ;;  %4638 = vmatprep.subr.bf16.mxu1 %v5130_v44  ;;  %v5163_v25 = vld [vmem:[#allocation8 + $0x1a8] sm:$0xff]   ;;  %v5165_v62 = vld [vmem:[#allocation8 + $0x1f0] sm:$0xff]   ;;  %v6422_v36 = vld [vmem:[#allocation2 + $0xc0] sm:$0xff] }
 0x2bf   : > { %4291 = vmatpush3.bf16.msra.mxu0 %v5131_v24  ;;  %4639 = vmatpush3.bf16.msra.mxu1 %v5130_v44  ;;  %v5169_v44 = vld [vmem:[#allocation8 + $0x1f8] sm:$0xff]   ;;  %v2374_v24 = vld [vmem:[#allocation2 + $0x8] sm:$0xff] }
 0x2c0   : > { %4656 = vmatprep.subr.bf16.mxu1 %v5132_v13  ;;  %4356 = vmatprep.subr.bf16.mxu0 %v5139_v55  ;;  %v5173_v55 = vld [vmem:[#allocation8 + $0x208] sm:$0xff]  }
 0x2c2   : > { %2695 = vmatmul.mubr.bf16.vlgmr.msra.gmra.mrb[100].mxu0 %v6353_v18  ;;  %4641 = vmatmul.mubr.bf16.vlgmr.msra.gmra.mrb[60].mxu1 %v6355_v17 }
 0x2c3   : > { %4657 = vmatpush3.bf16.msra.mxu1 %v5132_v13  ;;  %2702 = vmatprep.mubr.bf16.mxu0 %v6357_v3  ;;  %v5171_v13 = vld [vmem:[#allocation8 + $0x1b8] sm:$0xff]  }
 0x2c4   : > { %4658 = vmatprep.subr.bf16.mxu1 %v5133_v56  ;;  %4644 = vmatprep.mubr.bf16.mxu1 %v6359_v0 }
 0x2c5   : > { %4357 = vmatpush3.bf16.msra.mxu0 %v5140_v61  ;;  %v5174_v61 = vld [vmem:[#allocation8 + $0x210] sm:$0xff]  }
 0x2c6   : > { %4358 = vmatprep.subr.bf16.mxu0 %v5144_v58  ;;  %v5176_v58 = vld [vmem:[#allocation8 + $0x220] sm:$0xff]  }
 0x2c7   : > { %4659 = vmatpush3.bf16.msra.mxu1 %v5133_v56  ;;  %v5172_v56 = vld [vmem:[#allocation8 + $0x200] sm:$0xff]  }
 0x2c8   : > { %4660 = vmatprep.subr.bf16.mxu1 %v5134_v46 }
 0x2c9   : > { %4359 = vmatpush3.bf16.msra.mxu0 %v5145_v29  ;;  %v3217_v29 = vld [vmem:[#allocation2 + $0xe8] sm:$0xff] }
 0x2ca   : > { %2703 = vmatmul.mubr.bf16.gmra.mrb[104].mxu0 %v6365_v7  ;;  %4645 = vmatmul.mubr.bf16.gmra.mrb[64].mxu1 %v6367_v51 }
 0x2cb   : > { %4661 = vmatpush3.bf16.msra.mxu1 %v5134_v46  ;;  %2710 = vmatprep.mubr.bf16.mxu0 %v6369_v15  ;;  %v2373_v46 = vld [vmem:[#allocation2] sm:$0xff] }
 0x2cc   : > { %4662 = vmatprep.subr.bf16.mxu1 %v5135_v10  ;;  %4648 = vmatprep.mubr.bf16.mxu1 %v6371_v42 }
 0x2cd   : > { %4360 = vmatprep.subr.bf16.mxu0 %v5148_v45 }
 0x2ce   : > { %4361 = vmatpush3.bf16.msra.mxu0 %v5150_v5 }
 0x2cf   : > { %4663 = vmatpush3.bf16.msra.mxu1 %v5135_v10  ;;  %4362 = vmatprep.subr.bf16.mxu0 %v5152_v1  ;;  %v5175_v10 = vld [vmem:[#allocation8 + $0x218] sm:$0xff]  }
 0x2d0   : > { %4664 = vmatprep.subr.bf16.mxu1 %v5136_v38 }
 0x2d2   : > { %2711 = vmatmul.mubr.bf16.gmra.mrb[108].mxu0 %v6377_v21  ;;  %4649 = vmatmul.mubr.bf16.gmra.mrb[68].mxu1 %v6379_v16 }
 0x2d3   : > { %4665 = vmatpush3.bf16.msra.mxu1 %v5136_v38  ;;  %2718 = vmatprep.mubr.bf16.mxu0 %v6381_v12 }
 0x2d4   : > { %4666 = vmatprep.subr.bf16.mxu1 %v5137_v26  ;;  %4652 = vmatprep.mubr.bf16.mxu1 %v6383_v57 }
 0x2d5   : > { %4363 = vmatpush3.bf16.msra.mxu0 %v5154_v19 }
 0x2d6   : > { %4364 = vmatprep.subr.bf16.mxu0 %v5156_v63 }
 0x2d7   : > { %4667 = vmatpush3.bf16.msra.mxu1 %v5137_v26 }
 0x2d8   : > { %4668 = vmatprep.subr.bf16.mxu1 %v5138_v30 }
 0x2d9   : > { %4365 = vmatpush3.bf16.msra.mxu0 %v5158_v22 }
 0x2da   : > { %2719 = vmatmul.mubr.bf16.gmra.mrb[112].mxu0 %v6389_v2  ;;  %4653 = vmatmul.mubr.bf16.gmra.mrb[72].mxu1 %v6391_v52 }
 0x2db   : > { %4669 = vmatpush3.bf16.msra.mxu1 %v5138_v30  ;;  %2726 = vmatprep.mubr.bf16.mxu0 %v6393_v35 }
 0x2dc   : > { %4670 = vmatprep.subr.bf16.mxu1 %v5141_v59  ;;  %4672 = vmatprep.mubr.bf16.mxu1 %v2375_v6 }
 0x2dd   : > { %4366 = vmatprep.subr.bf16.mxu0 %v5160_v53 }
 0x2de   : > { %4367 = vmatpush3.bf16.msra.mxu0 %v5162_v28 }
 0x2df   : > { %4671 = vmatpush3.bf16.msra.mxu1 %v5141_v59  ;;  %4368 = vmatprep.subr.bf16.mxu0 %v5164_v37 }
 0x2e0   : > { %4436 = vmatprep.subr.bf16.mxu1 %v5142_v9 }
 0x2e2   : > { %2727 = vmatmul.mubr.bf16.gmra.mrb[116].mxu0 %v6398_v54  ;;  %4673 = vmatmul.mubr.bf16.vlgmr.msra.gmra.mrb[60].mxu1 %v6349_v27  ;;  %v5167_v27 = vld [vmem:[#allocation8 + $0x1b0] sm:$0xff]  }
 0x2e3   : > { %4437 = vmatpush3.bf16.msra.mxu1 %v5143_v31  ;;  %2734 = vmatprep.mubr.bf16.mxu0 %v6400_v40 }
 0x2e4   : > { %4438 = vmatprep.subr.bf16.mxu1 %v5146_v4  ;;  %4676 = vmatprep.mubr.bf16.mxu1 %v6355_v17 }
 0x2e5   : > { %4369 = vmatpush3.bf16.msra.mxu0 %v5166_v34 }
 0x2e6   : > { %4370 = vmatprep.subr.bf16.mxu0 %v5168_v41 }
 0x2e7   : > { %4439 = vmatpush3.bf16.msra.mxu1 %v5147_v23 }
 0x2e8   : > { %4440 = vmatprep.subr.bf16.mxu1 %v5149_v33 }
 0x2e9   : > { %4371 = vmatpush3.bf16.msra.mxu0 %v5170_v8 }
 0x2ea   : > { %2735 = vmatmul.mubr.bf16.gmra.mrb[120].mxu0 %v6406_v32  ;;  %4677 = vmatmul.mubr.bf16.gmra.mrb[64].mxu1 %v6359_v0 }
 0x2eb   : > { %4441 = vmatpush3.bf16.msra.mxu1 %v5151_v20  ;;  %2742 = vmatprep.mubr.bf16.mxu0 %v6408_v39 }
 0x2ec   : > { %4442 = vmatprep.subr.bf16.mxu1 %v5153_v60  ;;  %4680 = vmatprep.mubr.bf16.mxu1 %v6367_v51 }
 0x2ef   : > { %4443 = vmatpush3.bf16.msra.mxu1 %v5155_v49 }
 0x2f0   : > { %4444 = vmatprep.subr.bf16.mxu1 %v5157_v43 }
 0x2f2   : > { %2743 = vmatmul.mubr.bf16.gmra.mrb[124].mxu0 %v6414_v48  ;;  %4681 = vmatmul.mubr.bf16.gmra.mrb[68].mxu1 %v6371_v42 }
 0x2f3   : > { %4445 = vmatpush3.bf16.msra.mxu1 %v5159_v11  ;;  %2750 = vmatprep.mubr.bf16.mxu0 %v6416_v14 }
 0x2f4   : > { %4446 = vmatprep.subr.bf16.mxu1 %v5161_v47  ;;  %4684 = vmatprep.mubr.bf16.mxu1 %v6379_v16 }
 0x2f7   : > { %4447 = vmatpush3.bf16.msra.mxu1 %v5163_v25 }
 0x2f8   : > { %4448 = vmatprep.subr.bf16.mxu1 %v5165_v62 }
 0x2fa   : > { %2751 = vmatmul.mubr.bf16.gmra.mrb[128].mxu0 %v6422_v36  ;;  %4685 = vmatmul.mubr.bf16.gmra.mrb[72].mxu1 %v6383_v57 }
 0x2fb   : > { %4449 = vmatpush3.bf16.msra.mxu1 %v5167_v27  ;;  %3032 = vmatprep.mubr.bf16.mxu0 %v2374_v24 }
 0x2fc   : > { %4450 = vmatprep.subr.bf16.mxu1 %v5169_v44  ;;  %3443 = vmatprep.mubr.bf16.mxu1 %v6357_v3 }
 0x2ff   : > { %4451 = vmatpush3.bf16.msra.mxu1 %v5171_v13 }
 0x300   : > { %4688 = vmatprep.subr.bf16.mxu1 %v5172_v56 }
 0x302   : > { %3033 = vmatmul.mubr.bf16.vlgmr.msra.gmra.mrb[132].mxu0 %v2373_v46  ;;  %3444 = vmatmul.mubr.bf16.vlgmr.msra.gmra.mrb[76].mxu1 %v6365_v7 }
 0x303   : > { %4689 = vmatpush3.bf16.msra.mxu1 %v5172_v56  ;;  %3040 = vmatprep.mubr.bf16.mxu0 %v6347_v50  ;;  %v5177_v50 = vld [vmem:[#allocation8 + $0x228] sm:$0xff]  }
 0x304   : > { %3451 = vmatprep.mubr.bf16.mxu1 %v6369_v15  ;;  %4690 = vmatprep.subr.bf16.mxu1 %v5173_v55 }
 0x307   : > { %4691 = vmatpush3.bf16.msra.mxu1 %v5173_v55 }
 0x308   : > { %4692 = vmatprep.subr.bf16.mxu1 %v5174_v61 }
 0x30a   : > { %3041 = vmatmul.mubr.bf16.gmra.mrb[136].mxu0 %v6353_v18  ;;  %3452 = vmatmul.mubr.bf16.gmra.mrb[80].mxu1 %v6377_v21  ;;  %v5178_v18 = vld [vmem:[#allocation8 + $0x230] sm:$0xff]  }
 0x30b   : > { %3048 = vmatprep.mubr.bf16.mxu0 %v6357_v3  ;;  %3459 = vmatprep.mubr.bf16.mxu1 %v6381_v12  ;;  %v5179_v3 = vld [vmem:[#allocation8 + $0x238] sm:$0xff]  }
 0x30c   : > { %4693 = vmatpush3.bf16.msra.mxu1 %v5174_v61 }
 0x30d   : > { %4694 = vmatprep.subr.bf16.mxu1 %v5175_v10 }
 0x310   : > { %4695 = vmatpush3.bf16.msra.mxu1 %v5175_v10 }
 0x311   : > { %4696 = vmatprep.subr.bf16.mxu1 %v5176_v58 }
 0x312   : > { %3049 = vmatmul.mubr.bf16.gmra.mrb[140].mxu0 %v6365_v7  ;;  %3460 = vmatmul.mubr.bf16.gmra.mrb[84].mxu1 %v6389_v2  ;;  %v3216_v7 = vld [vmem:[#allocation2 + $0xe0] sm:$0xff] }
 0x313   : > { %3056 = vmatprep.mubr.bf16.mxu0 %v6369_v15  ;;  %3467 = vmatprep.mubr.bf16.mxu1 %v6393_v35  ;;  %v3215_v15 = vld [vmem:[#allocation2 + $0xd8] sm:$0xff] }
 0x314   : > { %4697 = vmatpush3.bf16.msra.mxu1 %v5176_v58 }
 0x315   : > { %4698 = vmatprep.subr.bf16.mxu1 %v5177_v50 }
 0x318   : > { %4699 = vmatpush3.bf16.msra.mxu1 %v5177_v50 }
 0x319   : > { %4700 = vmatprep.subr.bf16.mxu1 %v5178_v18 }
 0x31a   : > { %3057 = vmatmul.mubr.bf16.gmra.mrb[144].mxu0 %v6377_v21  ;;  %3468 = vmatmul.mubr.bf16.gmra.mrb[88].mxu1 %v6398_v54 }
 0x31b   : > { %3064 = vmatprep.mubr.bf16.mxu0 %v6381_v12  ;;  %3475 = vmatprep.mubr.bf16.mxu1 %v6400_v40 }
 0x31c   : > { %4701 = vmatpush3.bf16.msra.mxu1 %v5178_v18 }
 0x31d   : > { %4702 = vmatprep.subr.bf16.mxu1 %v5179_v3 }
 0x320   : > { %4703 = vmatpush3.bf16.msra.mxu1 %v5179_v3 }
 0x322   : > { %3065 = vmatmul.mubr.bf16.gmra.mrb[148].mxu0 %v6389_v2  ;;  %3476 = vmatmul.mubr.bf16.gmra.mrb[92].mxu1 %v6406_v32 }
 0x323   : > { %3072 = vmatprep.mubr.bf16.mxu0 %v6393_v35  ;;  %3483 = vmatprep.mubr.bf16.mxu1 %v6408_v39 }
 0x32a   : > { %3073 = vmatmul.mubr.bf16.gmra.mrb[152].mxu0 %v6398_v54  ;;  %3484 = vmatmul.mubr.bf16.gmra.mrb[96].mxu1 %v6414_v48 }
 0x32b   : > { %3080 = vmatprep.mubr.bf16.mxu0 %v6400_v40  ;;  %3491 = vmatprep.mubr.bf16.mxu1 %v6416_v14 }
 0x332   : > { %3081 = vmatmul.mubr.bf16.gmra.mrb[156].mxu0 %v6406_v32  ;;  %3492 = vmatmul.mubr.bf16.gmra.mrb[100].mxu1 %v6422_v36 }
 0x333   : > { %3088 = vmatprep.mubr.bf16.mxu0 %v6408_v39  ;;  %3499 = vmatprep.mubr.bf16.mxu1 %v3216_v7 }
 0x33a   : > { %3089 = vmatmul.mubr.bf16.gmra.mrb[160].mxu0 %v6414_v48  ;;  %3500 = vmatmul.mubr.bf16.gmra.mrb[104].mxu1 %v3215_v15 }
 0x33b   : > { %4704 = vmatprep.mubr.bf16.mxu1 %v6355_v17 }
 0x342   : > { %4705 = vmatmul.mubr.bf16.vlgmr.msra.gmra.mrb[60].mxu1 %v6359_v0 }
 0x343   : > { %4708 = vmatprep.mubr.bf16.mxu1 %v6367_v51 }
 0x34a   : > { %4709 = vmatmul.mubr.bf16.gmra.mrb[64].mxu1 %v6371_v42 }
 0x34b   : > { %4712 = vmatprep.mubr.bf16.mxu1 %v6379_v16 }
 0x352   : > { %4713 = vmatmul.mubr.bf16.gmra.mrb[68].mxu1 %v6383_v57 }
 0x353   : > { %4716 = vmatprep.mubr.bf16.mxu1 %v6391_v52 }
 0x35a   : > { %4717 = vmatmul.mubr.bf16.gmra.mrb[72].mxu1 %v3217_v29 }
 0x395   : > { %v4292_v38 = vpop.f32.mrb[100].mxu0 }
 0x396   : > { %v4293_v21 = vpop.f32.mrb[101].mxu0 }
 0x397   : > { %v4294_v26 = vadd.f32 %v4293_v21, %v4292_v38  ;;  %v4295_v45 = vpop.f32.mrb[102].mxu0 }
 0x398   : > { %v4296_v12 = vpop.f32.mrb[103].mxu0 }
 0x399   : > { %v4297_v17 = vadd.f32 %v4296_v12, %v4295_v45 }
 0x39d   : > { %v4298_v5 = vpop.f32.mrb[104].mxu0 }
 0x39e   : > { %v4299_v0 = vpop.f32.mrb[105].mxu0 }
 0x39f   : > { %v6461_v1 = vadd.f32 %v4299_v0, %v4298_v5  ;;  %v4301_v51 = vpop.f32.mrb[106].mxu0 }
 0x3a0   : > { %v4302_v42 = vpop.f32.mrb[107].mxu0 }
 0x3a1   : > { %v6463_v30 = vadd.f32 %v4302_v42, %v4301_v51 }
 0x3a5   : > { %v4304_v16 = vpop.f32.mrb[108].mxu0 }
 0x3a6   : > { %v4305_v57 = vpop.f32.mrb[109].mxu0 }
 0x3a7   : > { %v6465_v2 = vadd.f32 %v4305_v57, %v4304_v16  ;;  %v4307_v19 = vpop.f32.mrb[110].mxu0 }
 0x3a8   : > { %v4308_v52 = vpop.f32.mrb[111].mxu0 }
 0x3a9   : > { %v6467_v59 = vadd.f32 %v4308_v52, %v4307_v19 }
 0x3ad   : > { %v4310_v35 = vpop.f32.mrb[112].mxu0 }
 0x3ae   : > { %v4311_v6 = vpop.f32.mrb[113].mxu0 }
 0x3af   : > { %v6469_v63 = vadd.f32 %v4311_v6, %v4310_v35  ;;  %v4313_v22 = vpop.f32.mrb[114].mxu0 }
 0x3b0   : > { %v4314_v53 = vpop.f32.mrb[115].mxu0 }
 0x3b1   : > { %v6471_v9 = vadd.f32 %v4314_v53, %v4313_v22 }
 0x3b5   : > { %v4316_v54 = vpop.f32.mrb[116].mxu0 }
 0x3b6   : > { %v4317_v31 = vpop.f32.mrb[117].mxu0 }
 0x3b7   : > { %v6473_v4 = vadd.f32 %v4317_v31, %v4316_v54  ;;  %v4319_v40 = vpop.f32.mrb[118].mxu0 }
 0x3b8   : > { %v4320_v28 = vpop.f32.mrb[119].mxu0 }
 0x3b9   : > { %v6475_v37 = vadd.f32 %v4320_v28, %v4319_v40 }
 0x3bd   : > { %v4322_v23 = vpop.f32.mrb[120].mxu0 }
 0x3be   : > { %v4323_v33 = vpop.f32.mrb[121].mxu0 }
 0x3bf   : > { %v6477_v34 = vadd.f32 %v4323_v33, %v4322_v23  ;;  %v4325_v32 = vpop.f32.mrb[122].mxu0 }
 0x3c0   : > { %v4326_v20 = vpop.f32.mrb[123].mxu0 }
 0x3c1   : > { %v6479_v60 = vadd.f32 %v4326_v20, %v4325_v32 }
 0x3c5   : > { %v4328_v39 = vpop.f32.mrb[124].mxu0 }
 0x3c6   : > { %v4329_v41 = vpop.f32.mrb[125].mxu0 }
 0x3c7   : > { %v6481_v8 = vadd.f32 %v4329_v41, %v4328_v39  ;;  %v4331_v49 = vpop.f32.mrb[126].mxu0 }
 0x3c8   : > { %v4332_v43 = vpop.f32.mrb[127].mxu0 }
 0x3c9   : > { %v6483_v48 = vadd.f32 %v4332_v43, %v4331_v49 }
 0x3cd   : > { %v4334_v11 = vpop.f32.mrb[128].mxu0 }
 0x3ce   : > { %v4335_v47 = vpop.f32.mrb[129].mxu0 }
 0x3cf   : > { %v6485_v14 = vadd.f32 %v4335_v47, %v4334_v11  ;;  %v4337_v25 = vpop.f32.mrb[130].mxu0 }
 0x3d0   : > { %v4338_v62 = vpop.f32.mrb[131].mxu0 }
 0x3d1   : > { %v6487_v36 = vadd.f32 %v4338_v62, %v4337_v25 }
 0x3d5   : > { %v4372_v27 = vpop.f32.mrb[132].mxu0  ;;  %v4452_v44 = vpop.f32.mrb[76].mxu1 }
 0x3d6   : > { %v4373_v24 = vpop.f32.mrb[133].mxu0  ;;  %v4453_v13 = vpop.f32.mrb[77].mxu1 }
 0x3d7   : > { %v4374_v56 = vadd.f32 %v4373_v24, %v4372_v27  ;;  %v4454_v46 = vadd.f32 %v4453_v13, %v4452_v44  ;;  %v4375_v55 = vpop.f32.mrb[134].mxu0  ;;  %v4455_v61 = vpop.f32.mrb[78].mxu1 }
 0x3d8   : > { %v4376_v10 = vpop.f32.mrb[135].mxu0  ;;  %v4456_v58 = vpop.f32.mrb[79].mxu1 }
 0x3d9   : > { %v4803_v50 = vadd.f32 %v4374_v56, %v4294_v26  ;;  %v4377_v18 = vadd.f32 %v4376_v10, %v4375_v55  ;;  %v4457_v3 = vadd.f32 %v4456_v58, %v4455_v61 }
 0x3db   : > { %v4809_v7 = vadd.f32 %v4377_v18, %v4297_v17  ;;  %v6489_v15 = vadd.f32 %v4803_v50, %v4454_v46 }
 0x3dd   : > { %v4378_v29 = vpop.f32.mrb[136].mxu0  ;;  %v4458_v38 = vpop.f32.mrb[80].mxu1  ;;  %v6491_v21 = vadd.f32 %v4809_v7, %v4457_v3 }
 0x3de   : > { %v4379_v45 = vpop.f32.mrb[137].mxu0  ;;  %v4459_v12 = vpop.f32.mrb[81].mxu1 }
 0x3df   : > { %v4380_v5 = vadd.f32 %v4379_v45, %v4378_v29  ;;  %v4460_v0 = vadd.f32 %v4459_v12, %v4458_v38  ;;  %v4381_v51 = vpop.f32.mrb[138].mxu0  ;;  %v4461_v42 = vpop.f32.mrb[82].mxu1 }
 0x3e0   : > { %v4382_v16 = vpop.f32.mrb[139].mxu0  ;;  %v4462_v57 = vpop.f32.mrb[83].mxu1 }
 0x3e1   : > { %v4800_v19 = vadd.f32 %v4380_v5, %v6461_v1  ;;  %v4383_v26 = vadd.f32 %v4382_v16, %v4381_v51  ;;  %v4463_v52 = vadd.f32 %v4462_v57, %v4461_v42 }
 0x3e3   : > { %v4806_v17 = vadd.f32 %v4383_v26, %v6463_v30  ;;  %v6495_v35 = vadd.f32 %v4800_v19, %v4460_v0 }
 0x3e5   : > { %v4384_v6 = vpop.f32.mrb[140].mxu0  ;;  %v4464_v22 = vpop.f32.mrb[84].mxu1  ;;  %v6497_v53 = vadd.f32 %v4806_v17, %v4463_v52 }
 0x3e6   : > { %v4385_v54 = vpop.f32.mrb[141].mxu0  ;;  %v4465_v31 = vpop.f32.mrb[85].mxu1 }
 0x3e7   : > { %v4386_v40 = vadd.f32 %v4385_v54, %v4384_v6  ;;  %v4466_v28 = vadd.f32 %v4465_v31, %v4464_v22  ;;  %v4387_v23 = vpop.f32.mrb[142].mxu0  ;;  %v4467_v33 = vpop.f32.mrb[86].mxu1 }
 0x3e8   : > { %v4388_v32 = vpop.f32.mrb[143].mxu0  ;;  %v4468_v20 = vpop.f32.mrb[87].mxu1 }
 0x3e9   : > { %v4815_v1 = vadd.f32 %v4386_v40, %v6465_v2  ;;  %v4389_v39 = vadd.f32 %v4388_v32, %v4387_v23  ;;  %v4469_v41 = vadd.f32 %v4468_v20, %v4467_v33 }
 0x3eb   : > { %v4821_v30 = vadd.f32 %v4389_v39, %v6467_v59  ;;  %v6501_v49 = vadd.f32 %v4815_v1, %v4466_v28 }
 0x3ed   : > { %v4390_v43 = vpop.f32.mrb[144].mxu0  ;;  %v4470_v11 = vpop.f32.mrb[88].mxu1  ;;  %v6503_v47 = vadd.f32 %v4821_v30, %v4469_v41 }
 0x3ee   : > { %v4391_v25 = vpop.f32.mrb[145].mxu0  ;;  %v4471_v62 = vpop.f32.mrb[89].mxu1 }
 0x3ef   : > { %v4392_v27 = vadd.f32 %v4391_v25, %v4390_v43  ;;  %v4472_v44 = vadd.f32 %v4471_v62, %v4470_v11  ;;  %v4393_v24 = vpop.f32.mrb[146].mxu0  ;;  %v4473_v13 = vpop.f32.mrb[90].mxu1 }
 0x3f0   : > { %v4394_v56 = vpop.f32.mrb[147].mxu0  ;;  %v4474_v46 = vpop.f32.mrb[91].mxu1 }
 0x3f1   : > { %v4812_v2 = vadd.f32 %v4392_v27, %v6469_v63  ;;  %v4395_v55 = vadd.f32 %v4394_v56, %v4393_v24  ;;  %v4475_v61 = vadd.f32 %v4474_v46, %v4473_v13 }
 0x3f3   : > { %v4818_v59 = vadd.f32 %v4395_v55, %v6471_v9  ;;  %v6507_v10 = vadd.f32 %v4812_v2, %v4472_v44 }
 0x3f5   : > { %v4396_v58 = vpop.f32.mrb[148].mxu0  ;;  %v4476_v50 = vpop.f32.mrb[92].mxu1  ;;  %v6509_v18 = vadd.f32 %v4818_v59, %v4475_v61 }
 0x3f6   : > { %v4397_v3 = vpop.f32.mrb[149].mxu0  ;;  %v4477_v7 = vpop.f32.mrb[93].mxu1 }
 0x3f7   : > { %v4398_v29 = vadd.f32 %v4397_v3, %v4396_v58  ;;  %v4478_v38 = vadd.f32 %v4477_v7, %v4476_v50  ;;  %v4399_v45 = vpop.f32.mrb[150].mxu0  ;;  %v4479_v12 = vpop.f32.mrb[94].mxu1 }
 0x3f8   : > { %v4400_v5 = vpop.f32.mrb[151].mxu0  ;;  %v4480_v0 = vpop.f32.mrb[95].mxu1 }
 0x3f9   : > { %v4827_v63 = vadd.f32 %v4398_v29, %v6473_v4  ;;  %v4401_v51 = vadd.f32 %v4400_v5, %v4399_v45  ;;  %v4481_v42 = vadd.f32 %v4480_v0, %v4479_v12 }
 0x3fb   : > { %v4833_v9 = vadd.f32 %v4401_v51, %v6475_v37  ;;  %v6513_v16 = vadd.f32 %v4827_v63, %v4478_v38  ;;  %v3970_v63 = vld [vmem:[%s5680_s20 + $0x30] sm:$0xff] }
 0x3fd   : > { %v4402_v57 = vpop.f32.mrb[152].mxu0  ;;  %v4482_v19 = vpop.f32.mrb[96].mxu1  ;;  %v6515_v26 = vadd.f32 %v4833_v9, %v4481_v42 }
 0x3fe   : > { %v4403_v52 = vpop.f32.mrb[153].mxu0  ;;  %v4483_v17 = vpop.f32.mrb[97].mxu1 }
 0x3ff   : > { %v4404_v6 = vadd.f32 %v4403_v52, %v4402_v57  ;;  %v4484_v22 = vadd.f32 %v4483_v17, %v4482_v19  ;;  %v4405_v54 = vpop.f32.mrb[154].mxu0  ;;  %v4485_v31 = vpop.f32.mrb[98].mxu1  ;;  %v3968_v57 = vld [vmem:[%s5680_s20 + $0x20] sm:$0xff]  ;;  %v3971_v52 = vld [vmem:[%s5680_s20 + $0x38] sm:$0xff] }
 0x400   : > { %v4406_v40 = vpop.f32.mrb[155].mxu0  ;;  %v4486_v28 = vpop.f32.mrb[99].mxu1 }
 0x401   : > { %v4824_v4 = vadd.f32 %v4404_v6, %v6477_v34  ;;  %v4407_v23 = vadd.f32 %v4406_v40, %v4405_v54  ;;  %v4487_v33 = vadd.f32 %v4486_v28, %v4485_v31  ;;  %v3974_v28 = vld [vmem:[%s5680_s20 + $0x50] sm:$0xff] }
 0x403   : > { %v4830_v37 = vadd.f32 %v4407_v23, %v6479_v60  ;;  %v6519_v32 = vadd.f32 %v4824_v4, %v4484_v22  ;;  %v3969_v22 = vld [vmem:[%s5680_s20 + $0x28] sm:$0xff]  ;;  %v3972_v23 = vld [vmem:[%s5680_s20 + $0x40] sm:$0xff] }
 0x405   : > { %v4408_v20 = vpop.f32.mrb[156].mxu0  ;;  %v4488_v1 = vpop.f32.mrb[100].mxu1  ;;  %v6521_v39 = vadd.f32 %v4830_v37, %v4487_v33  ;;  %v3975_v37 = vld [vmem:[%s5680_s20 + $0x58] sm:$0xff] }
 0x406   : > { %v4409_v41 = vpop.f32.mrb[157].mxu0  ;;  %v4489_v30 = vpop.f32.mrb[101].mxu1 }
 0x407   : > { %v4410_v43 = vadd.f32 %v4409_v41, %v4408_v20  ;;  %v4490_v11 = vadd.f32 %v4489_v30, %v4488_v1  ;;  %v4411_v25 = vpop.f32.mrb[158].mxu0  ;;  %v4491_v62 = vpop.f32.mrb[102].mxu1  ;;  %v3973_v30 = vld [vmem:[%s5680_s20 + $0x48] sm:$0xff] }
 0x408   : > { %v4412_v27 = vpop.f32.mrb[159].mxu0  ;;  %v4492_v44 = vpop.f32.mrb[103].mxu1 }
 0x409   : > { %v4839_v34 = vadd.f32 %v4410_v43, %v6481_v8  ;;  %v4413_v24 = vadd.f32 %v4412_v27, %v4411_v25  ;;  %v4493_v13 = vadd.f32 %v4492_v44, %v4491_v62  ;;  %v3978_v62 = vld [vmem:[%s5680_s20 + $0x70] sm:$0xff]  ;;  %v3976_v44 = vld [vmem:[%s5680_s20 + $0x60] sm:$0xff] }
 0x40b   : > { %v4845_v60 = vadd.f32 %v4413_v24, %v6483_v48  ;;  %v6525_v56 = vadd.f32 %v4839_v34, %v4490_v11  ;;  %v3979_v24 = vld [vmem:[%s5680_s20 + $0x78] sm:$0xff] }
 0x40d   : > { %v4414_v46 = vpop.f32.mrb[160].mxu0  ;;  %v4494_v2 = vpop.f32.mrb[104].mxu1  ;;  %v6527_v55 = vadd.f32 %v4845_v60, %v4493_v13 }
 0x40e   : > { %v4415_v61 = vpop.f32.mrb[161].mxu0  ;;  %v4495_v59 = vpop.f32.mrb[105].mxu1 }
 0x40f   : > { %v4416_v58 = vadd.f32 %v4415_v61, %v4414_v46  ;;  %v4496_v50 = vadd.f32 %v4495_v59, %v4494_v2  ;;  %v4417_v3 = vpop.f32.mrb[162].mxu0  ;;  %v4497_v7 = vpop.f32.mrb[106].mxu1  ;;  %v3977_v2 = vld [vmem:[%s5680_s20 + $0x68] sm:$0xff] }
 0x410   : > { %v4418_v8 = vpop.f32.mrb[163].mxu0  ;;  %v4498_v29 = vpop.f32.mrb[107].mxu1 }
 0x411   : > { %v4836_v38 = vadd.f32 %v4416_v58, %v6485_v14  ;;  %v4419_v48 = vadd.f32 %v4418_v8, %v4417_v3  ;;  %v4499_v45 = vadd.f32 %v4498_v29, %v4497_v7  ;;  %v3980_v7 = vld [vmem:[%s5680_s20 + $0x80] sm:$0xff]  ;;  %v3983_v29 = vld [vmem:[%s5680_s20 + $0x98] sm:$0xff] }
 0x413   : > { %v4842_v12 = vadd.f32 %v4419_v48, %v6487_v36  ;;  %v6531_v5 = vadd.f32 %v4836_v38, %v4496_v50 }
 0x415   : > { %v4706_v0 = vpop.f32.mrb[60].mxu1  ;;  %v6534_v51 = vadd.f32 %v4842_v12, %v4499_v45  ;;  %v3981_v12 = vld [vmem:[%s5680_s20 + $0x88] sm:$0xff] }
 0x416   : > { %v4802_v42 = vadd.f32 %v6495_v35, %v4706_v0  ;;  %v3542_v9 = vpop.f32.mrb[61].mxu1 }
 0x417   : > { %v4805_v14 = vadd.f32 %v6489_v15, %v3542_v9  ;;  %v4707_v19 = vpop.f32.mrb[62].mxu1 }
 0x418   : > { %v3642_v36 = vadd.f32 %v4802_v42, %v3970_v63  ;;  %v4808_v17 = vadd.f32 %v6497_v53, %v4707_v19  ;;  %v3545_v6 = vpop.f32.mrb[63].mxu1 }
 0x419   : > { %v3640_v54 = vadd.f32 %v4805_v14, %v3968_v57  ;;  %v4811_v31 = vadd.f32 %v6491_v21, %v3545_v6 }
 0x41a   : > { %3658 = vst [vmem:[%s5933_s13 + $0x10] sm:$0xff] %v3642_v36  ;;  %v3643_v35 = vadd.f32 %v4808_v17, %v3971_v52 }
 0x41b   : > { %3656 = vst [vmem:[%s5933_s13] sm:$0xff] %v3640_v54  ;;  %v3641_v40 = vadd.f32 %v4811_v31, %v3969_v22 }
 0x41c   : > { %3659 = vst [vmem:[%s5933_s13 + $0x18] sm:$0xff] %v3643_v35 }
 0x41d   : > { %3657 = vst [vmem:[%s5933_s13 + $0x8] sm:$0xff] %v3641_v40  ;;  %v4710_v15 = vpop.f32.mrb[64].mxu1 }
 0x41e   : > { %v4814_v4 = vadd.f32 %v6507_v10, %v4710_v15  ;;  %v3558_v53 = vpop.f32.mrb[65].mxu1 }
 0x41f   : > { %v4817_v33 = vadd.f32 %v6501_v49, %v3558_v53  ;;  %v4711_v21 = vpop.f32.mrb[66].mxu1 }
 0x420   : > { %v3646_v20 = vadd.f32 %v4814_v4, %v3974_v28  ;;  %v4820_v1 = vadd.f32 %v6509_v18, %v4711_v21  ;;  %v3561_v41 = vpop.f32.mrb[67].mxu1 }
 0x421   : > { %v3644_v43 = vadd.f32 %v4817_v33, %v3972_v23  ;;  %v4823_v11 = vadd.f32 %v6503_v47, %v3561_v41 }
 0x422   : > { %3662 = vst [vmem:[%s5933_s13 + $0x30] sm:$0xff] %v3646_v20  ;;  %v3647_v10 = vadd.f32 %v4820_v1, %v3975_v37 }
 0x423   : > { %3660 = vst [vmem:[%s5933_s13 + $0x20] sm:$0xff] %v3644_v43  ;;  %v3645_v25 = vadd.f32 %v4823_v11, %v3973_v30 }
 0x424   : > { %3663 = vst [vmem:[%s5933_s13 + $0x38] sm:$0xff] %v3647_v10 }
 0x425   : > { %3661 = vst [vmem:[%s5933_s13 + $0x28] sm:$0xff] %v3645_v25  ;;  %v4714_v49 = vpop.f32.mrb[68].mxu1 }
 0x426   : > { %v4826_v18 = vadd.f32 %v6519_v32, %v4714_v49  ;;  %v3574_v27 = vpop.f32.mrb[69].mxu1 }
 0x427   : > { %v4829_v47 = vadd.f32 %v6513_v16, %v3574_v27  ;;  %v4715_v34 = vpop.f32.mrb[70].mxu1 }
 0x428   : > { %v3650_v13 = vadd.f32 %v4826_v18, %v3978_v62  ;;  %v4832_v60 = vadd.f32 %v6521_v39, %v4715_v34  ;;  %v3577_v46 = vpop.f32.mrb[71].mxu1  ;;  %v3982_v39 = vld [vmem:[%s5680_s20 + $0x90] sm:$0xff]  ;;  %s6595_s20 = scalar_lea.sflag [#allocation5], %s337_s9 }
 0x429   : > { %v3648_v61 = vadd.f32 %v4829_v47, %v3976_v44  ;;  %v4835_v59 = vadd.f32 %v6515_v26, %v3577_v46 }
 0x42a   : > { %3666 = vst [vmem:[%s5933_s13 + $0x50] sm:$0xff] %v3650_v13  ;;  %v3651_v32 = vadd.f32 %v4832_v60, %v3979_v24 }
 0x42b   : > { %3664 = vst [vmem:[%s5933_s13 + $0x40] sm:$0xff] %v3648_v61  ;;  %v3649_v16 = vadd.f32 %v4835_v59, %v3977_v2 }
 0x42c   : > { %3667 = vst [vmem:[%s5933_s13 + $0x58] sm:$0xff] %v3651_v32 }
 0x42d   : > { %3665 = vst [vmem:[%s5933_s13 + $0x48] sm:$0xff] %v3649_v16  ;;  %v4718_v58 = vpop.f32.mrb[72].mxu1 }
 0x42e   : > { %v4838_v50 = vadd.f32 %v6531_v5, %v4718_v58  ;;  %v3590_v3 = vpop.f32.mrb[73].mxu1 }
 0x42f   : > { %v4841_v26 = vadd.f32 %v6525_v56, %v3590_v3  ;;  %v4719_v8 = vpop.f32.mrb[74].mxu1 }
 0x430   : > { %v3654_v38 = vadd.f32 %v4838_v50, %v3982_v39  ;;  %v4844_v48 = vadd.f32 %v6534_v51, %v4719_v8  ;;  %v3593_v45 = vpop.f32.mrb[75].mxu1 }
 0x431   : > { %v3652_v0 = vadd.f32 %v4841_v26, %v3980_v7  ;;  %v4847_v5 = vadd.f32 %v6527_v55, %v3593_v45 }
 0x432   : > { %3670 = vst [vmem:[%s5933_s13 + $0x70] sm:$0xff] %v3654_v38  ;;  %v3655_v63 = vadd.f32 %v4844_v48, %v3983_v29 }
 0x433   : > { %3668 = vst [vmem:[%s5933_s13 + $0x60] sm:$0xff] %v3652_v0  ;;  %v3653_v56 = vadd.f32 %v4847_v5, %v3981_v12 }
 0x434   : > { %3671 = vst [vmem:[%s5933_s13 + $0x78] sm:$0xff] %v3655_v63 }
 0x435   : > { %3669 = vst [vmem:[%s5933_s13 + $0x68] sm:$0xff] %v3653_v56 }
 0x436   : > { %5279 = shalt.err (!%p5276_p12)
}
 0x437   : > { %s5280_s9 = scalar_lea.hbm %s6586_s6, 2048  ;;  %s5284_s12 = scalar_lea.hbm %s6704_s23, 8192 }
 0x438   : > { %p5281_p2 = scmp.ne.s32.totalorder %s6586_s6, %s5280_s9  ;;  %p5285_p0 = scmp.lt.u32.totalorder %s6586_s6, %s6704_s23 }
 0x439   : > { %p5286_p4 = scmp.lt.u32.totalorder %s5284_s12, %s5280_s9  ;;  %p5288_p3 = scmp.lt.u32.totalorder %s5280_s9, %s6586_s6 }
 0x43a   : > { %p5282_p6 = pnand %p5281_p2, %p6705_p13 }
 0x43b   : > { %p5287_p1 = por %p5286_p4, %p5285_p0 }
 0x43c   : > { %p5283_p10 = pneg %p5282_p6 }
 0x43d   : > { %p5289_p7 = por %p5288_p3, %p5287_p1 }
 0x43f   : > { %p5290_p9 = pnand %p5289_p7, %p5283_p10 }
 0x441   : > { %5293 = shalt.err (!%p5290_p9)
}
 0x442   : > { %s5406_s16 = smov 128   ;;  %s5407_s15 = smov 8  }
 0x443   : > { %4913 = dma.vmem_to_hbm [thread:$0]  (%p6705_p13), %s6588_s21, 2048, %s6586_s6, %s6595_s20, %s5406_s16, %s5406_s16, %s5407_s15  }
 0x444 PF: > { %s6706_s27 = sld [smem:[#allocation13_spill]]  ;;  %s6707_s22 = sld [smem:[#allocation17_spill]] }
 0x445   : > { %p4935_p11 = scmp.ge.s32.totalorder %s5392_s11, 2 }
 0x44a   : > { %s3704_s1 = sand.u32 1, %s6706_s27   ;;  %p6708_p5 = scmp.ne.s32.totalorder %s6707_s22, 0 }
 0x44b   : > { %s3705_s17 = scalar_lea.sflag [#allocation5], %s3704_s1 }
 0x44c   : > { %p4927_p8 = pnand %p4935_p11, %p6708_p5 }
 0x44e   : > { %5347 = dma.done.wait (!%p4927_p8), %s3705_s17, 2048  }
 0x44f   : > { %5349 = vsyncadd (!%p4927_p8), %s3705_s17, 4294965248  ;;  %s24_s11 = sadd.s32 1, %s5392_s11   ;;  %s6709_s30 = sld [smem:[#allocation15_spill]] }
 0x450   : > { %p21_p12 = scmp.ge.s32.totalorder %s24_s11, 6   ;;  %s6710_s9 = sld [smem:[#allocation18_spill]] }
 0x451   : > { %s6711_s24 = smov %s5356_s25  ;;  %s6712_s25 = smov %s5360_s26 }
 0x452   : > { %s6713_s26 = smov %s5623_s2  ;;  %s6714_s27 = smov %s5368_s28 }
 0x453   : > { %s6715_s28 = smov %s5372_s29  ;;  %s6716_s29 = smov %s5618_s8 }
 0x454   : > { %s6717_s8 = smov %s5388_s10  ;;  %s6718_s10 = smov %s6724_s7 }
 0x455   :  { %23 = sbr.rel (!%p21_p12) target bundleno = 15 (0xf), region = 127 }
 0x45c   :  { %3710 = vsyncpa [#allocation4], 1 }
 0x45d   :  { %3712 = vsyncpa [#allocation4 + $0x1], 1 }
 0x45e   :  { %3713 = vsyncpa [#allocation7], 1 }
 0x45f   :  { %3714 = vsyncpa [#allocation5], 1 }
 0x460   :  { %3716 = vsyncpa [#allocation5 + $0x1], 1 }

</bundles_post_ra>
